<compile_context>
chip_gen: v5e
topology: v5e:2x2
jax: 0.10.0
libtpu: 0.0.40
codegen_flags: <defaults>
</compile_context>

<pallas_src>
import functools

import jax
import jax.numpy as jnp
from jax.experimental import pallas as pl
from jax.experimental.pallas import tpu as pltpu


VMEM_LIMIT = 32 * 1024 * 1024  # explicit scoped-VMEM budget, safe on v5e/v6e/v7x


def _round_up(x, m):
    return ((x + m - 1) // m) * m


def _detect_num_tensorcores():
    # v7x has 2 TensorCores per chip; split tiles there so both get grid steps.
    try:
        kind = jax.devices()[0].device_kind.lower()
        if "v7" in kind:
            return 2
    except Exception:
        pass
    return 1


_NUM_TC = _detect_num_tensorcores()


def _pick_tile(dim, candidates):
    for c in candidates:
        if dim % c == 0:
            return c
    return dim


# ------------------------------------------------------------------ fused matmul

def _mm_k1_kernel(*refs, activation, has_residual):
    """Single-K-step matmul: dot + bias [+ residual] [+ activation], no scratch."""
    if has_residual:
        a_ref, b_ref, bias_ref, res_ref, o_ref = refs
    else:
        a_ref, b_ref, bias_ref, o_ref = refs
        res_ref = None
    out = jnp.dot(a_ref[...], b_ref[...], preferred_element_type=jnp.float32)
    out = out + bias_ref[...]
    if res_ref is not None:
        out = out + res_ref[...].astype(jnp.float32)
    if activation == "silu":
        out = out * jax.nn.sigmoid(out)
    elif activation == "sigmoid":
        out = jax.nn.sigmoid(out)
    o_ref[...] = out.astype(o_ref.dtype)


def _mm_acc_kernel(*refs, activation, has_residual):
    """K-tiled matmul with f32 VMEM accumulator (only used when K > 512)."""
    if has_residual:
        a_ref, b_ref, bias_ref, res_ref, o_ref, acc_ref = refs
    else:
        a_ref, b_ref, bias_ref, o_ref, acc_ref = refs
        res_ref = None
    k = pl.program_id(2)

    @pl.when(k == 0)
    def _():
        acc_ref[...] = jnp.zeros_like(acc_ref)

    acc_ref[...] += jnp.dot(a_ref[...], b_ref[...],
                            preferred_element_type=jnp.float32)

    @pl.when(k == pl.num_programs(2) - 1)
    def _():
        out = acc_ref[...] + bias_ref[...]
        if res_ref is not None:
            out = out + res_ref[...].astype(jnp.float32)
        if activation == "silu":
            out = out * jax.nn.sigmoid(out)
        elif activation == "sigmoid":
            out = jax.nn.sigmoid(out)
        o_ref[...] = out.astype(o_ref.dtype)


def matmul_fused(a, b, bias, residual=None, activation=None,
                 out_dtype=jnp.bfloat16):
    """o = act(a @ b + bias [+ residual]).

    `b` (K, Np) is a pre-formatted bf16 lane-dense weight, `bias` (1, Np) f32.
    Residual and activation are never requested together (residual path is linear).
    """
    assert residual is None or activation is None
    M, K = a.shape
    Kb, Np = b.shape
    assert K == Kb
    a = a.astype(jnp.bfloat16)

    tm = _pick_tile(M, (256, 128, 64, 32, 16, 8))
    tn = _pick_tile(Np, (256, 128))
    if _NUM_TC > 1 and (M // tm) * (Np // tn) < 2:
        # Make sure both v7x TensorCores get at least one "parallel" step.
        if tn > 128:
            tn //= 2
        elif tm >= 16:
            tm //= 2

    has_res = residual is not None
    inputs = [a, b, bias]

    if K <= 512:
        in_specs = [
            pl.BlockSpec((tm, K), lambda i, j: (i, 0)),
            pl.BlockSpec((K, tn), lambda i, j: (0, j)),
            pl.BlockSpec((1, tn), lambda i, j: (0, j)),
        ]
        if has_res:
            inputs.append(residual.astype(jnp.bfloat16))
            in_specs.append(pl.BlockSpec((tm, tn), lambda i, j: (i, j)))
        return pl.pallas_call(
            functools.partial(_mm_k1_kernel, activation=activation,
                              has_residual=has_res),
            out_shape=jax.ShapeDtypeStruct((M, Np), out_dtype),
            grid=(M // tm, Np // tn),
            in_specs=in_specs,
            out_specs=pl.BlockSpec((tm, tn), lambda i, j: (i, j)),
            compiler_params=pltpu.CompilerParams(
                dimension_semantics=("parallel", "parallel"),
                vmem_limit_bytes=VMEM_LIMIT),
        )(*inputs)

    # K-tiled accumulator path (real-b3 sized reductions).
    tk = _pick_tile(K, (512, 256, 128))
    in_specs = [
        pl.BlockSpec((tm, tk), lambda i, j, k: (i, k)),
        pl.BlockSpec((tk, tn), lambda i, j, k: (k, j)),
        pl.BlockSpec((1, tn), lambda i, j, k: (0, j)),
    ]
    if has_res:
        inputs.append(residual.astype(jnp.bfloat16))
        in_specs.append(pl.BlockSpec((tm, tn), lambda i, j, k: (i, j)))
    return pl.pallas_call(
        functools.partial(_mm_acc_kernel, activation=activation,
                          has_residual=has_res),
        out_shape=jax.ShapeDtypeStruct((M, Np), out_dtype),
        grid=(M // tm, Np // tn, K // tk),
        in_specs=in_specs,
        out_specs=pl.BlockSpec((tm, tn), lambda i, j, k: (i, j)),
        scratch_shapes=[pltpu.VMEM((tm, tn), jnp.float32)],
        compiler_params=pltpu.CompilerParams(
            dimension_semantics=("parallel", "parallel", "arbitrary"),
            vmem_limit_bytes=VMEM_LIMIT),
    )(*inputs)


# ------------------------------------------------------------------ depthwise conv + fused GAP

def _dwconv_gap_kernel(x_ref, w_ref, b_ref, o_ref, p_ref, *, H, W):
    # x_ref: (1, H+2, W+2, C) bf16 ; w_ref: (9, C) f32 ; b_ref: (1, C) f32
    x = x_ref[...]                                  # stays bf16; taps cast per-window
    w = w_ref[...]
    C = x.shape[-1]
    acc = jnp.zeros((1, H, W, C), jnp.float32)
    for ky in range(3):
        for kx in range(3):
            tap = x[:, ky:ky + H, kx:kx + W, :].astype(jnp.float32)
            acc = acc + tap * w[ky * 3 + kx][None, None, None, :]
    acc = acc + b_ref[...].reshape(1, 1, 1, C)
    acc = acc * jax.nn.sigmoid(acc)                 # fused SiLU (BN folded into w/b)
    o_ref[...] = acc.astype(o_ref.dtype)
    # Fused global-average-pool (SE squeeze) while the block is still in VMEM.
    p_ref[...] = jnp.mean(acc, axis=(1, 2)).reshape(1, 1, C)


def dwconv3x3_silu_gap(x, w, b):
    """Depthwise 3x3 stride-1 conv + bias + SiLU, plus fused per-image channel mean."""
    B, H, W, C = x.shape
    # TODO(synk): at real-b3 feature-map sizes this should be row-tiled with a 2-row
    # halo handled via the index_map instead of a whole-image block + host-side pad.
    xp = jnp.pad(x, ((0, 0), (1, 1), (1, 1), (0, 0)))
    out, pooled = pl.pallas_call(
        functools.partial(_dwconv_gap_kernel, H=H, W=W),
        out_shape=(jax.ShapeDtypeStruct((B, H, W, C), jnp.bfloat16),
                   jax.ShapeDtypeStruct((B, 1, C), jnp.float32)),
        grid=(B,),
        in_specs=[
            pl.BlockSpec((1, H + 2, W + 2, C), lambda bi: (bi, 0, 0, 0)),
            pl.BlockSpec((9, C), lambda bi: (0, 0)),
            pl.BlockSpec((1, C), lambda bi: (0, 0)),
        ],
        out_specs=(pl.BlockSpec((1, H, W, C), lambda bi: (bi, 0, 0, 0)),
                   pl.BlockSpec((1, 1, C), lambda bi: (bi, 0, 0))),
        compiler_params=pltpu.CompilerParams(
            dimension_semantics=("parallel",), vmem_limit_bytes=VMEM_LIMIT),
    )(xp, w, b)
    return out, pooled


# ------------------------------------------------------------------ fused squeeze-excite MLP

def _se_kernel(p_ref, w1_ref, b1_ref, w2_ref, b2_ref, g_ref):
    B = p_ref.shape[0]
    C = p_ref.shape[-1]
    p = p_ref[...].reshape(B, C).astype(jnp.bfloat16)
    s = jnp.dot(p, w1_ref[...], preferred_element_type=jnp.float32) + b1_ref[...]
    s = s * jax.nn.sigmoid(s)
    g = jnp.dot(s.astype(jnp.bfloat16), w2_ref[...],
                preferred_element_type=jnp.float32) + b2_ref[...]
    g_ref[...] = jax.nn.sigmoid(g).reshape(B, 1, -1)   # gate stays f32


def se_gate(pooled, w1, b1, w2, b2):
    """pooled (B,1,C) f32 -> sigmoid(silu(pooled @ w1 + b1) @ w2 + b2), (B,1,C) f32."""
    B, _, C = pooled.shape
    return pl.pallas_call(
        _se_kernel,
        out_shape=jax.ShapeDtypeStruct((B, 1, C), jnp.float32),
        compiler_params=pltpu.CompilerParams(vmem_limit_bytes=VMEM_LIMIT),
    )(pooled, w1, b1, w2, b2)


# ------------------------------------------------------------------ projection with fused SE scaling + residual

def _proj_kernel(a_ref, g_ref, w_ref, bias_ref, res_ref, o_ref):
    # a: (HW, K) bf16, g: (1, 1, K) f32 per-image gate, w: (K, tn) bf16
    gate = g_ref[...].reshape(1, -1)
    a = a_ref[...].astype(jnp.float32) * gate            # SE channel scaling in f32
    out = jnp.dot(a.astype(jnp.bfloat16), w_ref[...],
                  preferred_element_type=jnp.float32)
    out = out + bias_ref[...] + res_ref[...].astype(jnp.float32)
    o_ref[...] = out.astype(o_ref.dtype)


def project_scaled(a, gate, w, bias, residual, hw):
    """1x1 projection conv with the SE gate and residual add fused in."""
    M, K = a.shape
    Kw, Np = w.shape
    assert K == Kw and M % hw == 0
    B = M // hw
    tn = _pick_tile(Np, (256, 128))
    return pl.pallas_call(
        _proj_kernel,
        out_shape=jax.ShapeDtypeStruct((M, Np), jnp.bfloat16),
        grid=(B, Np // tn),
        in_specs=[
            pl.BlockSpec((hw, K), lambda bi, j: (bi, 0)),
            pl.BlockSpec((1, 1, K), lambda bi, j: (bi, 0, 0)),
            pl.BlockSpec((K, tn), lambda bi, j: (0, j)),
            pl.BlockSpec((1, tn), lambda bi, j: (0, j)),
            pl.BlockSpec((hw, tn), lambda bi, j: (bi, j)),
        ],
        out_specs=pl.BlockSpec((hw, tn), lambda bi, j: (bi, j)),
        compiler_params=pltpu.CompilerParams(
            dimension_semantics=("parallel", "parallel"),
            vmem_limit_bytes=VMEM_LIMIT),
    )(a, gate, w, bias, residual)


# ------------------------------------------------------------------ head conv + SiLU + fused GAP

def _head_gap_kernel(a_ref, w_ref, bias_ref, o_ref):
    out = jnp.dot(a_ref[...], w_ref[...],
                  preferred_element_type=jnp.float32) + bias_ref[...]
    out = out * jax.nn.sigmoid(out)
    o_ref[...] = jnp.mean(out, axis=0, keepdims=True).reshape(1, 1, -1)


def head_gap(a, w, bias, batch, hw):
    """head 1x1 conv + SiLU + global-average-pool; only the pooled means hit HBM."""
    M, K = a.shape
    Kw, Np = w.shape
    assert K == Kw and M == batch * hw
    out = pl.pallas_call(
        _head_gap_kernel,
        out_shape=jax.ShapeDtypeStruct((batch, 1, Np), jnp.float32),
        grid=(batch,),
        in_specs=[
            pl.BlockSpec((hw, K), lambda bi: (bi, 0)),
            pl.BlockSpec((K, Np), lambda bi: (0, 0)),
            pl.BlockSpec((1, Np), lambda bi: (0, 0)),
        ],
        out_specs=pl.BlockSpec((1, 1, Np), lambda bi: (bi, 0, 0)),
        compiler_params=pltpu.CompilerParams(
            dimension_semantics=("parallel",), vmem_limit_bytes=VMEM_LIMIT),
    )(a, w, bias)
    return out.reshape(batch, Np)


# ------------------------------------------------------------------ glue

def im2col(x, ksize=3, stride=2, pad=1):
    """Only used for the 3-channel stem (27-wide K -> negligible expansion)."""
    B, H, W, C = x.shape
    xp = jnp.pad(x, ((0, 0), (pad, pad), (pad, pad), (0, 0)))
    Ho = (H + 2 * pad - ksize) // stride + 1
    Wo = (W + 2 * pad - ksize) // stride + 1
    cols = []
    for i in range(ksize):
        for j in range(ksize):
            cols.append(xp[:, i:i + Ho * stride:stride, j:j + Wo * stride:stride, :])
    patches = jnp.concatenate(cols, axis=-1)             # (B, Ho, Wo, k*k*C)
    return patches.reshape(B * Ho * Wo, ksize * ksize * C), (B, Ho, Wo)


# ------------------------------------------------------------------ model config / params

C_IN = 3
C0 = 128          # stem / block channels (lane-dense; reduced-scale stand-in)
C_MID = 256       # expanded channels
SE_H = 128        # squeeze-excite hidden (lane-dense width)
C_HEAD = 256      # head channels (real b3: 1536)
FEAT = 1000       # backbone classifier output features
NUM_CLASSES = 50
NUM_BLOCKS = 2


def init_params(seed=42):
    """Weights are pre-cast to bf16 and pre-padded to lane-dense layout ONCE here."""
    key = jax.random.PRNGKey(seed)
    keys = iter(jax.random.split(key, 64))
    n = lambda shp, s=0.05: (s * jax.random.normal(next(keys), shp)).astype(jnp.float32)

    def fmt_w(w):                       # (K, N) -> bf16, N padded to a multiple of 128
        K, N = w.shape
        Np = _round_up(N, 128)
        return jnp.pad(w, ((0, 0), (0, Np - N))).astype(jnp.bfloat16)

    def fmt_b(b):                       # (N,) -> (1, Np) f32
        N = b.shape[0]
        Np = _round_up(N, 128)
        return jnp.pad(b, (0, Np - N)).reshape(1, Np).astype(jnp.float32)

    blocks = []
    for _ in range(NUM_BLOCKS):
        blocks.append({
            "exp_w": fmt_w(n((C0, C_MID))), "exp_b": fmt_b(n((C_MID,))),
            "dw_w": n((9, C_MID)), "dw_b": n((C_MID,)).reshape(1, C_MID),
            "se1_w": fmt_w(n((C_MID, SE_H))), "se1_b": fmt_b(n((SE_H,))),
            "se2_w": fmt_w(n((SE_H, C_MID))), "se2_b": fmt_b(n((C_MID,))),
            "proj_w": fmt_w(n((C_MID, C0))), "proj_b": fmt_b(n((C0,))),
        })

    # backbone fc (C_HEAD -> 1000) followed by classifier Linear(1000 -> num_classes);
    # no nonlinearity between them (dropout = identity in eval) -> fold offline.
    fc_w, fc_b = n((C_HEAD, FEAT)), n((FEAT,))
    cls_w, cls_b = n((FEAT, NUM_CLASSES)), n((NUM_CLASSES,))
    clsf_w = fc_w @ cls_w
    clsf_b = fc_b @ cls_w + cls_b

    return {
        "stem_w": fmt_w(n((9 * C_IN, C0))), "stem_b": fmt_b(n((C0,))),
        "blocks": blocks,
        "head_w": fmt_w(n((C0, C_HEAD))), "head_b": fmt_b(n((C_HEAD,))),
        "clsf_w": fmt_w(clsf_w), "clsf_b": fmt_b(clsf_b),
    }


# ------------------------------------------------------------------ forward

def efficientnet_b3_forward(x_nchw, p):
    # NCHW -> NHWC
    x = jnp.transpose(x_nchw, (0, 2, 3, 1)).astype(jnp.bfloat16)

    # ---- stem: 3x3 s2 conv (BN folded) + SiLU, via im2col on the 3-ch input
    patches, (B, H, W) = im2col(x, ksize=3, stride=2, pad=1)
    h = matmul_fused(patches, p["stem_w"], p["stem_b"], activation="silu")  # (B*H*W, C0)

    # ---- MBConv blocks (expand 1x1 -> dw3x3 [+GAP] -> SE MLP -> scaled project 1x1 + residual)
    for blk in p["blocks"]:
        x_in = h
        e = matmul_fused(x_in, blk["exp_w"], blk["exp_b"], activation="silu")   # (BHW, C_MID)
        d, pooled = dwconv3x3_silu_gap(e.reshape(B, H, W, C_MID),
                                       blk["dw_w"], blk["dw_b"])
        gate = se_gate(pooled, blk["se1_w"], blk["se1_b"],
                       blk["se2_w"], blk["se2_b"])                              # (B,1,C_MID) f32
        h = project_scaled(d.reshape(B * H * W, C_MID), gate,
                           blk["proj_w"], blk["proj_b"], x_in, hw=H * W)        # (BHW, C0)

    # ---- head 1x1 conv + SiLU + global average pool, fused (pooled means only)
    feat = head_gap(h, p["head_w"], p["head_b"], batch=B, hw=H * W)             # (B, C_HEAD) f32

    # ---- folded (backbone fc -> 1000 -> classifier) single matmul, f32 logits
    logits_p = matmul_fused(feat, p["clsf_w"], p["clsf_b"],
                            out_dtype=jnp.float32)                              # (B, 128 padded)
    return logits_p[:, :NUM_CLASSES]                                            # single final slice


# ------------------------------------------------------------------ main

if __name__ == "__main__":
    params = init_params(seed=42)
    x = jax.random.normal(jax.random.PRNGKey(0), (2, C_IN, 16, 16), dtype=jnp.float32)
    fwd = jax.jit(efficientnet_b3_forward)
    out = fwd(x, params)
    out = jax.block_until_ready(out)
    assert out.shape == (2, NUM_CLASSES), out.shape
    assert bool(jnp.all(jnp.isfinite(out)))
    print("KERNEL_OK")
</pallas_src>

<mosaic_0001>
module attributes {stable_mosaic.version = 11 : i64} {
  func.func @_mm_k1_kernel(%arg0: i32, %arg1: i32, %arg2: memref<128x27xbf16, #tpu.memory_space<vmem>>, %arg3: memref<27x128xbf16, #tpu.memory_space<vmem>>, %arg4: memref<1x128xf32, #tpu.memory_space<vmem>>, %arg5: memref<128x128xbf16, #tpu.memory_space<vmem>>) attributes {dimension_semantics = [#tpu.dimension_semantics<parallel>, #tpu.dimension_semantics<parallel>], iteration_bounds = array<i64: 1, 1>, scalar_prefetch = 0 : i64, scratch_operands = 0 : i64, tpu.core_type = #tpu.core_type<tc>, window_params = [{transform_indices = @transform_0, window_bounds = array<i64: 128, 27>}, {transform_indices = @transform_1, window_bounds = array<i64: 27, 128>}, {transform_indices = @transform_2, window_bounds = array<i64: 1, 128>}, {transform_indices = @transform_3, window_bounds = array<i64: 128, 128>}]} {
    %c0 = arith.constant 0 : index
    %c0_0 = arith.constant 0 : index
    %0 = vector.load %arg2[%c0, %c0_0] : memref<128x27xbf16, #tpu.memory_space<vmem>>, vector<128x27xbf16>
    %c0_1 = arith.constant 0 : index
    %c0_2 = arith.constant 0 : index
    %1 = vector.load %arg3[%c0_1, %c0_2] : memref<27x128xbf16, #tpu.memory_space<vmem>>, vector<27x128xbf16>
    %cst = arith.constant dense<0.000000e+00> : vector<128x128xf32>
    %2 = tpu.matmul %0, %1, %cst {dimension_numbers = #tpu.dot_dimension_numbers<[1], [0], [0], [1], [0, 0, 1, 1], [], []>} : vector<128x27xbf16>, vector<27x128xbf16>, vector<128x128xf32> -> vector<128x128xf32>
    %c0_3 = arith.constant 0 : index
    %c0_4 = arith.constant 0 : index
    %3 = vector.load %arg4[%c0_3, %c0_4] : memref<1x128xf32, #tpu.memory_space<vmem>>, vector<1x128xf32>
    %4 = vector.broadcast %3 : vector<1x128xf32> to vector<128x128xf32>
    %5 = arith.addf %2, %4 : vector<128x128xf32>
    %6 = arith.negf %5 : vector<128x128xf32>
    %7 = math.exp %6 : vector<128x128xf32>
    %cst_5 = arith.constant 1.000000e+00 : f32
    %8 = vector.broadcast %cst_5 : f32 to vector<128x128xf32>
    %9 = arith.addf %8, %7 : vector<128x128xf32>
    %10 = arith.divf %8, %9 : vector<128x128xf32>
    %11 = arith.mulf %5, %10 : vector<128x128xf32>
    %12 = arith.truncf %11 : vector<128x128xf32> to vector<128x128xbf16>
    %c0_6 = arith.constant 0 : index
    %c0_7 = arith.constant 0 : index
    %13 = vector.load %arg5[%c0_6, %c0_7] : memref<128x128xbf16, #tpu.memory_space<vmem>>, vector<128x128xbf16>
    tpu.vector_store %arg5[%c0_6, %c0_7], %12 {strides = array<i32>} : memref<128x128xbf16, #tpu.memory_space<vmem>>, vector<128x128xbf16>,
    return
  }
  func.func @transform_0(%arg0: i32, %arg1: i32) -> (i32, i32) {
    %c0_i32 = arith.constant 0 : i32
    %c0_i32_0 = arith.constant 0 : i32
    return %arg0, %c0_i32 : i32, i32
  }
  func.func @transform_1(%arg0: i32, %arg1: i32) -> (i32, i32) {
    %c0_i32 = arith.constant 0 : i32
    %c0_i32_0 = arith.constant 0 : i32
    return %c0_i32, %arg1 : i32, i32
  }
  func.func @transform_2(%arg0: i32, %arg1: i32) -> (i32, i32) {
    %c0_i32 = arith.constant 0 : i32
    %c0_i32_0 = arith.constant 0 : i32
    return %c0_i32, %arg1 : i32, i32
  }
  func.func @transform_3(%arg0: i32, %arg1: i32) -> (i32, i32) {
    %c0_i32 = arith.constant 0 : i32
    return %arg0, %arg1 : i32, i32
  }
}

module attributes {stable_mosaic.version = 11 : i64} {
  func.func @_mm_k1_kernel(%arg0: i32, %arg1: i32, %arg2: memref<128x128xbf16, #tpu.memory_space<vmem>>, %arg3: memref<128x256xbf16, #tpu.memory_space<vmem>>, %arg4: memref<1x256xf32, #tpu.memory_space<vmem>>, %arg5: memref<128x256xbf16, #tpu.memory_space<vmem>>) attributes {dimension_semantics = [#tpu.dimension_semantics<parallel>, #tpu.dimension_semantics<parallel>], iteration_bounds = array<i64: 1, 1>, scalar_prefetch = 0 : i64, scratch_operands = 0 : i64, tpu.core_type = #tpu.core_type<tc>, window_params = [{transform_indices = @transform_0, window_bounds = array<i64: 128, 128>}, {transform_indices = @transform_1, window_bounds = array<i64: 128, 256>}, {transform_indices = @transform_2, window_bounds = array<i64: 1, 256>}, {transform_indices = @transform_3, window_bounds = array<i64: 128, 256>}]} {
    %c0 = arith.constant 0 : index
    %c0_0 = arith.constant 0 : index
    %0 = vector.load %arg2[%c0, %c0_0] : memref<128x128xbf16, #tpu.memory_space<vmem>>, vector<128x128xbf16>
    %c0_1 = arith.constant 0 : index
    %c0_2 = arith.constant 0 : index
    %1 = vector.load %arg3[%c0_1, %c0_2] : memref<128x256xbf16, #tpu.memory_space<vmem>>, vector<128x256xbf16>
    %cst = arith.constant dense<0.000000e+00> : vector<128x256xf32>
    %2 = tpu.matmul %0, %1, %cst {dimension_numbers = #tpu.dot_dimension_numbers<[1], [0], [0], [1], [0, 0, 1, 1], [], []>} : vector<128x128xbf16>, vector<128x256xbf16>, vector<128x256xf32> -> vector<128x256xf32>
    %c0_3 = arith.constant 0 : index
    %c0_4 = arith.constant 0 : index
    %3 = vector.load %arg4[%c0_3, %c0_4] : memref<1x256xf32, #tpu.memory_space<vmem>>, vector<1x256xf32>
    %4 = vector.broadcast %3 : vector<1x256xf32> to vector<128x256xf32>
    %5 = arith.addf %2, %4 : vector<128x256xf32>
    %6 = arith.negf %5 : vector<128x256xf32>
    %7 = math.exp %6 : vector<128x256xf32>
    %cst_5 = arith.constant 1.000000e+00 : f32
    %8 = vector.broadcast %cst_5 : f32 to vector<128x256xf32>
    %9 = arith.addf %8, %7 : vector<128x256xf32>
    %10 = arith.divf %8, %9 : vector<128x256xf32>
    %11 = arith.mulf %5, %10 : vector<128x256xf32>
    %12 = arith.truncf %11 : vector<128x256xf32> to vector<128x256xbf16>
    %c0_6 = arith.constant 0 : index
    %c0_7 = arith.constant 0 : index
    %13 = vector.load %arg5[%c0_6, %c0_7] : memref<128x256xbf16, #tpu.memory_space<vmem>>, vector<128x256xbf16>
    tpu.vector_store %arg5[%c0_6, %c0_7], %12 {strides = array<i32>} : memref<128x256xbf16, #tpu.memory_space<vmem>>, vector<128x256xbf16>,
    return
  }
  func.func @transform_0(%arg0: i32, %arg1: i32) -> (i32, i32) {
    %c0_i32 = arith.constant 0 : i32
    %c0_i32_0 = arith.constant 0 : i32
    return %arg0, %c0_i32 : i32, i32
  }
  func.func @transform_1(%arg0: i32, %arg1: i32) -> (i32, i32) {
    %c0_i32 = arith.constant 0 : i32
    %c0_i32_0 = arith.constant 0 : i32
    return %c0_i32, %arg1 : i32, i32
  }
  func.func @transform_2(%arg0: i32, %arg1: i32) -> (i32, i32) {
    %c0_i32 = arith.constant 0 : i32
    %c0_i32_0 = arith.constant 0 : i32
    return %c0_i32, %arg1 : i32, i32
  }
  func.func @transform_3(%arg0: i32, %arg1: i32) -> (i32, i32) {
    %c0_i32 = arith.constant 0 : i32
    return %arg0, %arg1 : i32, i32
  }
}

module attributes {stable_mosaic.version = 11 : i64} {
  func.func @_dwconv_gap_kernel(%arg0: i32, %arg1: memref<1x10x10x256xbf16, #tpu.memory_space<vmem>>, %arg2: memref<9x256xf32, #tpu.memory_space<vmem>>, %arg3: memref<1x256xf32, #tpu.memory_space<vmem>>, %arg4: memref<1x8x8x256xbf16, #tpu.memory_space<vmem>>, %arg5: memref<1x1x256xf32, #tpu.memory_space<vmem>>) attributes {dimension_semantics = [#tpu.dimension_semantics<parallel>], iteration_bounds = array<i64: 2>, scalar_prefetch = 0 : i64, scratch_operands = 0 : i64, tpu.core_type = #tpu.core_type<tc>, window_params = [{transform_indices = @transform_0, window_bounds = array<i64: 1, 10, 10, 256>}, {pipeline_mode = #tpu.pipeline_mode<synchronous>, transform_indices = @transform_1, window_bounds = array<i64: 9, 256>}, {pipeline_mode = #tpu.pipeline_mode<synchronous>, transform_indices = @transform_2, window_bounds = array<i64: 1, 256>}, {transform_indices = @transform_3, window_bounds = array<i64: 1, 8, 8, 256>}, {transform_indices = @transform_4, window_bounds = array<i64: 1, 1, 256>}]} {
    %c0 = arith.constant 0 : index
    %c0_0 = arith.constant 0 : index
    %c0_1 = arith.constant 0 : index
    %c0_2 = arith.constant 0 : index
    %0 = vector.load %arg1[%c0, %c0_0, %c0_1, %c0_2] : memref<1x10x10x256xbf16, #tpu.memory_space<vmem>>, vector<1x10x10x256xbf16>
    %c0_3 = arith.constant 0 : index
    %c0_4 = arith.constant 0 : index
    %1 = vector.load %arg2[%c0_3, %c0_4] : memref<9x256xf32, #tpu.memory_space<vmem>>, vector<9x256xf32>
    %cst = arith.constant 0.000000e+00 : f32
    %2 = vector.broadcast %cst : f32 to vector<1x8x8x256xf32>
    %3 = vector.extract_strided_slice %0 {offsets = [0, 0, 0, 0], sizes = [1, 8, 8, 256], strides = [1, 1, 1, 1]} : vector<1x10x10x256xbf16> to vector<1x8x8x256xbf16>
    %4 = arith.extf %3 : vector<1x8x8x256xbf16> to vector<1x8x8x256xf32>
    %5 = vector.extract_strided_slice %1 {offsets = [0, 0], sizes = [1, 256], strides = [1, 1]} : vector<9x256xf32> to vector<1x256xf32>
    %6 = vector.shape_cast %5 : vector<1x256xf32> to vector<256xf32>
    %7 = vector.shape_cast %6 : vector<256xf32> to vector<1x1x1x256xf32>
    %8 = vector.broadcast %7 : vector<1x1x1x256xf32> to vector<1x8x8x256xf32>
    %9 = arith.mulf %4, %8 : vector<1x8x8x256xf32>
    %10 = arith.addf %2, %9 : vector<1x8x8x256xf32>
    %11 = vector.extract_strided_slice %0 {offsets = [0, 0, 1, 0], sizes = [1, 8, 8, 256], strides = [1, 1, 1, 1]} : vector<1x10x10x256xbf16> to vector<1x8x8x256xbf16>
    %12 = arith.extf %11 : vector<1x8x8x256xbf16> to vector<1x8x8x256xf32>
    %13 = vector.extract_strided_slice %1 {offsets = [1, 0], sizes = [1, 256], strides = [1, 1]} : vector<9x256xf32> to vector<1x256xf32>
    %14 = vector.shape_cast %13 : vector<1x256xf32> to vector<256xf32>
    %15 = vector.shape_cast %14 : vector<256xf32> to vector<1x1x1x256xf32>
    %16 = vector.broadcast %15 : vector<1x1x1x256xf32> to vector<1x8x8x256xf32>
    %17 = arith.mulf %12, %16 : vector<1x8x8x256xf32>
    %18 = arith.addf %10, %17 : vector<1x8x8x256xf32>
    %19 = vector.extract_strided_slice %0 {offsets = [0, 0, 2, 0], sizes = [1, 8, 8, 256], strides = [1, 1, 1, 1]} : vector<1x10x10x256xbf16> to vector<1x8x8x256xbf16>
    %20 = arith.extf %19 : vector<1x8x8x256xbf16> to vector<1x8x8x256xf32>
    %21 = vector.extract_strided_slice %1 {offsets = [2, 0], sizes = [1, 256], strides = [1, 1]} : vector<9x256xf32> to vector<1x256xf32>
    %22 = vector.shape_cast %21 : vector<1x256xf32> to vector<256xf32>
    %23 = vector.shape_cast %22 : vector<256xf32> to vector<1x1x1x256xf32>
    %24 = vector.broadcast %23 : vector<1x1x1x256xf32> to vector<1x8x8x256xf32>
    %25 = arith.mulf %20, %24 : vector<1x8x8x256xf32>
    %26 = arith.addf %18, %25 : vector<1x8x8x256xf32>
    %27 = vector.extract_strided_slice %0 {offsets = [0, 1, 0, 0], sizes = [1, 8, 8, 256], strides = [1, 1, 1, 1]} : vector<1x10x10x256xbf16> to vector<1x8x8x256xbf16>
    %28 = arith.extf %27 : vector<1x8x8x256xbf16> to vector<1x8x8x256xf32>
    %29 = vector.extract_strided_slice %1 {offsets = [3, 0], sizes = [1, 256], strides = [1, 1]} : vector<9x256xf32> to vector<1x256xf32>
    %30 = vector.shape_cast %29 : vector<1x256xf32> to vector<256xf32>
    %31 = vector.shape_cast %30 : vector<256xf32> to vector<1x1x1x256xf32>
    %32 = vector.broadcast %31 : vector<1x1x1x256xf32> to vector<1x8x8x256xf32>
    %33 = arith.mulf %28, %32 : vector<1x8x8x256xf32>
    %34 = arith.addf %26, %33 : vector<1x8x8x256xf32>
    %35 = vector.extract_strided_slice %0 {offsets = [0, 1, 1, 0], sizes = [1, 8, 8, 256], strides = [1, 1, 1, 1]} : vector<1x10x10x256xbf16> to vector<1x8x8x256xbf16>
    %36 = arith.extf %35 : vector<1x8x8x256xbf16> to vector<1x8x8x256xf32>
    %37 = vector.extract_strided_slice %1 {offsets = [4, 0], sizes = [1, 256], strides = [1, 1]} : vector<9x256xf32> to vector<1x256xf32>
    %38 = vector.shape_cast %37 : vector<1x256xf32> to vector<256xf32>
    %39 = vector.shape_cast %38 : vector<256xf32> to vector<1x1x1x256xf32>
    %40 = vector.broadcast %39 : vector<1x1x1x256xf32> to vector<1x8x8x256xf32>
    %41 = arith.mulf %36, %40 : vector<1x8x8x256xf32>
    %42 = arith.addf %34, %41 : vector<1x8x8x256xf32>
    %43 = vector.extract_strided_slice %0 {offsets = [0, 1, 2, 0], sizes = [1, 8, 8, 256], strides = [1, 1, 1, 1]} : vector<1x10x10x256xbf16> to vector<1x8x8x256xbf16>
    %44 = arith.extf %43 : vector<1x8x8x256xbf16> to vector<1x8x8x256xf32>
    %45 = vector.extract_strided_slice %1 {offsets = [5, 0], sizes = [1, 256], strides = [1, 1]} : vector<9x256xf32> to vector<1x256xf32>
    %46 = vector.shape_cast %45 : vector<1x256xf32> to vector<256xf32>
    %47 = vector.shape_cast %46 : vector<256xf32> to vector<1x1x1x256xf32>
    %48 = vector.broadcast %47 : vector<1x1x1x256xf32> to vector<1x8x8x256xf32>
    %49 = arith.mulf %44, %48 : vector<1x8x8x256xf32>
    %50 = arith.addf %42, %49 : vector<1x8x8x256xf32>
    %51 = vector.extract_strided_slice %0 {offsets = [0, 2, 0, 0], sizes = [1, 8, 8, 256], strides = [1, 1, 1, 1]} : vector<1x10x10x256xbf16> to vector<1x8x8x256xbf16>
    %52 = arith.extf %51 : vector<1x8x8x256xbf16> to vector<1x8x8x256xf32>
    %53 = vector.extract_strided_slice %1 {offsets = [6, 0], sizes = [1, 256], strides = [1, 1]} : vector<9x256xf32> to vector<1x256xf32>
    %54 = vector.shape_cast %53 : vector<1x256xf32> to vector<256xf32>
    %55 = vector.shape_cast %54 : vector<256xf32> to vector<1x1x1x256xf32>
    %56 = vector.broadcast %55 : vector<1x1x1x256xf32> to vector<1x8x8x256xf32>
    %57 = arith.mulf %52, %56 : vector<1x8x8x256xf32>
    %58 = arith.addf %50, %57 : vector<1x8x8x256xf32>
    %59 = vector.extract_strided_slice %0 {offsets = [0, 2, 1, 0], sizes = [1, 8, 8, 256], strides = [1, 1, 1, 1]} : vector<1x10x10x256xbf16> to vector<1x8x8x256xbf16>
    %60 = arith.extf %59 : vector<1x8x8x256xbf16> to vector<1x8x8x256xf32>
    %61 = vector.extract_strided_slice %1 {offsets = [7, 0], sizes = [1, 256], strides = [1, 1]} : vector<9x256xf32> to vector<1x256xf32>
    %62 = vector.shape_cast %61 : vector<1x256xf32> to vector<256xf32>
    %63 = vector.shape_cast %62 : vector<256xf32> to vector<1x1x1x256xf32>
    %64 = vector.broadcast %63 : vector<1x1x1x256xf32> to vector<1x8x8x256xf32>
    %65 = arith.mulf %60, %64 : vector<1x8x8x256xf32>
    %66 = arith.addf %58, %65 : vector<1x8x8x256xf32>
    %67 = vector.extract_strided_slice %0 {offsets = [0, 2, 2, 0], sizes = [1, 8, 8, 256], strides = [1, 1, 1, 1]} : vector<1x10x10x256xbf16> to vector<1x8x8x256xbf16>
    %68 = arith.extf %67 : vector<1x8x8x256xbf16> to vector<1x8x8x256xf32>
    %69 = vector.extract_strided_slice %1 {offsets = [8, 0], sizes = [1, 256], strides = [1, 1]} : vector<9x256xf32> to vector<1x256xf32>
    %70 = vector.shape_cast %69 : vector<1x256xf32> to vector<256xf32>
    %71 = vector.shape_cast %70 : vector<256xf32> to vector<1x1x1x256xf32>
    %72 = vector.broadcast %71 : vector<1x1x1x256xf32> to vector<1x8x8x256xf32>
    %73 = arith.mulf %68, %72 : vector<1x8x8x256xf32>
    %74 = arith.addf %66, %73 : vector<1x8x8x256xf32>
    %c0_5 = arith.constant 0 : index
    %c0_6 = arith.constant 0 : index
    %75 = vector.load %arg3[%c0_5, %c0_6] : memref<1x256xf32, #tpu.memory_space<vmem>>, vector<1x256xf32>
    %76 = vector.shape_cast %75 : vector<1x256xf32> to vector<1x1x1x256xf32>
    %77 = vector.broadcast %76 : vector<1x1x1x256xf32> to vector<1x8x8x256xf32>
    %78 = arith.addf %74, %77 : vector<1x8x8x256xf32>
    %79 = arith.negf %78 : vector<1x8x8x256xf32>
    %80 = math.exp %79 : vector<1x8x8x256xf32>
    %cst_7 = arith.constant 1.000000e+00 : f32
    %81 = vector.broadcast %cst_7 : f32 to vector<1x8x8x256xf32>
    %82 = arith.addf %81, %80 : vector<1x8x8x256xf32>
    %83 = arith.divf %81, %82 : vector<1x8x8x256xf32>
    %84 = arith.mulf %78, %83 : vector<1x8x8x256xf32>
    %85 = arith.truncf %84 : vector<1x8x8x256xf32> to vector<1x8x8x256xbf16>
    %c0_8 = arith.constant 0 : index
    %c0_9 = arith.constant 0 : index
    %c0_10 = arith.constant 0 : index
    %c0_11 = arith.constant 0 : index
    %86 = vector.load %arg4[%c0_8, %c0_9, %c0_10, %c0_11] : memref<1x8x8x256xbf16, #tpu.memory_space<vmem>>, vector<1x8x8x256xbf16>
    tpu.vector_store %arg4[%c0_8, %c0_9, %c0_10, %c0_11], %85 {strides = array<i32>} : memref<1x8x8x256xbf16, #tpu.memory_space<vmem>>, vector<1x8x8x256xbf16>,
    %cst_12 = arith.constant dense<0.000000e+00> : vector<1x256xf32>
    %87 = vector.multi_reduction <add>, %84, %cst_12 [1, 2] : vector<1x8x8x256xf32> to vector<1x256xf32>
    %cst_13 = arith.constant 6.400000e+01 : f32
    %88 = vector.broadcast %cst_13 : f32 to vector<1x256xf32>
    %89 = arith.divf %87, %88 : vector<1x256xf32>
    %90 = vector.shape_cast %89 : vector<1x256xf32> to vector<1x1x256xf32>
    %c0_14 = arith.constant 0 : index
    %c0_15 = arith.constant 0 : index
    %c0_16 = arith.constant 0 : index
    %91 = vector.load %arg5[%c0_14, %c0_15, %c0_16] : memref<1x1x256xf32, #tpu.memory_space<vmem>>, vector<1x1x256xf32>
    tpu.vector_store %arg5[%c0_14, %c0_15, %c0_16], %90 {strides = array<i32>} : memref<1x1x256xf32, #tpu.memory_space<vmem>>, vector<1x1x256xf32>,
    return
  }
  func.func @transform_0(%arg0: i32) -> (i32, i32, i32, i32) {
    %c0_i32 = arith.constant 0 : i32
    %c0_i32_0 = arith.constant 0 : i32
    %c0_i32_1 = arith.constant 0 : i32
    %c0_i32_2 = arith.constant 0 : i32
    return %arg0, %c0_i32, %c0_i32_0, %c0_i32_1 : i32, i32, i32, i32
  }
  func.func @transform_1(%arg0: i32) -> (i32, i32) {
    %c0_i32 = arith.constant 0 : i32
    %c0_i32_0 = arith.constant 0 : i32
    %c0_i32_1 = arith.constant 0 : i32
    return %c0_i32, %c0_i32_0 : i32, i32
  }
  func.func @transform_2(%arg0: i32) -> (i32, i32) {
    %c0_i32 = arith.constant 0 : i32
    %c0_i32_0 = arith.constant 0 : i32
    %c0_i32_1 = arith.constant 0 : i32
    return %c0_i32, %c0_i32_0 : i32, i32
  }
  func.func @transform_3(%arg0: i32) -> (i32, i32, i32, i32) {
    %c0_i32 = arith.constant 0 : i32
    %c0_i32_0 = arith.constant 0 : i32
    %c0_i32_1 = arith.constant 0 : i32
    %c0_i32_2 = arith.constant 0 : i32
    return %arg0, %c0_i32, %c0_i32_0, %c0_i32_1 : i32, i32, i32, i32
  }
  func.func @transform_4(%arg0: i32) -> (i32, i32, i32) {
    %c0_i32 = arith.constant 0 : i32
    %c0_i32_0 = arith.constant 0 : i32
    %c0_i32_1 = arith.constant 0 : i32
    return %arg0, %c0_i32, %c0_i32_0 : i32, i32, i32
  }
}

module attributes {stable_mosaic.version = 11 : i64} {
  func.func @_se_kernel(%arg0: memref<2x1x256xf32, #tpu.memory_space<vmem>>, %arg1: memref<256x128xbf16, #tpu.memory_space<vmem>>, %arg2: memref<1x128xf32, #tpu.memory_space<vmem>>, %arg3: memref<128x256xbf16, #tpu.memory_space<vmem>>, %arg4: memref<1x256xf32, #tpu.memory_space<vmem>>, %arg5: memref<2x1x256xf32, #tpu.memory_space<vmem>>) attributes {dimension_semantics = [], scalar_prefetch = 0 : i64, scratch_operands = 0 : i64, tpu.core_type = #tpu.core_type<tc>} {
    %c0 = arith.constant 0 : index
    %c0_0 = arith.constant 0 : index
    %c0_1 = arith.constant 0 : index
    %0 = vector.load %arg0[%c0, %c0_0, %c0_1] : memref<2x1x256xf32, #tpu.memory_space<vmem>>, vector<2x1x256xf32>
    %1 = vector.shape_cast %0 : vector<2x1x256xf32> to vector<2x256xf32>
    %2 = arith.truncf %1 : vector<2x256xf32> to vector<2x256xbf16>
    %c0_2 = arith.constant 0 : index
    %c0_3 = arith.constant 0 : index
    %3 = vector.load %arg1[%c0_2, %c0_3] : memref<256x128xbf16, #tpu.memory_space<vmem>>, vector<256x128xbf16>
    %cst = arith.constant dense<0.000000e+00> : vector<2x128xf32>
    %4 = tpu.matmul %2, %3, %cst {dimension_numbers = #tpu.dot_dimension_numbers<[1], [0], [0], [1], [0, 0, 1, 1], [], []>} : vector<2x256xbf16>, vector<256x128xbf16>, vector<2x128xf32> -> vector<2x128xf32>
    %c0_4 = arith.constant 0 : index
    %c0_5 = arith.constant 0 : index
    %5 = vector.load %arg2[%c0_4, %c0_5] : memref<1x128xf32, #tpu.memory_space<vmem>>, vector<1x128xf32>
    %6 = vector.broadcast %5 : vector<1x128xf32> to vector<2x128xf32>
    %7 = arith.addf %4, %6 : vector<2x128xf32>
    %8 = arith.negf %7 : vector<2x128xf32>
    %9 = math.exp %8 : vector<2x128xf32>
    %cst_6 = arith.constant 1.000000e+00 : f32
    %10 = vector.broadcast %cst_6 : f32 to vector<2x128xf32>
    %11 = arith.addf %10, %9 : vector<2x128xf32>
    %12 = arith.divf %10, %11 : vector<2x128xf32>
    %13 = arith.mulf %7, %12 : vector<2x128xf32>
    %14 = arith.truncf %13 : vector<2x128xf32> to vector<2x128xbf16>
    %c0_7 = arith.constant 0 : index
    %c0_8 = arith.constant 0 : index
    %15 = vector.load %arg3[%c0_7, %c0_8] : memref<128x256xbf16, #tpu.memory_space<vmem>>, vector<128x256xbf16>
    %cst_9 = arith.constant dense<0.000000e+00> : vector<2x256xf32>
    %16 = tpu.matmul %14, %15, %cst_9 {dimension_numbers = #tpu.dot_dimension_numbers<[1], [0], [0], [1], [0, 0, 1, 1], [], []>} : vector<2x128xbf16>, vector<128x256xbf16>, vector<2x256xf32> -> vector<2x256xf32>
    %c0_10 = arith.constant 0 : index
    %c0_11 = arith.constant 0 : index
    %17 = vector.load %arg4[%c0_10, %c0_11] : memref<1x256xf32, #tpu.memory_space<vmem>>, vector<1x256xf32>
    %18 = vector.broadcast %17 : vector<1x256xf32> to vector<2x256xf32>
    %19 = arith.addf %16, %18 : vector<2x256xf32>
    %20 = arith.negf %19 : vector<2x256xf32>
    %21 = math.exp %20 : vector<2x256xf32>
    %cst_12 = arith.constant 1.000000e+00 : f32
    %22 = vector.broadcast %cst_12 : f32 to vector<2x256xf32>
    %23 = arith.addf %22, %21 : vector<2x256xf32>
    %24 = arith.divf %22, %23 : vector<2x256xf32>
    %25 = vector.shape_cast %24 : vector<2x256xf32> to vector<2x1x256xf32>
    %c0_13 = arith.constant 0 : index
    %c0_14 = arith.constant 0 : index
    %c0_15 = arith.constant 0 : index
    %26 = vector.load %arg5[%c0_13, %c0_14, %c0_15] : memref<2x1x256xf32, #tpu.memory_space<vmem>>, vector<2x1x256xf32>
    tpu.vector_store %arg5[%c0_13, %c0_14, %c0_15], %25 {strides = array<i32>} : memref<2x1x256xf32, #tpu.memory_space<vmem>>, vector<2x1x256xf32>,
    return
  }
}

module attributes {stable_mosaic.version = 11 : i64} {
  func.func @_proj_kernel(%arg0: i32, %arg1: i32, %arg2: memref<64x256xbf16, #tpu.memory_space<vmem>>, %arg3: memref<1x1x256xf32, #tpu.memory_space<vmem>>, %arg4: memref<256x128xbf16, #tpu.memory_space<vmem>>, %arg5: memref<1x128xf32, #tpu.memory_space<vmem>>, %arg6: memref<64x128xbf16, #tpu.memory_space<vmem>>, %arg7: memref<64x128xbf16, #tpu.memory_space<vmem>>) attributes {dimension_semantics = [#tpu.dimension_semantics<parallel>, #tpu.dimension_semantics<parallel>], iteration_bounds = array<i64: 2, 1>, scalar_prefetch = 0 : i64, scratch_operands = 0 : i64, tpu.core_type = #tpu.core_type<tc>, window_params = [{transform_indices = @transform_0, window_bounds = array<i64: 64, 256>}, {transform_indices = @transform_1, window_bounds = array<i64: 1, 1, 256>}, {transform_indices = @transform_2, window_bounds = array<i64: 256, 128>}, {transform_indices = @transform_3, window_bounds = array<i64: 1, 128>}, {transform_indices = @transform_4, window_bounds = array<i64: 64, 128>}, {transform_indices = @transform_5, window_bounds = array<i64: 64, 128>}]} {
    %c0 = arith.constant 0 : index
    %c0_0 = arith.constant 0 : index
    %c0_1 = arith.constant 0 : index
    %0 = vector.load %arg3[%c0, %c0_0, %c0_1] : memref<1x1x256xf32, #tpu.memory_space<vmem>>, vector<1x1x256xf32>
    %1 = vector.shape_cast %0 : vector<1x1x256xf32> to vector<1x256xf32>
    %c0_2 = arith.constant 0 : index
    %c0_3 = arith.constant 0 : index
    %2 = vector.load %arg2[%c0_2, %c0_3] : memref<64x256xbf16, #tpu.memory_space<vmem>>, vector<64x256xbf16>
    %3 = arith.extf %2 : vector<64x256xbf16> to vector<64x256xf32>
    %4 = vector.broadcast %1 : vector<1x256xf32> to vector<64x256xf32>
    %5 = arith.mulf %3, %4 : vector<64x256xf32>
    %6 = arith.truncf %5 : vector<64x256xf32> to vector<64x256xbf16>
    %c0_4 = arith.constant 0 : index
    %c0_5 = arith.constant 0 : index
    %7 = vector.load %arg4[%c0_4, %c0_5] : memref<256x128xbf16, #tpu.memory_space<vmem>>, vector<256x128xbf16>
    %cst = arith.constant dense<0.000000e+00> : vector<64x128xf32>
    %8 = tpu.matmul %6, %7, %cst {dimension_numbers = #tpu.dot_dimension_numbers<[1], [0], [0], [1], [0, 0, 1, 1], [], []>} : vector<64x256xbf16>, vector<256x128xbf16>, vector<64x128xf32> -> vector<64x128xf32>
    %c0_6 = arith.constant 0 : index
    %c0_7 = arith.constant 0 : index
    %9 = vector.load %arg5[%c0_6, %c0_7] : memref<1x128xf32, #tpu.memory_space<vmem>>, vector<1x128xf32>
    %10 = vector.broadcast %9 : vector<1x128xf32> to vector<64x128xf32>
    %11 = arith.addf %8, %10 : vector<64x128xf32>
    %c0_8 = arith.constant 0 : index
    %c0_9 = arith.constant 0 : index
    %12 = vector.load %arg6[%c0_8, %c0_9] : memref<64x128xbf16, #tpu.memory_space<vmem>>, vector<64x128xbf16>
    %13 = arith.extf %12 : vector<64x128xbf16> to vector<64x128xf32>
    %14 = arith.addf %11, %13 : vector<64x128xf32>
    %15 = arith.truncf %14 : vector<64x128xf32> to vector<64x128xbf16>
    %c0_10 = arith.constant 0 : index
    %c0_11 = arith.constant 0 : index
    %16 = vector.load %arg7[%c0_10, %c0_11] : memref<64x128xbf16, #tpu.memory_space<vmem>>, vector<64x128xbf16>
    tpu.vector_store %arg7[%c0_10, %c0_11], %15 {strides = array<i32>} : memref<64x128xbf16, #tpu.memory_space<vmem>>, vector<64x128xbf16>,
    return
  }
  func.func @transform_0(%arg0: i32, %arg1: i32) -> (i32, i32) {
    %c0_i32 = arith.constant 0 : i32
    %c0_i32_0 = arith.constant 0 : i32
    return %arg0, %c0_i32 : i32, i32
  }
  func.func @transform_1(%arg0: i32, %arg1: i32) -> (i32, i32, i32) {
    %c0_i32 = arith.constant 0 : i32
    %c0_i32_0 = arith.constant 0 : i32
    %c0_i32_1 = arith.constant 0 : i32
    return %arg0, %c0_i32, %c0_i32_0 : i32, i32, i32
  }
  func.func @transform_2(%arg0: i32, %arg1: i32) -> (i32, i32) {
    %c0_i32 = arith.constant 0 : i32
    %c0_i32_0 = arith.constant 0 : i32
    return %c0_i32, %arg1 : i32, i32
  }
  func.func @transform_3(%arg0: i32, %arg1: i32) -> (i32, i32) {
    %c0_i32 = arith.constant 0 : i32
    %c0_i32_0 = arith.constant 0 : i32
    return %c0_i32, %arg1 : i32, i32
  }
  func.func @transform_4(%arg0: i32, %arg1: i32) -> (i32, i32) {
    %c0_i32 = arith.constant 0 : i32
    return %arg0, %arg1 : i32, i32
  }
  func.func @transform_5(%arg0: i32, %arg1: i32) -> (i32, i32) {
    %c0_i32 = arith.constant 0 : i32
    return %arg0, %arg1 : i32, i32
  }
}

module attributes {stable_mosaic.version = 11 : i64} {
  func.func @_head_gap_kernel(%arg0: i32, %arg1: memref<64x128xbf16, #tpu.memory_space<vmem>>, %arg2: memref<128x256xbf16, #tpu.memory_space<vmem>>, %arg3: memref<1x256xf32, #tpu.memory_space<vmem>>, %arg4: memref<1x1x256xf32, #tpu.memory_space<vmem>>) attributes {dimension_semantics = [#tpu.dimension_semantics<parallel>], iteration_bounds = array<i64: 2>, scalar_prefetch = 0 : i64, scratch_operands = 0 : i64, tpu.core_type = #tpu.core_type<tc>, window_params = [{transform_indices = @transform_0, window_bounds = array<i64: 64, 128>}, {pipeline_mode = #tpu.pipeline_mode<synchronous>, transform_indices = @transform_1, window_bounds = array<i64: 128, 256>}, {pipeline_mode = #tpu.pipeline_mode<synchronous>, transform_indices = @transform_2, window_bounds = array<i64: 1, 256>}, {transform_indices = @transform_3, window_bounds = array<i64: 1, 1, 256>}]} {
    %c0 = arith.constant 0 : index
    %c0_0 = arith.constant 0 : index
    %0 = vector.load %arg1[%c0, %c0_0] : memref<64x128xbf16, #tpu.memory_space<vmem>>, vector<64x128xbf16>
    %c0_1 = arith.constant 0 : index
    %c0_2 = arith.constant 0 : index
    %1 = vector.load %arg2[%c0_1, %c0_2] : memref<128x256xbf16, #tpu.memory_space<vmem>>, vector<128x256xbf16>
    %cst = arith.constant dense<0.000000e+00> : vector<64x256xf32>
    %2 = tpu.matmul %0, %1, %cst {dimension_numbers = #tpu.dot_dimension_numbers<[1], [0], [0], [1], [0, 0, 1, 1], [], []>} : vector<64x128xbf16>, vector<128x256xbf16>, vector<64x256xf32> -> vector<64x256xf32>
    %c0_3 = arith.constant 0 : index
    %c0_4 = arith.constant 0 : index
    %3 = vector.load %arg3[%c0_3, %c0_4] : memref<1x256xf32, #tpu.memory_space<vmem>>, vector<1x256xf32>
    %4 = vector.broadcast %3 : vector<1x256xf32> to vector<64x256xf32>
    %5 = arith.addf %2, %4 : vector<64x256xf32>
    %6 = arith.negf %5 : vector<64x256xf32>
    %7 = math.exp %6 : vector<64x256xf32>
    %cst_5 = arith.constant 1.000000e+00 : f32
    %8 = vector.broadcast %cst_5 : f32 to vector<64x256xf32>
    %9 = arith.addf %8, %7 : vector<64x256xf32>
    %10 = arith.divf %8, %9 : vector<64x256xf32>
    %11 = arith.mulf %5, %10 : vector<64x256xf32>
    %cst_6 = arith.constant dense<0.000000e+00> : vector<256xf32>
    %12 = vector.multi_reduction <add>, %11, %cst_6 [0] : vector<64x256xf32> to vector<256xf32>
    %13 = vector.shape_cast %12 : vector<256xf32> to vector<1x256xf32>
    %cst_7 = arith.constant 6.400000e+01 : f32
    %14 = vector.broadcast %cst_7 : f32 to vector<1x256xf32>
    %15 = arith.divf %13, %14 : vector<1x256xf32>
    %16 = vector.shape_cast %15 : vector<1x256xf32> to vector<1x1x256xf32>
    %c0_8 = arith.constant 0 : index
    %c0_9 = arith.constant 0 : index
    %c0_10 = arith.constant 0 : index
    %17 = vector.load %arg4[%c0_8, %c0_9, %c0_10] : memref<1x1x256xf32, #tpu.memory_space<vmem>>, vector<1x1x256xf32>
    tpu.vector_store %arg4[%c0_8, %c0_9, %c0_10], %16 {strides = array<i32>} : memref<1x1x256xf32, #tpu.memory_space<vmem>>, vector<1x1x256xf32>,
    return
  }
  func.func @transform_0(%arg0: i32) -> (i32, i32) {
    %c0_i32 = arith.constant 0 : i32
    %c0_i32_0 = arith.constant 0 : i32
    return %arg0, %c0_i32 : i32, i32
  }
  func.func @transform_1(%arg0: i32) -> (i32, i32) {
    %c0_i32 = arith.constant 0 : i32
    %c0_i32_0 = arith.constant 0 : i32
    %c0_i32_1 = arith.constant 0 : i32
    return %c0_i32, %c0_i32_0 : i32, i32
  }
  func.func @transform_2(%arg0: i32) -> (i32, i32) {
    %c0_i32 = arith.constant 0 : i32
    %c0_i32_0 = arith.constant 0 : i32
    %c0_i32_1 = arith.constant 0 : i32
    return %c0_i32, %c0_i32_0 : i32, i32
  }
  func.func @transform_3(%arg0: i32) -> (i32, i32, i32) {
    %c0_i32 = arith.constant 0 : i32
    %c0_i32_0 = arith.constant 0 : i32
    %c0_i32_1 = arith.constant 0 : i32
    return %arg0, %c0_i32, %c0_i32_0 : i32, i32, i32
  }
}

module attributes {stable_mosaic.version = 11 : i64} {
  func.func @_mm_k1_kernel(%arg0: i32, %arg1: i32, %arg2: memref<2x256xbf16, #tpu.memory_space<vmem>>, %arg3: memref<256x128xbf16, #tpu.memory_space<vmem>>, %arg4: memref<1x128xf32, #tpu.memory_space<vmem>>, %arg5: memref<2x128xf32, #tpu.memory_space<vmem>>) attributes {dimension_semantics = [#tpu.dimension_semantics<parallel>, #tpu.dimension_semantics<parallel>], iteration_bounds = array<i64: 1, 1>, scalar_prefetch = 0 : i64, scratch_operands = 0 : i64, tpu.core_type = #tpu.core_type<tc>, window_params = [{transform_indices = @transform_0, window_bounds = array<i64: 2, 256>}, {transform_indices = @transform_1, window_bounds = array<i64: 256, 128>}, {transform_indices = @transform_2, window_bounds = array<i64: 1, 128>}, {transform_indices = @transform_3, window_bounds = array<i64: 2, 128>}]} {
    %c0 = arith.constant 0 : index
    %c0_0 = arith.constant 0 : index
    %0 = vector.load %arg2[%c0, %c0_0] : memref<2x256xbf16, #tpu.memory_space<vmem>>, vector<2x256xbf16>
    %c0_1 = arith.constant 0 : index
    %c0_2 = arith.constant 0 : index
    %1 = vector.load %arg3[%c0_1, %c0_2] : memref<256x128xbf16, #tpu.memory_space<vmem>>, vector<256x128xbf16>
    %cst = arith.constant dense<0.000000e+00> : vector<2x128xf32>
    %2 = tpu.matmul %0, %1, %cst {dimension_numbers = #tpu.dot_dimension_numbers<[1], [0], [0], [1], [0, 0, 1, 1], [], []>} : vector<2x256xbf16>, vector<256x128xbf16>, vector<2x128xf32> -> vector<2x128xf32>
    %c0_3 = arith.constant 0 : index
    %c0_4 = arith.constant 0 : index
    %3 = vector.load %arg4[%c0_3, %c0_4] : memref<1x128xf32, #tpu.memory_space<vmem>>, vector<1x128xf32>
    %4 = vector.broadcast %3 : vector<1x128xf32> to vector<2x128xf32>
    %5 = arith.addf %2, %4 : vector<2x128xf32>
    %c0_5 = arith.constant 0 : index
    %c0_6 = arith.constant 0 : index
    %6 = vector.load %arg5[%c0_5, %c0_6] : memref<2x128xf32, #tpu.memory_space<vmem>>, vector<2x128xf32>
    tpu.vector_store %arg5[%c0_5, %c0_6], %5 {strides = array<i32>} : memref<2x128xf32, #tpu.memory_space<vmem>>, vector<2x128xf32>,
    return
  }
  func.func @transform_0(%arg0: i32, %arg1: i32) -> (i32, i32) {
    %c0_i32 = arith.constant 0 : i32
    %c0_i32_0 = arith.constant 0 : i32
    return %arg0, %c0_i32 : i32, i32
  }
  func.func @transform_1(%arg0: i32, %arg1: i32) -> (i32, i32) {
    %c0_i32 = arith.constant 0 : i32
    %c0_i32_0 = arith.constant 0 : i32
    return %c0_i32, %arg1 : i32, i32
  }
  func.func @transform_2(%arg0: i32, %arg1: i32) -> (i32, i32) {
    %c0_i32 = arith.constant 0 : i32
    %c0_i32_0 = arith.constant 0 : i32
    return %c0_i32, %arg1 : i32, i32
  }
  func.func @transform_3(%arg0: i32, %arg1: i32) -> (i32, i32) {
    %c0_i32 = arith.constant 0 : i32
    return %arg0, %arg1 : i32, i32
  }
}

</mosaic_0001>

<bundles_post_ra>
// kernel: efficientnet_b3_forward.11
= control target key start
LH: loop header
LB: loop body
LE: loop exit
PB: predicated region body
PF: predicated region fallthrough
CT: control target
= control target key end

     0   :  { %vm115_vm0 = vcmask 1044480   ;;  %vm116_vm1 = vcmask 1045504   ;;  %v720_v2 = vmov 65535   ;;  %vm90_vm2 = vcmask 220160   ;;  %s1220_s1 = inlined_call_operand.vmem [shape: bf16[27,128], index: 1, kind: input, shape index: {}]   ;;  %s1221_s2 = inlined_call_operand.vmem [shape: f32[1,128], index: 2, kind: input, shape index: {}]   ;;  %s1222_s0 = inlined_call_operand.vmem [shape: bf16[128,27], index: 0, kind: input, shape index: {}]   ;;  %s1223_s3 = inlined_call_operand.vmem [shape: bf16[128,128], index: 3, kind: output, shape index: {}]  }
   0x1   :  { %v565_v0 = vld [vmem:[%s1220_s1 + $0x8] sm:$0xf]  ;;  %v600_v1 = vld [vmem:[%s1220_s1 + $0x8] sm:$0x30]  ;;  %v117_v3 = vsel %vm115_vm0, 4294967295, %v720_v2  ;;  %v599_v7 = vld [vmem:[%s1220_s1] sm:$0xff] }
   0x2   :  { %v566_v4 = vor.u32 %v600_v1, %v565_v0  ;;  %v118_v5 = vsel %vm116_vm1, %v117_v3, 0  ;;  %v591_v8 = vld [vmem:[%s1222_s0] sm:$0xff]  ;;  %v593_v9 = vld [vmem:[%s1222_s0 + $0x10] sm:$0xff]  ;;  %v592_v12 = vld [vmem:[%s1222_s0 + $0x8] sm:$0xff] }
   0x3   :  { %v595_v10 = vld [vmem:[%s1222_s0 + $0x20] sm:$0xff]  ;;  %v597_v11 = vld [vmem:[%s1222_s0 + $0x30] sm:$0xff]  ;;  %v594_v13 = vld [vmem:[%s1222_s0 + $0x18] sm:$0xff] }
   0x4   :  { %v120_v6 = vand.u32 %v566_v4, %v118_v5  ;;  %v596_v14 = vld [vmem:[%s1222_s0 + $0x28] sm:$0xff]  ;;  %v598_v15 = vld [vmem:[%s1222_s0 + $0x38] sm:$0xff]  ;;  %v785_v16 = vld [vmem:[%s1221_s2] ss:$0 sm:$0xff] }
   0x6   :  { %128 = vmatpush.bf16.msra.mxu0 %v120_v6  ;;  %648 = vmatpush.bf16.msra.mxu1 %v120_v6 }
   0x7   :  { %649 = vmatpush.bf16.msra.mxu2 %v120_v6  ;;  %650 = vmatpush.bf16.msra.mxu3 %v120_v6 }
   0xa   :  { %129 = vmatpush.bf16.msra.mxu0 %v599_v7  ;;  %651 = vmatpush.bf16.msra.mxu1 %v599_v7 }
   0xb   :  { %652 = vmatpush.bf16.msra.mxu2 %v599_v7  ;;  %653 = vmatpush.bf16.msra.mxu3 %v599_v7 }
   0xd   :  { %567 = vmatmul.msk.bf16.vlgmr.msra.gmra.mxu0 %vm90_vm2, %v591_v8  ;;  %569 = vmatmul.msk.bf16.vlgmr.msra.gmra.mxu1 %vm90_vm2, %v593_v9 }
   0xe   :  { %571 = vmatmul.msk.bf16.vlgmr.msra.gmra.mxu2 %vm90_vm2, %v595_v10  ;;  %573 = vmatmul.msk.bf16.vlgmr.msra.gmra.mxu3 %vm90_vm2, %v597_v11 }
  0x1d   :  { %568 = vmatmul.msk.bf16.gmra.mxu0 %vm90_vm2, %v592_v12  ;;  %570 = vmatmul.msk.bf16.gmra.mxu1 %vm90_vm2, %v594_v13 }
  0x1e   :  { %572 = vmatmul.msk.bf16.gmra.mxu2 %vm90_vm2, %v596_v14  ;;  %574 = vmatmul.msk.bf16.gmra.mxu3 %vm90_vm2, %v598_v15 }
  0x8a   :  { %v131_v17 = vpop.f32.mrf.mxu0  ;;  %v141_v18 = vpop.f32.mrf.mxu1 }
  0x8b   :  { %v788_v19 = vadd.f32 %v785_v16, %v131_v17  ;;  %v791_v20 = vadd.f32 %v785_v16, %v141_v18 }
  0x8d   :  { %v575_v21 = vmul.f32 -1.442695, %v788_v19  ;;  %v579_v22 = vmul.f32 -1.442695, %v791_v20 }
  0x8f   :  { %656 = vpow2.f32 %v575_v21 }
  0x90   :  { %658 = vpow2.f32 %v579_v22 }
  0x91   :  { %v151_v23 = vpop.f32.mrf.mxu2  ;;  %v161_v24 = vpop.f32.mrf.mxu3 }
  0x92   :  { %v796_v25 = vadd.f32 %v785_v16, %v151_v23  ;;  %v799_v26 = vadd.f32 %v785_v16, %v161_v24  ;;  %v133_v27 = vpop.f32.mrf.mxu0  ;;  %v143_v28 = vpop.f32.mrf.mxu1 }
  0x93   :  { %v802_v29 = vadd.f32 %v785_v16, %v133_v27  ;;  %v805_v30 = vadd.f32 %v785_v16, %v143_v28 }
  0x94   :  { %v583_v31 = vmul.f32 -1.442695, %v796_v25  ;;  %v587_v32 = vmul.f32 -1.442695, %v799_v26 }
  0x95   :  { %v657_v33 = vpop.eup %656  ;;  %v576_v36 = vmul.f32 -1.442695, %v802_v29  ;;  %v580_v38 = vmul.f32 -1.442695, %v805_v30 }
  0x96   :  { %v659_v34 = vpop.eup %658  ;;  %v809_v35 = vadd.f32 1.0, %v657_v33  ;;  %660 = vpow2.f32 %v583_v31 }
  0x97   :  { %v812_v37 = vadd.f32 1.0, %v659_v34  ;;  %662 = vpow2.f32 %v587_v32 }
  0x98   :  { %664 = vrcp.f32 %v809_v35  ;;  %v244_v51 = vand.u32 2147483647, %v809_v35  ;;  %v246_v53 = vand.u32 2147483648, %v809_v35  ;;  %vm240_vm3 = vweird.f32 %v809_v35 }
  0x99   :  { %666 = vrcp.f32 %v812_v37  ;;  %v153_v39 = vpop.f32.mrf.mxu2  ;;  %v163_v40 = vpop.f32.mrf.mxu3  ;;  %vm300_vm4 = vweird.f32 %v812_v37  ;;  %v304_v61 = vand.u32 2147483647, %v812_v37  ;;  %v306_v62 = vand.u32 2147483648, %v812_v37 }
  0x9a   :  { %668 = vpow2.f32 %v576_v36  ;;  %v818_v41 = vadd.f32 %v785_v16, %v153_v39  ;;  %v821_v43 = vadd.f32 %v785_v16, %v163_v40  ;;  %v136_v56 = vpop.f32.mrf.mxu0  ;;  %v146_v59 = vpop.f32.mrf.mxu1  ;;  %vm846_vm5 = vcmp.eq.f32.partialorder %v244_v51, 8.507059e+37 }
  0x9b   :  { %670 = vpow2.f32 %v580_v38  ;;  %v855_v3 = vadd.f32 %v785_v16, %v136_v56  ;;  %v247_v4 = vor.u32 1.1754944e-38, %v246_v53  ;;  %v859_v6 = vadd.f32 %v785_v16, %v146_v59 }
  0x9c   :  { %v661_v42 = vpop.eup %660  ;;  %v584_v48 = vmul.f32 -1.442695, %v818_v41  ;;  %v588_v55 = vmul.f32 -1.442695, %v821_v43  ;;  %vm867_vm7 = vcmp.eq.f32.partialorder %v304_v61, 8.507059e+37  ;;  %v307_v11 = vor.u32 1.1754944e-38, %v306_v62 }
  0x9d   :  { %v663_v44 = vpop.eup %662  ;;  %v823_v45 = vadd.f32 1.0, %v661_v42  ;;  %v577_v17 = vmul.f32 -1.442695, %v855_v3  ;;  %v581_v28 = vmul.f32 -1.442695, %v859_v6 }
  0x9e   :  { %v825_v46 = vpop.eup %664  ;;  %v827_v47 = vadd.f32 1.0, %v663_v44 }
  0x9f   :  { %v830_v49 = vpop.eup %666  ;;  %v236_v50 = vmul.f32 %v825_v46, %v809_v35  ;;  %672 = vrcp.f32 %v823_v45  ;;  %vm241_vm6 = vweird.f32 %v825_v46  ;;  %v366_v9 = vand.u32 2147483648, %v823_v45 }
  0xa0   :  { %v669_v52 = vpop.eup %668  ;;  %v296_v54 = vmul.f32 %v830_v49, %v812_v37  ;;  %674 = vrcp.f32 %v827_v47  ;;  %v426_v13 = vand.u32 2147483648, %v827_v47  ;;  %vm301_vm8 = vweird.f32 %v830_v49  ;;  %vm882_vm9 = vmor %vm240_vm3, %vm241_vm6 }
  0xa1   :  { %v671_v57 = vpop.eup %670  ;;  %v237_v58 = vsub.f32 1.0, %v236_v50  ;;  %676 = vpow2.f32 %v584_v48  ;;  %v850_v1 = vadd.f32 1.0, %v669_v52  ;;  %v156_v18 = vpop.f32.mrf.mxu2  ;;  %v364_v24 = vand.u32 2147483647, %v823_v45  ;;  %vm902_vm11 = vmor %vm300_vm4, %vm301_vm8 }
  0xa2   :  { %v297_v60 = vsub.f32 1.0, %v296_v54  ;;  %v852_v2 = vadd.f32 1.0, %v671_v57  ;;  %678 = vpow2.f32 %v588_v55  ;;  %vm360_vm10 = vweird.f32 %v823_v45 }
  0xa3   :  { %v238_v63 = vmul.f32 %v825_v46, %v237_v58  ;;  %680 = vrcp.f32 %v850_v1  ;;  %v894_v32 = vor.u32 1.1754944e-38, %v366_v9  ;;  %v424_v33 = vand.u32 2147483647, %v827_v47 }
  0xa4   :  { %v298_v5 = vmul.f32 %v830_v49, %v297_v60  ;;  %682 = vrcp.f32 %v852_v2  ;;  %v259_v34 = vand.u32 2147483647, %v850_v1  ;;  %v906_v39 = vor.u32 1.1754944e-38, %v426_v13 }
  0xa5   :  { %v861_v7 = vpop.eup %672  ;;  %v239_v8 = vadd.f32 %v825_v46, %v238_v63  ;;  %vm255_vm12 = vweird.f32 %v850_v1  ;;  %v910_v40 = vadd.f32 %v785_v16, %v156_v18  ;;  %vm420_vm14 = vweird.f32 %v827_v47 }
  0xa6   :  { %v356_v12 = vmul.f32 %v861_v7, %v823_v45  ;;  %v874_v14 = vpop.eup %674  ;;  %v299_v15 = vadd.f32 %v830_v49, %v298_v5  ;;  %vm361_vm13 = vweird.f32 %v861_v7  ;;  %684 = vpow2.f32 %v577_v17 }
  0xa7   :  { %v677_v21 = vpop.eup %676  ;;  %v416_v27 = vmul.f32 %v874_v14, %v827_v47  ;;  %v243_v31 = vsel %vm882_vm9, %v825_v46, %v239_v8  ;;  %v261_v51 = vand.u32 2147483648, %v850_v1  ;;  %vm924_vm15 = vcmp.eq.f32.partialorder %v259_v34, 8.507059e+37  ;;  %vm959_vm6 = vmor %vm360_vm10, %vm361_vm13  ;;  %v166_v47 = vpop.f32.mrf.mxu3 }
  0xa8   :  { %v357_v23 = vsub.f32 1.0, %v356_v12  ;;  %v679_v35 = vpop.eup %678  ;;  %v303_v44 = vsel %vm902_vm11, %v830_v49, %v299_v15  ;;  %v917_v37 = vadd.f32 1.0, %v677_v21  ;;  %v248_v46 = vsel %vm846_vm5, %v247_v4, %v243_v31 }
  0xa9   :  { %v417_v38 = vsub.f32 1.0, %v416_v27  ;;  %v681_v42 = vpop.eup %680  ;;  %v319_v49 = vand.u32 2147483647, %v852_v2  ;;  %v930_v54 = vadd.f32 1.0, %v679_v35  ;;  %v308_v55 = vsel %vm867_vm7, %v307_v11, %v303_v44 }
  0xaa   :  { %v358_v48 = vmul.f32 %v861_v7, %v357_v23  ;;  %v251_v50 = vmul.f32 %v681_v42, %v850_v1  ;;  %v683_v52 = vpop.eup %682  ;;  %686 = vrcp.f32 %v917_v37  ;;  %vm934_vm0 = vcmp.eq.f32.partialorder %v364_v24, 8.507059e+37 }
  0xab   :  { %v418_v57 = vmul.f32 %v874_v14, %v417_v38  ;;  %v311_v59 = vmul.f32 %v683_v52, %v852_v2  ;;  %v475_v60 = vmul.f32 %v248_v46, %v788_v19  ;;  %vm421_vm1 = vweird.f32 %v874_v14 }
  0xac   :  { %v252_v58 = vsub.f32 1.0, %v251_v50  ;;  %vm315_vm2 = vweird.f32 %v852_v2  ;;  %v321_v61 = vand.u32 2147483648, %v852_v2  ;;  %v359_v62 = vadd.f32 %v861_v7, %v358_v48  ;;  %v685_v5 = vpop.eup %684  ;;  %vm976_vm10 = vmor %vm420_vm14, %vm421_vm1 }
  0xad   :  { %vm945_vm3 = vcmp.eq.f32.partialorder %v424_v33, 8.507059e+37  ;;  %vm256_vm4 = vweird.f32 %v681_v42  ;;  %v312_v4 = vsub.f32 1.0, %v311_v59  ;;  %v479_v8 = vmul.f32 %v308_v55, %v791_v20  ;;  %v158_v59 = vpop.f32.mrf.mxu2 }
  0xae   :  { %v253_v0 = vmul.f32 %v681_v42, %v252_v58  ;;  %v262_v9 = vor.u32 1.1754944e-38, %v261_v51  ;;  %vm950_vm5 = vcmp.eq.f32.partialorder %v319_v49, 8.507059e+37  ;;  %688 = vrcp.f32 %v930_v54  ;;  %vm257_vm8 = vmor %vm255_vm12, %vm256_vm4  ;;  %v148_v49 = vpop.f32.mrf.mxu1 }
  0xaf   :  { %v419_v11 = vadd.f32 %v874_v14, %v418_v57  ;;  %v313_v13 = vmul.f32 %v683_v52, %v312_v4  ;;  %vm316_vm7 = vweird.f32 %v683_v52  ;;  %v322_v15 = vor.u32 1.1754944e-38, %v321_v61 }
  0xb0   :  { %v254_v12 = vadd.f32 %v681_v42, %v253_v0  ;;  %v687_v20 = vpop.eup %686  ;;  %vm375_vm9 = vweird.f32 %v917_v37  ;;  %v967_v17 = vadd.f32 1.0, %v685_v5  ;;  %690 = vpow2.f32 %v581_v28  ;;  %vm317_vm11 = vmor %vm315_vm2, %vm316_vm7 }
  0xb1   :  { %v363_v45 = vsel %vm959_vm6, %v861_v7, %v359_v62  ;;  %v314_v21 = vadd.f32 %v683_v52, %v313_v13  ;;  %v371_v22 = vmul.f32 %v687_v20, %v917_v37  ;;  %v379_v7 = vand.u32 2147483647, %v917_v37 }
  0xb2   :  { %v258_v1 = vsel %vm257_vm8, %v681_v42, %v254_v12  ;;  %v381_v24 = vand.u32 2147483648, %v917_v37  ;;  %692 = vrcp.f32 %v967_v17  ;;  %v423_v27 = vsel %vm976_vm10, %v874_v14, %v419_v11  ;;  %v168_v12 = vpop.f32.mrf.mxu3 }
  0xb3   :  { %v263_v23 = vsel %vm924_vm15, %v262_v9, %v258_v1  ;;  %v318_v31 = vsel %vm317_vm11, %v683_v52, %v314_v21  ;;  %v372_v33 = vsub.f32 1.0, %v371_v22  ;;  %v368_v2 = vsel %vm934_vm0, %v894_v32, %v363_v45 }
  0xb4   :  { %v476_v28 = vmul.f32 %v263_v23, %v802_v29  ;;  %v689_v34 = vpop.eup %688  ;;  %v323_v35 = vsel %vm950_vm5, %v322_v15, %v318_v31  ;;  %vm376_vm12 = vweird.f32 %v687_v20  ;;  %v585_v36 = vmul.f32 -1.442695, %v910_v40  ;;  %v138_v29 = vpop.f32.mrf.mxu0 }
  0xb5   :  { %v480_v42 = vmul.f32 %v323_v35, %v805_v30  ;;  %v373_v44 = vmul.f32 %v687_v20, %v372_v33  ;;  %v431_v14 = vmul.f32 %v689_v34, %v930_v54  ;;  %v428_v48 = vsel %vm945_vm3, %v906_v39, %v423_v27  ;;  %vm377_vm14 = vmor %vm375_vm9, %vm376_vm12 }
  0xb6   :  { %v604_v38 = vpack.c.bf16 %v476_v28, %v475_v60  ;;  %v691_v46 = vpop.eup %690  ;;  %vm1003_vm13 = vcmp.eq.f32.partialorder %v379_v7, 8.507059e+37  ;;  %v382_v50 = vor.u32 1.1754944e-38, %v381_v24  ;;  %694 = vpow2.f32 %v585_v36 }
  0xb7   :  { %v614_v30 = vpack.c.bf16 %v480_v42, %v479_v8  ;;  %v374_v51 = vadd.f32 %v687_v20, %v373_v44  ;;  %v432_v52 = vsub.f32 1.0, %v431_v14  ;;  %v1010_v53 = vadd.f32 1.0, %v691_v46 }
  0xb8   :  { %605 = vst [vmem:[%s1223_s3] sm:$0xff] %v604_v38   ;;  %v1012_v55 = vpop.eup %692  ;;  %v439_v39 = vand.u32 2147483647, %v930_v54  ;;  %v441_v56 = vand.u32 2147483648, %v930_v54  ;;  %v1020_v57 = vadd.f32 %v785_v16, %v166_v47  ;;  %v1023_v58 = vadd.f32 %v785_v16, %v138_v29 }
  0xb9   :  { %642 = vst [vmem:[%s1223_s3 + $0x10] sm:$0xff] %v614_v30   ;;  %v378_v60 = vsel %vm377_vm14, %v687_v20, %v374_v51  ;;  %v433_v61 = vmul.f32 %v689_v34, %v432_v52  ;;  %vm436_vm15 = vweird.f32 %v689_v34  ;;  %v266_v37 = vmul.f32 %v1012_v55, %v967_v17 }
  0xba   :  { %v483_v62 = vmul.f32 %v368_v2, %v796_v25  ;;  %v383_v63 = vsel %vm1003_vm13, %v382_v50, %v378_v60  ;;  %696 = vrcp.f32 %v1010_v53  ;;  %v1035_v0 = vadd.f32 %v785_v16, %v148_v49 }
  0xbb   :  { %v484_v4 = vmul.f32 %v383_v63, %v818_v41  ;;  %v434_v5 = vadd.f32 %v689_v34, %v433_v61  ;;  %vm435_vm0 = vweird.f32 %v930_v54  ;;  %v1040_v8 = vadd.f32 %v785_v16, %v158_v59 }
  0xbc   :  { %v695_v9 = vpop.eup %694  ;;  %v487_v19 = vmul.f32 %v428_v48, %v799_v26  ;;  %vm437_vm1 = vmor %vm435_vm0, %vm436_vm15  ;;  %v442_v25 = vor.u32 1.1754944e-38, %v441_v56  ;;  %v589_v10 = vmul.f32 -1.442695, %v1020_v57  ;;  %v578_v11 = vmul.f32 -1.442695, %v1023_v58 }
  0xbd   :  { %v624_v13 = vpack.c.bf16 %v484_v4, %v483_v62  ;;  %v438_v20 = vsel %vm437_vm1, %v689_v34, %v434_v5  ;;  %vm440_vm2 = vcmp.eq.f32.partialorder %v439_v39, 8.507059e+37  ;;  %v267_v41 = vsub.f32 1.0, %v266_v37 }
  0xbe   :  { %v443_v15 = vsel %vm440_vm2, %v442_v25, %v438_v20  ;;  %v1045_v45 = vadd.f32 1.0, %v695_v9  ;;  %698 = vpow2.f32 %v589_v10  ;;  %v582_v54 = vmul.f32 -1.442695, %v1035_v0 }
  0xbf   :  { %644 = vst [vmem:[%s1223_s3 + $0x20] sm:$0xff] %v624_v13   ;;  %v488_v26 = vmul.f32 %v443_v15, %v821_v43  ;;  %700 = vpow2.f32 %v578_v11  ;;  %v586_v18 = vmul.f32 -1.442695, %v1040_v8  ;;  %v1054_v1 = vadd.f32 %v785_v16, %v168_v12 }
  0xc0   :  { %v1056_v21 = vpop.eup %696  ;;  %702 = vrcp.f32 %v1045_v45  ;;  %v268_v7 = vmul.f32 %v1012_v55, %v267_v41  ;;  %vm270_vm3 = vweird.f32 %v967_v17  ;;  %v274_v27 = vand.u32 2147483647, %v967_v17 }
  0xc1   :  { %v634_v22 = vpack.c.bf16 %v488_v26, %v487_v19  ;;  %v326_v23 = vmul.f32 %v1056_v21, %v1010_v53  ;;  %704 = vpow2.f32 %v582_v54  ;;  %v590_v43 = vmul.f32 -1.442695, %v1054_v1 }
  0xc2   :  { %706 = vpow2.f32 %v586_v18  ;;  %v269_v33 = vadd.f32 %v1012_v55, %v268_v7  ;;  %vm271_vm4 = vweird.f32 %v1012_v55  ;;  %v276_v34 = vand.u32 2147483648, %v967_v17 }
  0xc3   :  { %646 = vst [vmem:[%s1223_s3 + $0x30] sm:$0xff] %v634_v22   ;;  %v327_v24 = vsub.f32 1.0, %v326_v23  ;;  %708 = vpow2.f32 %v590_v43  ;;  %v334_v42 = vand.u32 2147483647, %v1010_v53  ;;  %vm1085_vm5 = vmor %vm270_vm3, %vm271_vm4  ;;  %v336_v29 = vand.u32 2147483648, %v1010_v53 }
  0xc4   :  { %v699_v16 = vpop.eup %698  ;;  %v273_v48 = vsel %vm1085_vm5, %v1012_v55, %v269_v33  ;;  %vm275_vm6 = vcmp.eq.f32.partialorder %v274_v27, 8.507059e+37  ;;  %v277_v32 = vor.u32 1.1754944e-38, %v276_v34  ;;  %v394_v50 = vand.u32 2147483647, %v1045_v45 }
  0xc5   :  { %v701_v47 = vpop.eup %700  ;;  %v1068_v28 = vadd.f32 1.0, %v699_v16  ;;  %v328_v38 = vmul.f32 %v1056_v21, %v327_v24  ;;  %vm330_vm7 = vweird.f32 %v1010_v53  ;;  %v396_v51 = vand.u32 2147483648, %v1045_v45 }
  0xc6   :  { %v1070_v31 = vpop.eup %702  ;;  %v1075_v2 = vadd.f32 1.0, %v701_v47  ;;  %vm331_vm8 = vweird.f32 %v1056_v21  ;;  %vm1101_vm9 = vcmp.eq.f32.partialorder %v334_v42, 8.507059e+37  ;;  %v278_v59 = vsel %vm275_vm6, %v277_v32, %v273_v48 }
  0xc7   :  { %v386_v35 = vmul.f32 %v1070_v31, %v1045_v45  ;;  %710 = vrcp.f32 %v1068_v28  ;;  %v705_v36 = vpop.eup %704  ;;  %v329_v49 = vadd.f32 %v1056_v21, %v328_v38  ;;  %v337_v60 = vor.u32 1.1754944e-38, %v336_v29  ;;  %vm1122_vm12 = vmor %vm330_vm7, %vm331_vm8 }
  0xc8   :  { %712 = vrcp.f32 %v1075_v2  ;;  %v707_v44 = vpop.eup %706  ;;  %v1097_v52 = vadd.f32 1.0, %v705_v36  ;;  %vm390_vm10 = vweird.f32 %v1045_v45  ;;  %vm1111_vm11 = vcmp.eq.f32.partialorder %v394_v50, 8.507059e+37 }
  0xc9   :  { %v387_v46 = vsub.f32 1.0, %v386_v35  ;;  %v709_v30 = vpop.eup %708  ;;  %v1105_v55 = vadd.f32 1.0, %v707_v44  ;;  %vm391_vm13 = vweird.f32 %v1070_v31  ;;  %v397_v9 = vor.u32 1.1754944e-38, %v396_v51 }
  0xca   :  { %714 = vrcp.f32 %v1097_v52  ;;  %v1118_v63 = vadd.f32 1.0, %v709_v30  ;;  %v333_v25 = vsel %vm1122_vm12, %v1056_v21, %v329_v49  ;;  %v289_v11 = vand.u32 2147483647, %v1075_v2  ;;  %vm1139_vm15 = vmor %vm390_vm10, %vm391_vm13 }
  0xcb   :  { %v388_v17 = vmul.f32 %v1070_v31, %v387_v46  ;;  %716 = vrcp.f32 %v1105_v55  ;;  %v291_v53 = vand.u32 2147483648, %v1075_v2  ;;  %v477_v12 = vmul.f32 %v278_v59, %v855_v3 }
  0xcc   :  { %vm450_vm14 = vweird.f32 %v1068_v28  ;;  %v454_v13 = vand.u32 2147483647, %v1068_v28  ;;  %v456_v15 = vand.u32 2147483648, %v1068_v28  ;;  %vm285_vm0 = vweird.f32 %v1075_v2 }
  0xcd   :  { %v1107_v56 = vpop.eup %710  ;;  %v389_v5 = vadd.f32 %v1070_v31, %v388_v17  ;;  %v349_v54 = vand.u32 2147483647, %v1097_v52  ;;  %718 = vrcp.f32 %v1118_v63  ;;  %v338_v26 = vsel %vm1101_vm9, %v337_v60, %v333_v25 }
  0xce   :  { %v713_v61 = vpop.eup %712  ;;  %v446_v62 = vmul.f32 %v1107_v56, %v1068_v28  ;;  %vm1153_vm2 = vcmp.eq.f32.partialorder %v289_v11, 8.507059e+37  ;;  %v292_v7 = vor.u32 1.1754944e-38, %v291_v53  ;;  %vm451_vm3 = vweird.f32 %v1107_v56 }
  0xcf   :  { %v281_v19 = vmul.f32 %v713_v61, %v1075_v2  ;;  %v393_v45 = vsel %vm1139_vm15, %v1070_v31, %v389_v5  ;;  %vm286_vm1 = vweird.f32 %v713_v61  ;;  %vm345_vm4 = vweird.f32 %v1097_v52  ;;  %vm1185_vm10 = vmor %vm450_vm14, %vm451_vm3 }
  0xd0   :  { %v447_v10 = vsub.f32 1.0, %v446_v62  ;;  %v715_v3 = vpop.eup %714  ;;  %v398_v47 = vsel %vm1111_vm11, %v397_v9, %v393_v45  ;;  %vm287_vm5 = vmor %vm285_vm0, %vm286_vm1  ;;  %vm1165_vm6 = vcmp.eq.f32.partialorder %v349_v54, 8.507059e+37  ;;  %v351_v33 = vand.u32 2147483648, %v1097_v52 }
  0xd1   :  { %v282_v20 = vsub.f32 1.0, %v281_v19  ;;  %v717_v21 = vpop.eup %716  ;;  %v341_v43 = vmul.f32 %v715_v3, %v1097_v52  ;;  %vm1170_vm7 = vcmp.eq.f32.partialorder %v454_v13, 8.507059e+37  ;;  %v409_v38 = vand.u32 2147483647, %v1105_v55 }
  0xd2   :  { %v448_v22 = vmul.f32 %v1107_v56, %v447_v10  ;;  %v401_v24 = vmul.f32 %v717_v21, %v1105_v55  ;;  %v411_v42 = vand.u32 2147483648, %v1105_v55  ;;  %vm346_vm8 = vweird.f32 %v715_v3 }
  0xd3   :  { %v283_v18 = vmul.f32 %v713_v61, %v282_v20  ;;  %v342_v27 = vsub.f32 1.0, %v341_v43  ;;  %v719_v44 = vpop.eup %718  ;;  %vm406_vm9 = vweird.f32 %v717_v21  ;;  %v352_v17 = vor.u32 1.1754944e-38, %v351_v33  ;;  %vm347_vm12 = vmor %vm345_vm4, %vm346_vm8 }
  0xd4   :  { %v402_v36 = vsub.f32 1.0, %v401_v24  ;;  %v449_v2 = vadd.f32 %v1107_v56, %v448_v22  ;;  %v461_v32 = vmul.f32 %v719_v44, %v1118_v63  ;;  %vm405_vm11 = vweird.f32 %v1105_v55 }
  0xd5   :  { %v284_v16 = vadd.f32 %v713_v61, %v283_v18  ;;  %v343_v29 = vmul.f32 %v715_v3, %v342_v27  ;;  %v469_v51 = vand.u32 2147483647, %v1118_v63  ;;  %vm410_vm13 = vcmp.eq.f32.partialorder %v409_v38, 8.507059e+37  ;;  %vm407_vm14 = vmor %vm405_vm11, %vm406_vm9 }
  0xd6   :  { %v403_v48 = vmul.f32 %v717_v21, %v402_v36  ;;  %v462_v39 = vsub.f32 1.0, %v461_v32  ;;  %v453_v28 = vsel %vm1185_vm10, %v1107_v56, %v449_v2  ;;  %v412_v60 = vor.u32 1.1754944e-38, %v411_v42 }
  0xd7   :  { %v288_v35 = vsel %vm287_vm5, %v713_v61, %v284_v16  ;;  %v344_v30 = vadd.f32 %v715_v3, %v343_v29  ;;  %v471_v61 = vand.u32 2147483648, %v1118_v63  ;;  %vm466_vm15 = vweird.f32 %v719_v44 }
  0xd8   :  { %v293_v14 = vsel %vm1153_vm2, %v292_v7, %v288_v35  ;;  %v463_v37 = vmul.f32 %v719_v44, %v462_v39  ;;  %v481_v62 = vmul.f32 %v338_v26, %v859_v6  ;;  %v457_v4 = vor.u32 1.1754944e-38, %v456_v15 }
  0xd9   :  { %v478_v46 = vmul.f32 %v293_v14, %v1023_v58  ;;  %v404_v58 = vadd.f32 %v717_v21, %v403_v48  ;;  %v348_v59 = vsel %vm347_vm12, %v715_v3, %v344_v30  ;;  %v485_v9 = vmul.f32 %v398_v47, %v910_v40 }
  0xda   :  { %v353_v52 = vsel %vm1165_vm6, %v352_v17, %v348_v59  ;;  %v464_v25 = vadd.f32 %v719_v44, %v463_v37  ;;  %vm465_vm0 = vweird.f32 %v1118_v63  ;;  %v458_v10 = vsel %vm1170_vm7, %v457_v4, %v453_v28 }
  0xdb   :  { %v609_v49 = vpack.c.bf16 %v478_v46, %v477_v12  ;;  %v408_v55 = vsel %vm407_vm14, %v717_v21, %v404_v58  ;;  %v482_v56 = vmul.f32 %v353_v52, %v1035_v0  ;;  %vm467_vm1 = vmor %vm465_vm0, %vm466_vm15  ;;  %v472_v53 = vor.u32 1.1754944e-38, %v471_v61 }
  0xdc   :  { %v413_v5 = vsel %vm410_vm13, %v412_v60, %v408_v55  ;;  %v468_v13 = vsel %vm467_vm1, %v719_v44, %v464_v25  ;;  %vm470_vm2 = vcmp.eq.f32.partialorder %v469_v51, 8.507059e+37  ;;  %v489_v40 = vmul.f32 %v458_v10, %v1020_v57 }
  0xdd   :  { %641 = vst [vmem:[%s1223_s3 + $0x8] sm:$0xff] %v609_v49   ;;  %v486_v19 = vmul.f32 %v413_v5, %v1040_v8  ;;  %v619_v11 = vpack.c.bf16 %v482_v56, %v481_v62  ;;  %v473_v6 = vsel %vm470_vm2, %v472_v53, %v468_v13 }
  0xde   :  { %v490_v0 = vmul.f32 %v473_v6, %v1054_v1 }
  0xdf   :  { %v629_v12 = vpack.c.bf16 %v486_v19, %v485_v9  ;;  %643 = vst [vmem:[%s1223_s3 + $0x18] sm:$0xff] %v619_v11  }
  0xe0   :  { %v639_v8 = vpack.c.bf16 %v490_v0, %v489_v40 }
  0xe1   :  { %645 = vst [vmem:[%s1223_s3 + $0x28] sm:$0xff] %v629_v12  }
  0xe2   :  { %647 = vst [vmem:[%s1223_s3 + $0x38] sm:$0xff] %v639_v8  }

// kernel: efficientnet_b3_forward.12
= control target key start
LH: loop header
LB: loop body
LE: loop exit
PB: predicated region body
PF: predicated region fallthrough
CT: control target
= control target key end

     0   :  { %s2078_s1 = inlined_call_operand.vmem [shape: bf16[128,256], index: 1, kind: input, shape index: {}]   ;;  %s2079_s0 = inlined_call_operand.vmem [shape: bf16[128,128], index: 0, kind: input, shape index: {}]   ;;  %s2080_s2 = inlined_call_operand.vmem [shape: f32[1,256], index: 2, kind: input, shape index: {}]   ;;  %s2081_s3 = inlined_call_operand.vmem [shape: bf16[128,256], index: 3, kind: output, shape index: {}]  }
   0x1   :  { %v1044_v0 = vld [vmem:[%s2078_s1 + $0x70] sm:$0xf]  ;;  %v1105_v1 = vld [vmem:[%s2078_s1 + $0x74] sm:$0xf0]  ;;  %v1104_v2 = vld [vmem:[%s2078_s1 + $0x74] sm:$0xf] }
   0x2   :  { %v1045_v3 = vor.u32 %v1105_v1, %v1044_v0  ;;  %v1046_v4 = vld [vmem:[%s2078_s1 + $0x78] sm:$0xf0]  ;;  %v1036_v5 = vld [vmem:[%s2078_s1 + $0x60] sm:$0xf]  ;;  %v1103_v6 = vld [vmem:[%s2078_s1 + $0x64] sm:$0xf0] }
   0x3   :  { %v1049_v7 = vor.u32 %v1104_v2, %v1046_v4  ;;  %v1102_v8 = vld [vmem:[%s2078_s1 + $0x64] sm:$0xf]  ;;  %v1038_v9 = vld [vmem:[%s2078_s1 + $0x68] sm:$0xf0]  ;;  %v1037_v10 = vor.u32 %v1103_v6, %v1036_v5  ;;  %v1028_v12 = vld [vmem:[%s2078_s1 + $0x50] sm:$0xf] }
   0x4   :  { %180 = vmatpush.bf16.msra.mxu0 %v1045_v3  ;;  %1106 = vmatpush.bf16.msra.mxu2 %v1045_v3  ;;  %v1041_v11 = vor.u32 %v1102_v8, %v1038_v9  ;;  %v1101_v13 = vld [vmem:[%s2078_s1 + $0x54] sm:$0xf0]  ;;  %v1100_v14 = vld [vmem:[%s2078_s1 + $0x54] sm:$0xf]  ;;  %v1030_v15 = vld [vmem:[%s2078_s1 + $0x58] sm:$0xf0] }
   0x5   :  { %229 = vmatpush.bf16.msra.mxu1 %v1049_v7  ;;  %1114 = vmatpush.bf16.msra.mxu3 %v1049_v7  ;;  %v1029_v16 = vor.u32 %v1101_v13, %v1028_v12  ;;  %v1033_v17 = vor.u32 %v1100_v14, %v1030_v15  ;;  %v1020_v18 = vld [vmem:[%s2078_s1 + $0x40] sm:$0xf]  ;;  %v1099_v19 = vld [vmem:[%s2078_s1 + $0x44] sm:$0xf0]  ;;  %v1098_v20 = vld [vmem:[%s2078_s1 + $0x44] sm:$0xf] }
   0x6   :  { %v1022_v21 = vld [vmem:[%s2078_s1 + $0x48] sm:$0xf0]  ;;  %v1021_v22 = vor.u32 %v1099_v19, %v1020_v18  ;;  %v1012_v24 = vld [vmem:[%s2078_s1 + $0x30] sm:$0xf]  ;;  %v1097_v25 = vld [vmem:[%s2078_s1 + $0x34] sm:$0xf0] }
   0x7   :  { %v1025_v23 = vor.u32 %v1098_v20, %v1022_v21  ;;  %v1096_v26 = vld [vmem:[%s2078_s1 + $0x34] sm:$0xf]  ;;  %v1014_v27 = vld [vmem:[%s2078_s1 + $0x38] sm:$0xf0]  ;;  %v1013_v28 = vor.u32 %v1097_v25, %v1012_v24  ;;  %v1004_v30 = vld [vmem:[%s2078_s1 + $0x20] sm:$0xf] }
   0x8   :  { %181 = vmatpush.bf16.msra.mxu0 %v1037_v10  ;;  %1107 = vmatpush.bf16.msra.mxu2 %v1037_v10  ;;  %v1017_v29 = vor.u32 %v1096_v26, %v1014_v27  ;;  %v1095_v31 = vld [vmem:[%s2078_s1 + $0x24] sm:$0xf0]  ;;  %v1094_v32 = vld [vmem:[%s2078_s1 + $0x24] sm:$0xf]  ;;  %v1006_v33 = vld [vmem:[%s2078_s1 + $0x28] sm:$0xf0] }
   0x9   :  { %230 = vmatpush.bf16.msra.mxu1 %v1041_v11  ;;  %1115 = vmatpush.bf16.msra.mxu3 %v1041_v11  ;;  %v1005_v34 = vor.u32 %v1095_v31, %v1004_v30  ;;  %v1009_v35 = vor.u32 %v1094_v32, %v1006_v33  ;;  %v996_v36 = vld [vmem:[%s2078_s1 + $0x10] sm:$0xf]  ;;  %v1093_v37 = vld [vmem:[%s2078_s1 + $0x14] sm:$0xf0]  ;;  %v1092_v38 = vld [vmem:[%s2078_s1 + $0x14] sm:$0xf] }
   0xa   :  { %v998_v39 = vld [vmem:[%s2078_s1 + $0x18] sm:$0xf0]  ;;  %v997_v40 = vor.u32 %v1093_v37, %v996_v36  ;;  %v988_v42 = vld [vmem:[%s2078_s1] sm:$0xf]  ;;  %v1091_v43 = vld [vmem:[%s2078_s1 + $0x4] sm:$0xf0] }
   0xb   :  { %v1001_v41 = vor.u32 %v1092_v38, %v998_v39  ;;  %v1090_v44 = vld [vmem:[%s2078_s1 + $0x4] sm:$0xf]  ;;  %v990_v45 = vld [vmem:[%s2078_s1 + $0x8] sm:$0xf0]  ;;  %v989_v46 = vor.u32 %v1091_v43, %v988_v42  ;;  %v1084_v52 = vld [vmem:[%s2079_s0 + $0x10] sm:$0xff] }
   0xc   :  { %182 = vmatpush.bf16.msra.mxu0 %v1029_v16  ;;  %1108 = vmatpush.bf16.msra.mxu2 %v1029_v16  ;;  %v993_v47 = vor.u32 %v1090_v44, %v990_v45  ;;  %v1082_v48 = vld [vmem:[%s2079_s0] sm:$0xff]  ;;  %v1083_v50 = vld [vmem:[%s2079_s0 + $0x8] sm:$0xff]  ;;  %v1088_v53 = vld [vmem:[%s2079_s0 + $0x30] sm:$0xff] }
   0xd   :  { %231 = vmatpush.bf16.msra.mxu1 %v1033_v17  ;;  %1116 = vmatpush.bf16.msra.mxu3 %v1033_v17  ;;  %v1086_v49 = vld [vmem:[%s2079_s0 + $0x20] sm:$0xff]  ;;  %v1087_v51 = vld [vmem:[%s2079_s0 + $0x28] sm:$0xff]  ;;  %v1085_v54 = vld [vmem:[%s2079_s0 + $0x18] sm:$0xff] }
   0xe   :  { %v1089_v55 = vld [vmem:[%s2079_s0 + $0x38] sm:$0xff]  ;;  %v46_v56 = vld [vmem:[%s2080_s2] sm:$0x3] }
   0xf   :  { %v1393_v57 = vperm.slane %v46_v56, 0  ;;  %v1395_v58 = vperm.slane %v46_v56, 1 }
  0x10   :  { %183 = vmatpush.bf16.msra.mxu0 %v1021_v22  ;;  %1109 = vmatpush.bf16.msra.mxu2 %v1021_v22 }
  0x11   :  { %232 = vmatpush.bf16.msra.mxu1 %v1025_v23  ;;  %1117 = vmatpush.bf16.msra.mxu3 %v1025_v23 }
  0x14   :  { %184 = vmatpush.bf16.msra.mxu0 %v1013_v28  ;;  %1110 = vmatpush.bf16.msra.mxu2 %v1013_v28 }
  0x15   :  { %233 = vmatpush.bf16.msra.mxu1 %v1017_v29  ;;  %1118 = vmatpush.bf16.msra.mxu3 %v1017_v29 }
  0x18   :  { %185 = vmatpush.bf16.msra.mxu0 %v1005_v34  ;;  %1111 = vmatpush.bf16.msra.mxu2 %v1005_v34 }
  0x19   :  { %234 = vmatpush.bf16.msra.mxu1 %v1009_v35  ;;  %1119 = vmatpush.bf16.msra.mxu3 %v1009_v35 }
  0x1c   :  { %186 = vmatpush.bf16.msra.mxu0 %v997_v40  ;;  %1112 = vmatpush.bf16.msra.mxu2 %v997_v40 }
  0x1d   :  { %235 = vmatpush.bf16.msra.mxu1 %v1001_v41  ;;  %1120 = vmatpush.bf16.msra.mxu3 %v1001_v41 }
  0x20   :  { %187 = vmatpush.bf16.msra.mxu0 %v989_v46  ;;  %1113 = vmatpush.bf16.msra.mxu2 %v989_v46 }
  0x21   :  { %236 = vmatpush.bf16.msra.mxu1 %v993_v47  ;;  %1121 = vmatpush.bf16.msra.mxu3 %v993_v47 }
  0x23   :  { %188 = vmatmul.bf16.vlgmr.msra.gmra.mxu0 %v1082_v48  ;;  %208 = vmatmul.bf16.vlgmr.msra.gmra.mxu2 %v1086_v49 }
  0x24   :  { %237 = vmatmul.bf16.vlgmr.msra.gmra.mxu1 %v1082_v48  ;;  %257 = vmatmul.bf16.vlgmr.msra.gmra.mxu3 %v1086_v49 }
  0x33   :  { %193 = vmatmul.bf16.gmra.mxu0 %v1083_v50  ;;  %213 = vmatmul.bf16.gmra.mxu2 %v1087_v51 }
  0x34   :  { %242 = vmatmul.bf16.gmra.mxu1 %v1083_v50  ;;  %262 = vmatmul.bf16.gmra.mxu3 %v1087_v51 }
  0x43   :  { %198 = vmatmul.bf16.gmra.mxu0 %v1084_v52  ;;  %218 = vmatmul.bf16.gmra.mxu2 %v1088_v53 }
  0x44   :  { %247 = vmatmul.bf16.gmra.mxu1 %v1084_v52  ;;  %267 = vmatmul.bf16.gmra.mxu3 %v1088_v53 }
  0x53   :  { %203 = vmatmul.bf16.gmra.mxu0 %v1085_v54  ;;  %223 = vmatmul.bf16.gmra.mxu2 %v1089_v55 }
  0x54   :  { %252 = vmatmul.bf16.gmra.mxu1 %v1085_v54  ;;  %272 = vmatmul.bf16.gmra.mxu3 %v1089_v55 }
  0xa0   :  { %v189_v59 = vpop.f32.mrf.mxu0 }
  0xa1   :  { %v1398_v60 = vadd.f32 %v189_v59, %v1393_v57  ;;  %v238_v61 = vpop.f32.mrf.mxu1 }
  0xa2   :  { %v1401_v62 = vadd.f32 %v238_v61, %v1395_v58 }
  0xa3   :  { %v1050_v63 = vmul.f32 -1.442695, %v1398_v60 }
  0xa4   :  { %v1051_v0 = vmul.f32 -1.442695, %v1401_v62 }
  0xa5   :  { %1122 = vpow2.f32 %v1050_v63 }
  0xa6   :  { %1124 = vpow2.f32 %v1051_v0  ;;  %v209_v1 = vpop.f32.mrf.mxu2 }
  0xa7   :  { %v1406_v2 = vadd.f32 %v209_v1, %v1393_v57  ;;  %v258_v3 = vpop.f32.mrf.mxu3 }
  0xa8   :  { %v1409_v4 = vadd.f32 %v258_v3, %v1395_v58  ;;  %v191_v5 = vpop.f32.mrf.mxu0 }
  0xa9   :  { %v1066_v6 = vmul.f32 -1.442695, %v1406_v2  ;;  %v1413_v7 = vadd.f32 %v191_v5, %v1393_v57  ;;  %v240_v8 = vpop.f32.mrf.mxu1 }
  0xaa   :  { %v1067_v9 = vmul.f32 -1.442695, %v1409_v4  ;;  %v1417_v10 = vadd.f32 %v240_v8, %v1395_v58 }
  0xab   :  { %v1123_v11 = vpop.eup %1122  ;;  %1126 = vpow2.f32 %v1066_v6  ;;  %v1052_v12 = vmul.f32 -1.442695, %v1413_v7 }
  0xac   :  { %v1125_v13 = vpop.eup %1124  ;;  %v1420_v14 = vadd.f32 1.0, %v1123_v11  ;;  %1128 = vpow2.f32 %v1067_v9  ;;  %v1053_v15 = vmul.f32 -1.442695, %v1417_v10 }
  0xad   :  { %v1423_v16 = vadd.f32 1.0, %v1125_v13  ;;  %1130 = vpow2.f32 %v1052_v12 }
  0xae   :  { %1132 = vrcp.f32 %v1420_v14  ;;  %v211_v17 = vpop.f32.mrf.mxu2  ;;  %v417_v19 = vand.u32 2147483648, %v1420_v14  ;;  %v415_v23 = vand.u32 2147483647, %v1420_v14  ;;  %vm411_vm0 = vweird.f32 %v1420_v14 }
  0xaf   :  { %1134 = vrcp.f32 %v1423_v16  ;;  %v260_v18 = vpop.f32.mrf.mxu3  ;;  %v1429_v20 = vadd.f32 %v211_v17, %v1393_v57  ;;  %v432_v24 = vand.u32 2147483648, %v1423_v16  ;;  %v430_v26 = vand.u32 2147483647, %v1423_v16 }
  0xb0   :  { %1136 = vpow2.f32 %v1053_v15  ;;  %v194_v21 = vpop.f32.mrf.mxu0  ;;  %v1437_v28 = vadd.f32 %v260_v18, %v1395_v58  ;;  %v418_v34 = vor.u32 1.1754944e-38, %v417_v19  ;;  %vm426_vm1 = vweird.f32 %v1423_v16 }
  0xb1   :  { %v1127_v22 = vpop.eup %1126  ;;  %v1440_v29 = vadd.f32 %v194_v21, %v1393_v57  ;;  %v243_v30 = vpop.f32.mrf.mxu1  ;;  %v1068_v35 = vmul.f32 -1.442695, %v1429_v20  ;;  %vm1449_vm2 = vcmp.eq.f32.partialorder %v415_v23, 8.507059e+37  ;;  %v433_v39 = vor.u32 1.1754944e-38, %v432_v24 }
  0xb2   :  { %v1129_v25 = vpop.eup %1128  ;;  %v1434_v27 = vadd.f32 1.0, %v1127_v22  ;;  %v1455_v40 = vadd.f32 %v243_v30, %v1395_v58  ;;  %vm1458_vm3 = vcmp.eq.f32.partialorder %v430_v26, 8.507059e+37  ;;  %v1464_v45 = vmul.f32 -1.442695, %v1437_v28 }
  0xb3   :  { %v1131_v31 = vpop.eup %1130  ;;  %v1443_v32 = vadd.f32 1.0, %v1129_v25  ;;  %v1467_v46 = vmul.f32 -1.442695, %v1440_v29 }
  0xb4   :  { %v1133_v33 = vpop.eup %1132  ;;  %1138 = vrcp.f32 %v1434_v27  ;;  %v657_v44 = vand.u32 2147483648, %v1434_v27  ;;  %v655_v48 = vand.u32 2147483647, %v1434_v27  ;;  %v1471_v50 = vadd.f32 1.0, %v1131_v31 }
  0xb5   :  { %v1135_v36 = vpop.eup %1134  ;;  %v407_v37 = vmul.f32 %v1133_v33, %v1420_v14  ;;  %1140 = vrcp.f32 %v1443_v32  ;;  %v670_v49 = vand.u32 2147483647, %v1443_v32  ;;  %v672_v52 = vand.u32 2147483648, %v1443_v32 }
  0xb6   :  { %v1137_v41 = vpop.eup %1136  ;;  %v422_v42 = vmul.f32 %v1135_v36, %v1423_v16  ;;  %1142 = vpow2.f32 %v1068_v35  ;;  %vm412_vm4 = vweird.f32 %v1133_v33  ;;  %vm651_vm5 = vweird.f32 %v1434_v27 }
  0xb7   :  { %v408_v47 = vsub.f32 1.0, %v407_v37  ;;  %v1474_v53 = vadd.f32 1.0, %v1137_v41  ;;  %1144 = vrcp.f32 %v1471_v50  ;;  %vm427_vm6 = vweird.f32 %v1135_v36  ;;  %vm413_vm9 = vmor %vm411_vm0, %vm412_vm4 }
  0xb8   :  { %v423_v51 = vsub.f32 1.0, %v422_v42  ;;  %v658_v59 = vor.u32 1.1754944e-38, %v657_v44  ;;  %vm666_vm7 = vweird.f32 %v1443_v32  ;;  %vm1480_vm8 = vcmp.eq.f32.partialorder %v655_v48, 8.507059e+37  ;;  %vm428_vm11 = vmor %vm426_vm1, %vm427_vm6  ;;  %v214_v44 = vpop.f32.mrf.mxu2 }
  0xb9   :  { %v409_v54 = vmul.f32 %v1133_v33, %v408_v47  ;;  %1146 = vrcp.f32 %v1474_v53  ;;  %v1486_v3 = vmul.f32 -1.442695, %v1455_v40  ;;  %vm1491_vm10 = vcmp.eq.f32.partialorder %v670_v49, 8.507059e+37 }
  0xba   :  { %v1139_v55 = vpop.eup %1138  ;;  %v424_v56 = vmul.f32 %v1135_v36, %v423_v51  ;;  %v673_v9 = vor.u32 1.1754944e-38, %v672_v52  ;;  %v445_v13 = vand.u32 2147483647, %v1471_v50  ;;  %v447_v15 = vand.u32 2147483648, %v1471_v50 }
  0xbb   :  { %v1141_v61 = vpop.eup %1140  ;;  %v410_v63 = vadd.f32 %v1133_v33, %v409_v54  ;;  %v647_v0 = vmul.f32 %v1139_v55, %v1434_v27  ;;  %vm441_vm12 = vweird.f32 %v1471_v50  ;;  %vm652_vm13 = vweird.f32 %v1139_v55  ;;  %v263_v54 = vpop.f32.mrf.mxu3 }
  0xbc   :  { %v425_v5 = vadd.f32 %v1135_v36, %v424_v56  ;;  %v662_v6 = vmul.f32 %v1141_v61, %v1443_v32  ;;  %v1143_v14 = vpop.eup %1142  ;;  %vm667_vm14 = vweird.f32 %v1141_v61  ;;  %vm1508_vm15 = vcmp.eq.f32.partialorder %v445_v13, 8.507059e+37  ;;  %vm653_vm0 = vmor %vm651_vm5, %vm652_vm13 }
  0xbd   :  { %v414_v11 = vsel %vm413_vm9, %v1133_v33, %v410_v63  ;;  %v648_v12 = vsub.f32 1.0, %v647_v0  ;;  %v1145_v21 = vpop.eup %1144  ;;  %v1512_v35 = vadd.f32 1.0, %v1143_v14  ;;  %vm668_vm1 = vmor %vm666_vm7, %vm667_vm14  ;;  %v460_v48 = vand.u32 2147483647, %v1474_v53 }
  0xbe   :  { %v419_v17 = vsel %vm1449_vm2, %v418_v34, %v414_v11  ;;  %v429_v18 = vsel %vm428_vm11, %v1135_v36, %v425_v5  ;;  %v663_v19 = vsub.f32 1.0, %v662_v6  ;;  %v437_v26 = vmul.f32 %v1145_v21, %v1471_v50 }
  0xbf   :  { %v886_v22 = vmul.f32 %v419_v17, %v1398_v60  ;;  %v434_v16 = vsel %vm1458_vm3, %v433_v39, %v429_v18  ;;  %v649_v23 = vmul.f32 %v1139_v55, %v648_v12  ;;  %v1147_v30 = vpop.eup %1146  ;;  %v448_v34 = vor.u32 1.1754944e-38, %v447_v15 }
  0xc0   :  { %v887_v24 = vmul.f32 %v434_v16, %v1401_v62  ;;  %v664_v25 = vmul.f32 %v1141_v61, %v663_v19  ;;  %v438_v37 = vsub.f32 1.0, %v437_v26  ;;  %v452_v62 = vmul.f32 %v1147_v30, %v1474_v53  ;;  %v216_v16 = vpop.f32.mrf.mxu2 }
  0xc1   :  { %v650_v31 = vadd.f32 %v1139_v55, %v649_v23  ;;  %vm442_vm2 = vweird.f32 %v1145_v21  ;;  %v462_v39 = vand.u32 2147483648, %v1474_v53  ;;  %1148 = vrcp.f32 %v1512_v35 }
  0xc2   :  { %v918_v60 = vpack.c.bf16 %v887_v24, %v886_v22  ;;  %v665_v36 = vadd.f32 %v1141_v61, %v664_v25  ;;  %v439_v42 = vmul.f32 %v1145_v21, %v438_v37  ;;  %v453_v43 = vsub.f32 1.0, %v452_v62  ;;  %vm443_vm4 = vmor %vm441_vm12, %vm442_vm2  ;;  %v245_v22 = vpop.f32.mrf.mxu1 }
  0xc3   :  { %v654_v38 = vsel %vm653_vm0, %v1139_v55, %v650_v31  ;;  %vm457_vm3 = vweird.f32 %v1147_v30  ;;  %1150 = vpow2.f32 %v1464_v45  ;;  %v196_v55 = vpop.f32.mrf.mxu0  ;;  %vm456_vm5 = vweird.f32 %v1474_v53  ;;  %v265_v33 = vpop.f32.mrf.mxu3 }
  0xc4   :  { %934 = vst [vmem:[%s2081_s3] sm:$0xff] %v918_v60  ;;  %v659_v27 = vsel %vm1480_vm8, %v658_v59, %v654_v38  ;;  %v669_v41 = vsel %vm668_vm1, %v1141_v61, %v665_v36  ;;  %v440_v51 = vadd.f32 %v1145_v21, %v439_v42  ;;  %v454_v52 = vmul.f32 %v1147_v30, %v453_v43  ;;  %vm458_vm6 = vmor %vm456_vm5, %vm457_vm3 }
  0xc5   :  { %v902_v47 = vmul.f32 %v659_v27, %v1406_v2  ;;  %v674_v32 = vsel %vm1491_vm10, %v673_v9, %v669_v41  ;;  %v463_v2 = vor.u32 1.1754944e-38, %v462_v39  ;;  %1152 = vpow2.f32 %v1467_v46 }
  0xc6   :  { %v903_v49 = vmul.f32 %v674_v32, %v1409_v4  ;;  %v1538_v56 = vadd.f32 %v214_v44, %v1393_v57  ;;  %v444_v4 = vsel %vm443_vm4, %v1145_v21, %v440_v51  ;;  %v455_v61 = vadd.f32 %v1147_v30, %v454_v52 }
  0xc7   :  { %1154 = vpow2.f32 %v1486_v3  ;;  %v1149_v45 = vpop.eup %1148  ;;  %v449_v63 = vsel %vm1508_vm15, %v448_v34, %v444_v4  ;;  %v1546_v53 = vadd.f32 %v263_v54, %v1395_v58  ;;  %v1549_v46 = vadd.f32 %v196_v55, %v1393_v57 }
  0xc8   :  { %v926_v59 = vpack.c.bf16 %v903_v49, %v902_v47  ;;  %v1070_v50 = vmul.f32 -1.442695, %v1538_v56  ;;  %v888_v0 = vmul.f32 %v449_v63, %v1413_v7  ;;  %v459_v1 = vsel %vm458_vm6, %v1147_v30, %v455_v61 }
  0xc9   :  { %vm461_vm7 = vcmp.eq.f32.partialorder %v460_v48, 8.507059e+37  ;;  %v677_v3 = vmul.f32 %v1149_v45, %v1512_v35  ;;  %v1071_v6 = vmul.f32 -1.442695, %v1546_v53  ;;  %v1056_v8 = vmul.f32 -1.442695, %v1549_v46  ;;  %v1151_v9 = vpop.eup %1150 }
  0xca   :  { %942 = vst [vmem:[%s2081_s3 + $0x40] sm:$0xff] %v926_v59  ;;  %v464_v5 = vsel %vm461_vm7, %v463_v2, %v459_v1  ;;  %1156 = vpow2.f32 %v1070_v50  ;;  %v685_v13 = vand.u32 2147483647, %v1512_v35  ;;  %vm682_vm8 = vweird.f32 %v1149_v45 }
  0xcb   :  { %v889_v11 = vmul.f32 %v464_v5, %v1417_v10  ;;  %v678_v12 = vsub.f32 1.0, %v677_v3  ;;  %v1153_v15 = vpop.eup %1152  ;;  %v687_v7 = vand.u32 2147483648, %v1512_v35  ;;  %v1561_v14 = vadd.f32 1.0, %v1151_v9  ;;  %v199_v34 = vpop.f32.mrf.mxu0 }
  0xcc   :  { %1158 = vpow2.f32 %v1071_v6  ;;  %v1563_v21 = vadd.f32 1.0, %v1153_v15  ;;  %vm681_vm9 = vweird.f32 %v1512_v35  ;;  %vm1576_vm11 = vcmp.eq.f32.partialorder %v685_v13, 8.507059e+37 }
  0xcd   :  { %v1155_v17 = vpop.eup %1154  ;;  %v919_v18 = vpack.c.bf16 %v889_v11, %v888_v0  ;;  %v679_v19 = vmul.f32 %v1149_v45, %v678_v12  ;;  %1160 = vpow2.f32 %v1056_v8  ;;  %vm1572_vm10 = vmor %vm681_vm9, %vm682_vm8  ;;  %v688_v26 = vor.u32 1.1754944e-38, %v687_v7 }
  0xce   :  { %1162 = vrcp.f32 %v1561_v14  ;;  %v1580_v30 = vadd.f32 1.0, %v1155_v17  ;;  %v1583_v31 = vadd.f32 %v245_v22, %v1395_v58  ;;  %v700_v60 = vand.u32 2147483647, %v1561_v14 }
  0xcf   :  { %935 = vst [vmem:[%s2081_s3 + $0x8] sm:$0xff] %v919_v18  ;;  %v680_v10 = vadd.f32 %v1149_v45, %v679_v19  ;;  %1164 = vrcp.f32 %v1563_v21  ;;  %v702_v36 = vand.u32 2147483648, %v1561_v14  ;;  %v475_v38 = vand.u32 2147483647, %v1563_v21 }
  0xd0   :  { %v1157_v23 = vpop.eup %1156  ;;  %v477_v39 = vand.u32 2147483648, %v1563_v21  ;;  %1166 = vrcp.f32 %v1580_v30  ;;  %v1595_v27 = vadd.f32 %v216_v16, %v1393_v57  ;;  %vm696_vm12 = vweird.f32 %v1561_v14 }
  0xd1   :  { %v684_v35 = vsel %vm1572_vm10, %v1149_v45, %v680_v10  ;;  %v1589_v37 = vadd.f32 1.0, %v1157_v23  ;;  %v1600_v42 = vadd.f32 %v265_v33, %v1395_v58  ;;  %v1603_v43 = vadd.f32 %v199_v34, %v1393_v57 }
  0xd2   :  { %v1159_v62 = vpop.eup %1158  ;;  %v689_v47 = vsel %vm1576_vm11, %v688_v26, %v684_v35  ;;  %vm471_vm13 = vweird.f32 %v1563_v21  ;;  %v1057_v48 = vmul.f32 -1.442695, %v1583_v31  ;;  %vm1612_vm14 = vcmp.eq.f32.partialorder %v700_v60, 8.507059e+37 }
  0xd3   :  { %v1161_v41 = vpop.eup %1160  ;;  %1168 = vrcp.f32 %v1589_v37  ;;  %v1608_v32 = vadd.f32 1.0, %v1159_v62  ;;  %v703_v54 = vor.u32 1.1754944e-38, %v702_v36  ;;  %v490_v55 = vand.u32 2147483647, %v1580_v30 }
  0xd4   :  { %v1163_v44 = vpop.eup %1162  ;;  %v492_v2 = vand.u32 2147483648, %v1580_v30  ;;  %vm1619_vm15 = vcmp.eq.f32.partialorder %v475_v38, 8.507059e+37  ;;  %v478_v61 = vor.u32 1.1754944e-38, %v477_v39  ;;  %vm486_vm0 = vweird.f32 %v1580_v30 }
  0xd5   :  { %v1165_v49 = vpop.eup %1164  ;;  %v692_v51 = vmul.f32 %v1163_v44, %v1561_v14  ;;  %v715_v45 = vand.u32 2147483647, %v1589_v37  ;;  %v904_v63 = vmul.f32 %v689_v47, %v1429_v20  ;;  %v717_v0 = vand.u32 2147483648, %v1589_v37 }
  0xd6   :  { %v467_v59 = vmul.f32 %v1165_v49, %v1563_v21  ;;  %1170 = vrcp.f32 %v1608_v32  ;;  %v1167_v1 = vpop.eup %1166  ;;  %vm697_vm1 = vweird.f32 %v1163_v44  ;;  %vm711_vm2 = vweird.f32 %v1589_v37 }
  0xd7   :  { %v693_v50 = vsub.f32 1.0, %v692_v51  ;;  %v1629_v5 = vadd.f32 1.0, %v1161_v41  ;;  %1172 = vpow2.f32 %v1057_v48  ;;  %v482_v9 = vmul.f32 %v1167_v1, %v1580_v30  ;;  %vm698_vm6 = vmor %vm696_vm12, %vm697_vm1 }
  0xd8   :  { %v468_v3 = vsub.f32 1.0, %v467_v59  ;;  %vm1632_vm3 = vcmp.eq.f32.partialorder %v490_v55, 8.507059e+37  ;;  %v493_v20 = vor.u32 1.1754944e-38, %v492_v2  ;;  %vm472_vm4 = vweird.f32 %v1165_v49 }
  0xd9   :  { %v1169_v6 = vpop.eup %1168  ;;  %v694_v8 = vmul.f32 %v1163_v44, %v693_v50  ;;  %vm1637_vm5 = vcmp.eq.f32.partialorder %v715_v45, 8.507059e+37  ;;  %v483_v17 = vsub.f32 1.0, %v482_v9  ;;  %v718_v18 = vor.u32 1.1754944e-38, %v717_v0  ;;  %vm473_vm8 = vmor %vm471_vm13, %vm472_vm4  ;;  %v219_v0 = vpop.f32.mrf.mxu2 }
  0xda   :  { %v469_v12 = vmul.f32 %v1165_v49, %v468_v3  ;;  %v707_v13 = vmul.f32 %v1169_v6, %v1589_v37  ;;  %1174 = vrcp.f32 %v1629_v5  ;;  %vm726_vm7 = vweird.f32 %v1608_v32 }
  0xdb   :  { %v695_v7 = vadd.f32 %v1163_v44, %v694_v8  ;;  %v730_v10 = vand.u32 2147483647, %v1608_v32  ;;  %v732_v16 = vand.u32 2147483648, %v1608_v32  ;;  %v484_v25 = vmul.f32 %v1167_v1, %v483_v17  ;;  %v268_v8 = vpop.f32.mrf.mxu3 }
  0xdc   :  { %v470_v19 = vadd.f32 %v1165_v49, %v469_v12  ;;  %v708_v22 = vsub.f32 1.0, %v707_v13  ;;  %v1171_v23 = vpop.eup %1170  ;;  %vm487_vm9 = vweird.f32 %v1167_v1  ;;  %vm712_vm10 = vweird.f32 %v1169_v6 }
  0xdd   :  { %v699_v24 = vsel %vm698_vm6, %v1163_v44, %v695_v7  ;;  %v1173_v26 = vpop.eup %1172  ;;  %v722_v35 = vmul.f32 %v1171_v23, %v1608_v32  ;;  %v485_v62 = vadd.f32 %v1167_v1, %v484_v25  ;;  %v1072_v21 = vmul.f32 -1.442695, %v1595_v27  ;;  %vm488_vm11 = vmor %vm486_vm0, %vm487_vm9  ;;  %v248_v44 = vpop.f32.mrf.mxu1 }
  0xde   :  { %v704_v14 = vsel %vm1612_vm14, %v703_v54, %v699_v24  ;;  %v474_v33 = vsel %vm473_vm8, %v1165_v49, %v470_v19  ;;  %v709_v34 = vmul.f32 %v1169_v6, %v708_v22  ;;  %vm727_vm12 = vweird.f32 %v1171_v23  ;;  %vm713_vm13 = vmor %vm711_vm2, %vm712_vm10  ;;  %v201_v7 = vpop.f32.mrf.mxu0 }
  0xdf   :  { %v905_v60 = vmul.f32 %v704_v14, %v1437_v28  ;;  %v479_v36 = vsel %vm1619_vm15, %v478_v61, %v474_v33  ;;  %v723_v39 = vsub.f32 1.0, %v722_v35  ;;  %v1073_v41 = vmul.f32 -1.442695, %v1600_v42  ;;  %vm728_vm15 = vmor %vm726_vm7, %vm727_vm12 }
  0xe0   :  { %v710_v38 = vadd.f32 %v1169_v6, %v709_v34  ;;  %v1661_v47 = vpop.eup %1174  ;;  %v890_v28 = vmul.f32 %v479_v36, %v1440_v29  ;;  %v489_v49 = vsel %vm488_vm11, %v1167_v1, %v485_v62  ;;  %v1667_v51 = vadd.f32 1.0, %v1173_v26 }
  0xe1   :  { %v927_v48 = vpack.c.bf16 %v905_v60, %v904_v63  ;;  %v494_v30 = vsel %vm1632_vm3, %v493_v20, %v489_v49  ;;  %v724_v54 = vmul.f32 %v1171_v23, %v723_v39  ;;  %v497_v55 = vmul.f32 %v1661_v47, %v1629_v5  ;;  %v221_v39 = vpop.f32.mrf.mxu2 }
  0xe2   :  { %v714_v52 = vsel %vm713_vm13, %v1169_v6, %v710_v38  ;;  %v891_v29 = vmul.f32 %v494_v30, %v1455_v40  ;;  %vm1679_vm14 = vcmp.eq.f32.partialorder %v730_v10, 8.507059e+37  ;;  %1176 = vrcp.f32 %v1667_v51 }
  0xe3   :  { %943 = vst [vmem:[%s2081_s3 + $0x48] sm:$0xff] %v927_v48  ;;  %v719_v37 = vsel %vm1637_vm5, %v718_v18, %v714_v52  ;;  %v725_v59 = vadd.f32 %v1171_v23, %v724_v54  ;;  %v733_v4 = vor.u32 1.1754944e-38, %v732_v16  ;;  %v498_v61 = vsub.f32 1.0, %v497_v55 }
  0xe4   :  { %v505_v45 = vand.u32 2147483647, %v1629_v5  ;;  %v920_v63 = vpack.c.bf16 %v891_v29, %v890_v28  ;;  %v906_v50 = vmul.f32 %v719_v37, %v1538_v56  ;;  %v507_v40 = vand.u32 2147483648, %v1629_v5 }
  0xe5   :  { %1178 = vpow2.f32 %v1072_v21  ;;  %v729_v1 = vsel %vm728_vm15, %v1171_v23, %v725_v59  ;;  %v499_v3 = vmul.f32 %v1661_v47, %v498_v61  ;;  %v1058_v6 = vmul.f32 -1.442695, %v1603_v43  ;;  %v250_v10 = vpop.f32.mrf.mxu1 }
  0xe6   :  { %1180 = vpow2.f32 %v1073_v41  ;;  %936 = vst [vmem:[%s2081_s3 + $0x10] sm:$0xff] %v920_v63  ;;  %v734_v56 = vsel %vm1679_vm14, %v733_v4, %v729_v1  ;;  %vm502_vm0 = vweird.f32 %v1661_v47  ;;  %v1699_v32 = vadd.f32 %v248_v44, %v1395_v58 }
  0xe7   :  { %v907_v9 = vmul.f32 %v734_v56, %v1546_v53  ;;  %v500_v11 = vadd.f32 %v1661_v47, %v499_v3  ;;  %1182 = vpow2.f32 %v1058_v6  ;;  %v1704_v20 = vadd.f32 %v219_v0, %v1393_v57  ;;  %v270_v6 = vpop.f32.mrf.mxu3 }
  0xe8   :  { %v1177_v12 = vpop.eup %1176  ;;  %vm501_vm1 = vweird.f32 %v1629_v5  ;;  %v1059_v13 = vmul.f32 -1.442695, %v1699_v32  ;;  %v1709_v15 = vadd.f32 %v268_v8, %v1395_v58  ;;  %vm1715_vm3 = vcmp.eq.f32.partialorder %v505_v45, 8.507059e+37 }
  0xe9   :  { %v928_v17 = vpack.c.bf16 %v907_v9, %v906_v50  ;;  %vm1711_vm2 = vmor %vm501_vm1, %vm502_vm0  ;;  %v508_v19 = vor.u32 1.1754944e-38, %v507_v40  ;;  %v512_v22 = vmul.f32 %v1177_v12, %v1667_v51  ;;  %v520_v23 = vand.u32 2147483647, %v1667_v51 }
  0xea   :  { %v504_v16 = vsel %vm1711_vm2, %v1661_v47, %v500_v11  ;;  %1184 = vpow2.f32 %v1059_v13  ;;  %v1074_v24 = vmul.f32 -1.442695, %v1704_v20  ;;  %v522_v14 = vand.u32 2147483648, %v1667_v51 }
  0xeb   :  { %v1179_v5 = vpop.eup %1178  ;;  %944 = vst [vmem:[%s2081_s3 + $0x50] sm:$0xff] %v928_v17  ;;  %v513_v26 = vsub.f32 1.0, %v512_v22  ;;  %v1732_v34 = vadd.f32 %v201_v7, %v1393_v57  ;;  %v1075_v60 = vmul.f32 -1.442695, %v1709_v15  ;;  %v1738_v36 = vadd.f32 %v250_v10, %v1395_v58 }
  0xec   :  { %v1181_v25 = vpop.eup %1180  ;;  %v1729_v33 = vadd.f32 1.0, %v1179_v5  ;;  %1186 = vpow2.f32 %v1074_v24  ;;  %v509_v21 = vsel %vm1715_vm3, %v508_v19, %v504_v16  ;;  %vm517_vm4 = vweird.f32 %v1177_v12 }
  0xed   :  { %v1734_v35 = vadd.f32 1.0, %v1181_v25  ;;  %v1183_v62 = vpop.eup %1182  ;;  %v514_v38 = vmul.f32 %v1177_v12, %v513_v26  ;;  %vm516_vm5 = vweird.f32 %v1667_v51  ;;  %vm521_vm6 = vcmp.eq.f32.partialorder %v520_v23, 8.507059e+37 }
  0xee   :  { %1188 = vrcp.f32 %v1729_v33  ;;  %v1745_v44 = vadd.f32 1.0, %v1183_v62  ;;  %v1060_v47 = vmul.f32 -1.442695, %v1732_v34  ;;  %v892_v28 = vmul.f32 %v509_v21, %v1549_v46  ;;  %vm518_vm7 = vmor %vm516_vm5, %vm517_vm4 }
  0xef   :  { %1190 = vrcp.f32 %v1734_v35  ;;  %v515_v41 = vadd.f32 %v1177_v12, %v514_v38  ;;  %v523_v49 = vor.u32 1.1754944e-38, %v522_v14  ;;  %v745_v30 = vand.u32 2147483647, %v1729_v33 }
  0xf0   :  { %v1185_v48 = vpop.eup %1184  ;;  %1192 = vpow2.f32 %v1075_v60  ;;  %v1061_v51 = vmul.f32 -1.442695, %v1738_v36  ;;  %v1753_v54 = vadd.f32 %v221_v39, %v1393_v57  ;;  %vm741_vm8 = vweird.f32 %v1729_v33 }
  0xf1   :  { %v519_v52 = vsel %vm518_vm7, %v1177_v12, %v515_v41  ;;  %1194 = vrcp.f32 %v1745_v44  ;;  %v747_v37 = vand.u32 2147483648, %v1729_v33  ;;  %v760_v46 = vand.u32 2147483647, %v1734_v35 }
  0xf2   :  { %v1187_v55 = vpop.eup %1186  ;;  %v524_v29 = vsel %vm521_vm6, %v523_v49, %v519_v52  ;;  %v1758_v2 = vadd.f32 1.0, %v1185_v48  ;;  %v762_v61 = vand.u32 2147483648, %v1734_v35  ;;  %1196 = vpow2.f32 %v1060_v47 }
  0xf3   :  { %v893_v4 = vmul.f32 %v524_v29, %v1583_v31  ;;  %v1762_v45 = vadd.f32 1.0, %v1187_v55  ;;  %vm1765_vm9 = vcmp.eq.f32.partialorder %v745_v30, 8.507059e+37  ;;  %vm756_vm10 = vweird.f32 %v1734_v35 }
  0xf4   :  { %v1189_v59 = vpop.eup %1188  ;;  %v535_v0 = vand.u32 2147483647, %v1745_v44  ;;  %v537_v31 = vand.u32 2147483648, %v1745_v44  ;;  %1198 = vrcp.f32 %v1758_v2  ;;  %v748_v9 = vor.u32 1.1754944e-38, %v747_v37 }
  0xf5   :  { %v1191_v63 = vpop.eup %1190  ;;  %v737_v50 = vmul.f32 %v1189_v59, %v1729_v33  ;;  %v921_v1 = vpack.c.bf16 %v893_v4, %v892_v28  ;;  %vm1774_vm11 = vcmp.eq.f32.partialorder %v760_v46, 8.507059e+37  ;;  %v1779_v12 = vmul.f32 -1.442695, %v1753_v54 }
  0xf6   :  { %v752_v3 = vmul.f32 %v1191_v63, %v1734_v35  ;;  %v1193_v8 = vpop.eup %1192  ;;  %v763_v17 = vor.u32 1.1754944e-38, %v762_v61  ;;  %vm531_vm12 = vweird.f32 %v1745_v44  ;;  %1200 = vrcp.f32 %v1762_v45 }
  0xf7   :  { %v738_v56 = vsub.f32 1.0, %v737_v50  ;;  %v1195_v13 = vpop.eup %1194  ;;  %937 = vst [vmem:[%s2081_s3 + $0x18] sm:$0xff] %v921_v1  ;;  %vm742_vm13 = vweird.f32 %v1189_v59  ;;  %v1788_v19 = vadd.f32 %v270_v6, %v1395_v58  ;;  %vm757_vm14 = vweird.f32 %v1191_v63  ;;  %v204_v50 = vpop.f32.mrf.mxu0 }
  0xf8   :  { %v753_v7 = vsub.f32 1.0, %v752_v3  ;;  %v527_v53 = vmul.f32 %v1195_v13, %v1745_v44  ;;  %v1197_v22 = vpop.eup %1196  ;;  %vm1790_vm15 = vcmp.eq.f32.partialorder %v535_v0, 8.507059e+37  ;;  %v538_v16 = vor.u32 1.1754944e-38, %v537_v31  ;;  %vm743_vm1 = vmor %vm741_vm8, %vm742_vm13 }
  0xf9   :  { %v739_v18 = vmul.f32 %v1189_v59, %v738_v56  ;;  %vm546_vm0 = vweird.f32 %v1758_v2  ;;  %v1795_v25 = vadd.f32 1.0, %v1193_v8  ;;  %vm532_vm2 = vweird.f32 %v1195_v13  ;;  %vm758_vm3 = vmor %vm756_vm10, %vm757_vm14 }
  0xfa   :  { %v754_v10 = vmul.f32 %v1191_v63, %v753_v7  ;;  %v528_v24 = vsub.f32 1.0, %v527_v53  ;;  %v1199_v26 = vpop.eup %1198  ;;  %v550_v60 = vand.u32 2147483647, %v1758_v2  ;;  %1202 = vpow2.f32 %v1061_v51  ;;  %vm533_vm4 = vmor %vm531_vm12, %vm532_vm2 }
  0xfb   :  { %v740_v23 = vadd.f32 %v1189_v59, %v739_v18  ;;  %v542_v38 = vmul.f32 %v1199_v26, %v1758_v2  ;;  %v1803_v39 = vadd.f32 1.0, %v1197_v22  ;;  %v552_v48 = vand.u32 2147483648, %v1758_v2 }
  0xfc   :  { %v755_v14 = vadd.f32 %v1191_v63, %v754_v10  ;;  %v529_v21 = vmul.f32 %v1195_v13, %v528_v24  ;;  %v1201_v41 = vpop.eup %1200  ;;  %1204 = vrcp.f32 %v1795_v25  ;;  %vm771_vm5 = vweird.f32 %v1762_v45  ;;  %v253_v10 = vpop.f32.mrf.mxu1 }
  0xfd   :  { %v744_v62 = vsel %vm743_vm1, %v1189_v59, %v740_v23  ;;  %v543_v30 = vsub.f32 1.0, %v542_v38  ;;  %v767_v51 = vmul.f32 %v1201_v41, %v1762_v45  ;;  %v775_v55 = vand.u32 2147483647, %v1762_v45  ;;  %v224_v24 = vpop.f32.mrf.mxu2 }
  0xfe   :  { %v749_v47 = vsel %vm1765_vm9, %v748_v9, %v744_v62  ;;  %v759_v33 = vsel %vm758_vm3, %v1191_v63, %v755_v14  ;;  %v530_v49 = vadd.f32 %v1195_v13, %v529_v21  ;;  %vm547_vm6 = vweird.f32 %v1199_v26 }
  0xff   :  { %v908_v28 = vmul.f32 %v749_v47, %v1595_v27  ;;  %v764_v35 = vsel %vm1774_vm11, %v763_v17, %v759_v33  ;;  %v544_v37 = vmul.f32 %v1199_v26, %v543_v30  ;;  %1206 = vrcp.f32 %v1803_v39  ;;  %vm548_vm9 = vmor %vm546_vm0, %vm547_vm6  ;;  %v273_v33 = vpop.f32.mrf.mxu3 }
 0x100   :  { %v909_v52 = vmul.f32 %v764_v35, %v1600_v42  ;;  %v534_v29 = vsel %vm533_vm4, %v1195_v13, %v530_v49  ;;  %v1203_v27 = vpop.eup %1202  ;;  %vm1822_vm7 = vcmp.eq.f32.partialorder %v550_v60, 8.507059e+37  ;;  %v768_v44 = vsub.f32 1.0, %v767_v51 }
 0x101   :  { %v539_v42 = vsel %vm1790_vm15, %v538_v16, %v534_v29  ;;  %v545_v4 = vadd.f32 %v1199_v26, %v544_v37  ;;  %v553_v61 = vor.u32 1.1754944e-38, %v552_v48  ;;  %vm772_vm8 = vweird.f32 %v1201_v41 }
 0x102   :  { %v929_v46 = vpack.c.bf16 %v909_v52, %v908_v28  ;;  %v777_v63 = vand.u32 2147483648, %v1762_v45  ;;  %v1205_v40 = vpop.eup %1204  ;;  %v769_v0 = vmul.f32 %v1201_v41, %v768_v44  ;;  %v790_v1 = vand.u32 2147483647, %v1795_v25  ;;  %vm773_vm11 = vmor %vm771_vm5, %vm772_vm8  ;;  %v206_v52 = vpop.f32.mrf.mxu0 }
 0x103   :  { %v792_v3 = vand.u32 2147483648, %v1795_v25  ;;  %v1834_v31 = vadd.f32 1.0, %v1203_v27  ;;  %v894_v6 = vmul.f32 %v539_v42, %v1603_v43  ;;  %v549_v8 = vsel %vm548_vm9, %v1199_v26, %v545_v4 }
 0x104   :  { %945 = vst [vmem:[%s2081_s3 + $0x58] sm:$0xff] %v929_v46  ;;  %v782_v56 = vmul.f32 %v1205_v40, %v1795_v25  ;;  %1208 = vpow2.f32 %v1779_v12  ;;  %v554_v9 = vsel %vm1822_vm7, %v553_v61, %v549_v8  ;;  %v770_v11 = vadd.f32 %v1201_v41, %v769_v0 }
 0x105   :  { %vm1841_vm10 = vcmp.eq.f32.partialorder %v775_v55, 8.507059e+37  ;;  %v1077_v13 = vmul.f32 -1.442695, %v1788_v19  ;;  %v1846_v7 = vpop.eup %1206  ;;  %v895_v17 = vmul.f32 %v554_v9, %v1699_v32  ;;  %v778_v43 = vor.u32 1.1754944e-38, %v777_v63  ;;  %v226_v9 = vpop.f32.mrf.mxu2 }
 0x106   :  { %v783_v12 = vsub.f32 1.0, %v782_v56  ;;  %1210 = vrcp.f32 %v1834_v31  ;;  %v774_v18 = vsel %vm773_vm11, %v1201_v41, %v770_v11  ;;  %vm786_vm12 = vweird.f32 %v1795_v25 }
 0x107   :  { %vm1854_vm13 = vcmp.eq.f32.partialorder %v790_v1, 8.507059e+37  ;;  %v557_v22 = vmul.f32 %v1846_v7, %v1803_v39  ;;  %v922_v32 = vpack.c.bf16 %v895_v17, %v894_v6  ;;  %vm787_vm14 = vweird.f32 %v1205_v40 }
 0x108   :  { %v784_v5 = vmul.f32 %v1205_v40, %v783_v12  ;;  %v793_v45 = vor.u32 1.1754944e-38, %v792_v3  ;;  %v779_v16 = vsel %vm1841_vm10, %v778_v43, %v774_v18  ;;  %vm561_vm15 = vweird.f32 %v1803_v39  ;;  %vm788_vm0 = vmor %vm786_vm12, %vm787_vm14 }
 0x109   :  { %v558_v23 = vsub.f32 1.0, %v557_v22  ;;  %1212 = vpow2.f32 %v1077_v13  ;;  %938 = vst [vmem:[%s2081_s3 + $0x20] sm:$0xff] %v922_v32  ;;  %v565_v60 = vand.u32 2147483647, %v1803_v39  ;;  %v1868_v62 = vadd.f32 %v204_v50, %v1393_v57 }
 0x10a   :  { %v1209_v26 = vpop.eup %1208  ;;  %v785_v14 = vadd.f32 %v1205_v40, %v784_v5  ;;  %v1871_v21 = vadd.f32 %v253_v10, %v1395_v58  ;;  %vm562_vm1 = vweird.f32 %v1846_v7  ;;  %v567_v41 = vand.u32 2147483648, %v1803_v39 }
 0x10b   :  { %v559_v38 = vmul.f32 %v1846_v7, %v558_v23  ;;  %v1878_v47 = vadd.f32 1.0, %v1209_v26  ;;  %v910_v28 = vmul.f32 %v779_v16, %v1704_v20  ;;  %v580_v49 = vand.u32 2147483647, %v1834_v31  ;;  %vm1893_vm2 = vmor %vm561_vm15, %vm562_vm1 }
 0x10c   :  { %v1211_v48 = vpop.eup %1210  ;;  %v789_v35 = vsel %vm788_vm0, %v1205_v40, %v785_v14  ;;  %v1062_v30 = vmul.f32 -1.442695, %v1868_v62  ;;  %v1063_v29 = vmul.f32 -1.442695, %v1871_v21  ;;  %v1899_v27 = vadd.f32 %v224_v24, %v1393_v57  ;;  %v255_v40 = vpop.f32.mrf.mxu1 }
 0x10d   :  { %v794_v25 = vsel %vm1854_vm13, %v793_v45, %v789_v35  ;;  %v560_v51 = vadd.f32 %v1846_v7, %v559_v38  ;;  %v572_v55 = vmul.f32 %v1211_v48, %v1834_v31  ;;  %1214 = vrcp.f32 %v1878_v47 }
 0x10e   :  { %v911_v37 = vmul.f32 %v794_v25, %v1709_v15  ;;  %v1902_v46 = vadd.f32 %v273_v33, %v1395_v58  ;;  %1216 = vpow2.f32 %v1062_v30  ;;  %v1908_v39 = vadd.f32 %v206_v52, %v1393_v57 }
 0x10f   :  { %v1213_v42 = vpop.eup %1212  ;;  %v564_v15 = vsel %vm1893_vm2, %v1846_v7, %v560_v51  ;;  %v573_v59 = vsub.f32 1.0, %v572_v55  ;;  %v568_v4 = vor.u32 1.1754944e-38, %v567_v41  ;;  %v582_v61 = vand.u32 2147483648, %v1834_v31 }
 0x110   :  { %v930_v44 = vpack.c.bf16 %v911_v37, %v910_v28  ;;  %v1911_v63 = vadd.f32 1.0, %v1213_v42  ;;  %vm566_vm3 = vcmp.eq.f32.partialorder %v565_v60, 8.507059e+37  ;;  %vm577_vm4 = vweird.f32 %v1211_v48 }
 0x111   :  { %v574_v50 = vmul.f32 %v1211_v48, %v573_v59  ;;  %1218 = vpow2.f32 %v1063_v29  ;;  %v569_v0 = vsel %vm566_vm3, %v568_v4, %v564_v15  ;;  %vm576_vm5 = vweird.f32 %v1834_v31 }
 0x112   :  { %946 = vst [vmem:[%s2081_s3 + $0x60] sm:$0xff] %v930_v44  ;;  %vm1917_vm6 = vcmp.eq.f32.partialorder %v580_v49, 8.507059e+37  ;;  %1220 = vrcp.f32 %v1911_v63  ;;  %v1078_v6 = vmul.f32 -1.442695, %v1899_v27  ;;  %v1079_v8 = vmul.f32 -1.442695, %v1902_v46  ;;  %vm578_vm7 = vmor %vm576_vm5, %vm577_vm4  ;;  %v275_v44 = vpop.f32.mrf.mxu3 }
 0x113   :  { %v575_v3 = vadd.f32 %v1211_v48, %v574_v50  ;;  %v1064_v56 = vmul.f32 -1.442695, %v1908_v39  ;;  %v1215_v11 = vpop.eup %1214  ;;  %v583_v2 = vor.u32 1.1754944e-38, %v582_v61  ;;  %v805_v13 = vand.u32 2147483647, %v1878_v47 }
 0x114   :  { %v807_v31 = vand.u32 2147483648, %v1878_v47  ;;  %v1928_v7 = vadd.f32 %v255_v40, %v1395_v58  ;;  %v1217_v17 = vpop.eup %1216  ;;  %v896_v43 = vmul.f32 %v569_v0, %v1732_v34  ;;  %v797_v18 = vmul.f32 %v1215_v11, %v1878_v47 }
 0x115   :  { %v579_v12 = vsel %vm578_vm7, %v1211_v48, %v575_v3  ;;  %1222 = vpow2.f32 %v1078_v6  ;;  %v1934_v22 = vadd.f32 1.0, %v1217_v17  ;;  %v1937_v10 = vadd.f32 %v226_v9, %v1393_v57 }
 0x116   :  { %v584_v53 = vsel %vm1917_vm6, %v583_v2, %v579_v12  ;;  %1224 = vpow2.f32 %v1079_v8  ;;  %v798_v45 = vsub.f32 1.0, %v797_v18  ;;  %v1065_v34 = vmul.f32 -1.442695, %v1928_v7 }
 0x117   :  { %v1219_v32 = vpop.eup %1218  ;;  %v897_v5 = vmul.f32 %v584_v53, %v1738_v36  ;;  %1226 = vpow2.f32 %v1064_v56  ;;  %vm801_vm8 = vweird.f32 %v1878_v47  ;;  %vm1942_vm9 = vcmp.eq.f32.partialorder %v805_v13, 8.507059e+37 }
 0x118   :  { %v1221_v16 = vpop.eup %1220  ;;  %1228 = vrcp.f32 %v1934_v22  ;;  %v799_v26 = vmul.f32 %v1215_v11, %v798_v45  ;;  %vm802_vm10 = vweird.f32 %v1215_v11  ;;  %v808_v14 = vor.u32 1.1754944e-38, %v807_v31 }
 0x119   :  { %v923_v24 = vpack.c.bf16 %v897_v5, %v896_v43  ;;  %v812_v57 = vmul.f32 %v1221_v16, %v1911_v63  ;;  %v820_v36 = vand.u32 2147483647, %v1911_v63  ;;  %v822_v60 = vand.u32 2147483648, %v1911_v63  ;;  %vm803_vm11 = vmor %vm801_vm8, %vm802_vm10 }
 0x11a   :  { %v1950_v38 = vadd.f32 1.0, %v1219_v32  ;;  %v800_v33 = vadd.f32 %v1215_v11, %v799_v26  ;;  %1230 = vpow2.f32 %v1065_v34  ;;  %v1080_v28 = vmul.f32 -1.442695, %v1937_v10 }
 0x11b   :  { %v1223_v41 = vpop.eup %1222  ;;  %939 = vst [vmem:[%s2081_s3 + $0x28] sm:$0xff] %v923_v24  ;;  %v813_v48 = vsub.f32 1.0, %v812_v57  ;;  %vm816_vm12 = vweird.f32 %v1911_v63  ;;  %vm817_vm13 = vweird.f32 %v1221_v16  ;;  %v595_v49 = vand.u32 2147483647, %v1934_v22 }
 0x11c   :  { %v1225_v35 = vpop.eup %1224  ;;  %1232 = vrcp.f32 %v1950_v38  ;;  %v804_v52 = vsel %vm803_vm11, %v1215_v11, %v800_v33  ;;  %v1961_v51 = vadd.f32 1.0, %v1223_v41  ;;  %vm1967_vm14 = vcmp.eq.f32.partialorder %v820_v36, 8.507059e+37  ;;  %vm818_vm0 = vmor %vm816_vm12, %vm817_vm13 }
 0x11d   :  { %v1227_v30 = vpop.eup %1226  ;;  %v814_v25 = vmul.f32 %v1221_v16, %v813_v48  ;;  %v1963_v55 = vadd.f32 1.0, %v1225_v35  ;;  %v809_v37 = vsel %vm1942_vm9, %v808_v14, %v804_v52  ;;  %v823_v20 = vor.u32 1.1754944e-38, %v822_v60 }
 0x11e   :  { %v1229_v29 = vpop.eup %1228  ;;  %v597_v42 = vand.u32 2147483648, %v1934_v22  ;;  %vm591_vm15 = vweird.f32 %v1934_v22  ;;  %1234 = vpow2.f32 %v1080_v28  ;;  %vm1977_vm1 = vcmp.eq.f32.partialorder %v595_v49, 8.507059e+37 }
 0x11f   :  { %v815_v15 = vadd.f32 %v1221_v16, %v814_v25  ;;  %v587_v59 = vmul.f32 %v1229_v29, %v1934_v22  ;;  %v610_v61 = vand.u32 2147483647, %v1950_v38  ;;  %1236 = vrcp.f32 %v1961_v51 }
 0x120   :  { %v1983_v50 = vadd.f32 1.0, %v1227_v30  ;;  %v1231_v40 = vpop.eup %1230  ;;  %v912_v0 = vmul.f32 %v809_v37, %v1753_v54  ;;  %1238 = vrcp.f32 %v1963_v55  ;;  %v598_v8 = vor.u32 1.1754944e-38, %v597_v42 }
 0x121   :  { %v819_v1 = vsel %vm818_vm0, %v1221_v16, %v815_v15  ;;  %v588_v3 = vsub.f32 1.0, %v587_v59  ;;  %v612_v56 = vand.u32 2147483648, %v1950_v38  ;;  %v1991_v9 = vadd.f32 %v275_v44, %v1395_v58 }
 0x122   :  { %v1233_v6 = vpop.eup %1232  ;;  %v824_v63 = vsel %vm1967_vm14, %v823_v20, %v819_v1  ;;  %vm592_vm2 = vweird.f32 %v1229_v29  ;;  %vm606_vm3 = vweird.f32 %v1950_v38  ;;  %vm1996_vm4 = vcmp.eq.f32.partialorder %v610_v61, 8.507059e+37 }
 0x123   :  { %v913_v11 = vmul.f32 %v824_v63, %v1788_v19  ;;  %v589_v2 = vmul.f32 %v1229_v29, %v588_v3  ;;  %v602_v54 = vmul.f32 %v1233_v6, %v1950_v38  ;;  %v835_v31 = vand.u32 2147483647, %v1961_v51  ;;  %vm593_vm5 = vmor %vm591_vm15, %vm592_vm2 }
 0x124   :  { %1240 = vrcp.f32 %v1983_v50  ;;  %v1235_v17 = vpop.eup %1234  ;;  %v837_v19 = vand.u32 2147483648, %v1961_v51  ;;  %v613_v53 = vor.u32 1.1754944e-38, %v612_v56  ;;  %vm831_vm6 = vweird.f32 %v1961_v51 }
 0x125   :  { %v931_v43 = vpack.c.bf16 %v913_v11, %v912_v0  ;;  %v590_v58 = vadd.f32 %v1229_v29, %v589_v2  ;;  %v603_v12 = vsub.f32 1.0, %v602_v54  ;;  %v1237_v18 = vpop.eup %1236  ;;  %vm846_vm7 = vweird.f32 %v1963_v55 }
 0x126   :  { %v2007_v32 = vadd.f32 1.0, %v1231_v40  ;;  %v1239_v5 = vpop.eup %1238  ;;  %vm607_vm8 = vweird.f32 %v1233_v6  ;;  %v827_v16 = vmul.f32 %v1237_v18, %v1961_v51  ;;  %vm2015_vm9 = vcmp.eq.f32.partialorder %v835_v31, 8.507059e+37 }
 0x127   :  { %947 = vst [vmem:[%s2081_s3 + $0x68] sm:$0xff] %v931_v43  ;;  %v594_v45 = vsel %vm593_vm5, %v1229_v29, %v590_v58  ;;  %v604_v34 = vmul.f32 %v1233_v6, %v603_v12  ;;  %v842_v24 = vmul.f32 %v1239_v5, %v1963_v55  ;;  %v850_v26 = vand.u32 2147483647, %v1963_v55  ;;  %vm608_vm10 = vmor %vm606_vm3, %vm607_vm8 }
 0x128   :  { %v599_v22 = vsel %vm1977_vm1, %v598_v8, %v594_v45  ;;  %v828_v14 = vsub.f32 1.0, %v827_v16  ;;  %v838_v36 = vor.u32 1.1754944e-38, %v837_v19  ;;  %v2021_v60 = vadd.f32 1.0, %v1235_v17 }
 0x129   :  { %v605_v57 = vadd.f32 %v1233_v6, %v604_v34  ;;  %vm832_vm11 = vweird.f32 %v1237_v18  ;;  %v843_v33 = vsub.f32 1.0, %v842_v24  ;;  %v852_v48 = vand.u32 2147483648, %v1963_v55 }
 0x12a   :  { %v1241_v41 = vpop.eup %1240  ;;  %1242 = vrcp.f32 %v2007_v32  ;;  %v898_v28 = vmul.f32 %v599_v22, %v1868_v62  ;;  %v829_v49 = vmul.f32 %v1237_v18, %v828_v14  ;;  %vm847_vm12 = vweird.f32 %v1239_v5  ;;  %vm833_vm14 = vmor %vm831_vm6, %vm832_vm11 }
 0x12b   :  { %v609_v35 = vsel %vm608_vm10, %v1233_v6, %v605_v57  ;;  %v617_v30 = vmul.f32 %v1241_v41, %v1983_v50  ;;  %v844_v25 = vmul.f32 %v1239_v5, %v843_v33  ;;  %vm2031_vm13 = vcmp.eq.f32.partialorder %v850_v26, 8.507059e+37  ;;  %vm848_vm0 = vmor %vm846_vm7, %vm847_vm12 }
 0x12c   :  { %v614_v52 = vsel %vm1996_vm4, %v613_v53, %v609_v35  ;;  %v830_v37 = vadd.f32 %v1237_v18, %v829_v49  ;;  %1244 = vrcp.f32 %v2021_v60  ;;  %v853_v20 = vor.u32 1.1754944e-38, %v852_v48 }
 0x12d   :  { %v899_v29 = vmul.f32 %v614_v52, %v1871_v21  ;;  %v618_v47 = vsub.f32 1.0, %v617_v30  ;;  %v845_v62 = vadd.f32 %v1239_v5, %v844_v25  ;;  %vm621_vm15 = vweird.f32 %v1983_v50 }
 0x12e   :  { %v625_v42 = vand.u32 2147483647, %v1983_v50  ;;  %v834_v59 = vsel %vm833_vm14, %v1237_v18, %v830_v37  ;;  %vm622_vm1 = vweird.f32 %v1241_v41  ;;  %v627_v51 = vand.u32 2147483648, %v1983_v50 }
 0x12f   :  { %v924_v15 = vpack.c.bf16 %v899_v29, %v898_v28  ;;  %v619_v21 = vmul.f32 %v1241_v41, %v618_v47  ;;  %v839_v4 = vsel %vm2015_vm9, %v838_v36, %v834_v59  ;;  %v849_v61 = vsel %vm848_vm0, %v1239_v5, %v845_v62  ;;  %vm623_vm2 = vmor %vm621_vm15, %vm622_vm1 }
 0x130   :  { %v1243_v44 = vpop.eup %1242  ;;  %v1081_v40 = vmul.f32 -1.442695, %v1991_v9  ;;  %v914_v0 = vmul.f32 %v839_v4, %v1899_v27  ;;  %v854_v55 = vsel %vm2031_vm13, %v853_v20, %v849_v61  ;;  %v628_v2 = vor.u32 1.1754944e-38, %v627_v51 }
 0x131   :  { %940 = vst [vmem:[%s2081_s3 + $0x30] sm:$0xff] %v924_v15  ;;  %v620_v1 = vadd.f32 %v1241_v41, %v619_v21  ;;  %v632_v3 = vmul.f32 %v1243_v44, %v2007_v32  ;;  %v915_v6 = vmul.f32 %v854_v55, %v1902_v46  ;;  %v642_v54 = vand.u32 2147483648, %v2007_v32 }
 0x132   :  { %1246 = vpow2.f32 %v1081_v40  ;;  %v1245_v63 = vpop.eup %1244  ;;  %vm626_vm3 = vcmp.eq.f32.partialorder %v625_v42, 8.507059e+37  ;;  %vm637_vm4 = vweird.f32 %v1243_v44  ;;  %v640_v31 = vand.u32 2147483647, %v2007_v32 }
 0x133   :  { %v624_v8 = vsel %vm623_vm2, %v1241_v41, %v620_v1  ;;  %v633_v56 = vsub.f32 1.0, %v632_v3  ;;  %v932_v11 = vpack.c.bf16 %v915_v6, %v914_v0  ;;  %v857_v27 = vmul.f32 %v1245_v63, %v2021_v60 }
 0x134   :  { %v629_v46 = vsel %vm626_vm3, %v628_v2, %v624_v8  ;;  %vm636_vm5 = vweird.f32 %v2007_v32  ;;  %v643_v43 = vor.u32 1.1754944e-38, %v642_v54  ;;  %vm641_vm7 = vcmp.eq.f32.partialorder %v640_v31, 8.507059e+37 }
 0x135   :  { %v634_v13 = vmul.f32 %v1243_v44, %v633_v56  ;;  %948 = vst [vmem:[%s2081_s3 + $0x70] sm:$0xff] %v932_v11  ;;  %vm638_vm6 = vmor %vm636_vm5, %vm637_vm4  ;;  %v858_v58 = vsub.f32 1.0, %v857_v27  ;;  %v900_v12 = vmul.f32 %v629_v46, %v1908_v39  ;;  %vm862_vm8 = vweird.f32 %v1245_v63 }
 0x136   :  { %v867_v22 = vand.u32 2147483648, %v2021_v60  ;;  %vm861_vm9 = vweird.f32 %v2021_v60  ;;  %v865_v39 = vand.u32 2147483647, %v2021_v60 }
 0x137   :  { %v635_v50 = vadd.f32 %v1243_v44, %v634_v13  ;;  %v859_v45 = vmul.f32 %v1245_v63, %v858_v58  ;;  %vm863_vm10 = vmor %vm861_vm9, %vm862_vm8 }
 0x138   :  { %v1247_v17 = vpop.eup %1246  ;;  %v868_v26 = vor.u32 1.1754944e-38, %v867_v22  ;;  %vm866_vm11 = vcmp.eq.f32.partialorder %v865_v39, 8.507059e+37 }
 0x139   :  { %v639_v19 = vsel %vm638_vm6, %v1243_v44, %v635_v50  ;;  %v405_v18 = vadd.f32 1.0, %v1247_v17  ;;  %v860_v32 = vadd.f32 %v1245_v63, %v859_v45 }
 0x13a   :  { %v644_v53 = vsel %vm641_vm7, %v643_v43, %v639_v19 }
 0x13b   :  { %v901_v5 = vmul.f32 %v644_v53, %v1928_v7  ;;  %1248 = vrcp.f32 %v405_v18  ;;  %v864_v24 = vsel %vm863_vm10, %v1245_v63, %v860_v32  ;;  %v882_v57 = vand.u32 2147483648, %v405_v18 }
 0x13c   :  { %v880_v36 = vand.u32 2147483647, %v405_v18  ;;  %v869_v41 = vsel %vm866_vm11, %v868_v26, %v864_v24  ;;  %vm876_vm13 = vweird.f32 %v405_v18 }
 0x13d   :  { %v925_v34 = vpack.c.bf16 %v901_v5, %v900_v12  ;;  %v883_v48 = vor.u32 1.1754944e-38, %v882_v57  ;;  %v916_v28 = vmul.f32 %v869_v41, %v1937_v10 }
 0x13e   :  { %vm881_vm15 = vcmp.eq.f32.partialorder %v880_v36, 8.507059e+37 }
 0x13f   :  { %941 = vst [vmem:[%s2081_s3 + $0x38] sm:$0xff] %v925_v34 }
 0x141   :  { %v1249_v16 = vpop.eup %1248 }
 0x142   :  { %v872_v23 = vmul.f32 %v1249_v16, %v405_v18  ;;  %vm877_vm12 = vweird.f32 %v1249_v16 }
 0x143   :  { %vm878_vm14 = vmor %vm876_vm13, %vm877_vm12 }
 0x144   :  { %v873_v7 = vsub.f32 1.0, %v872_v23 }
 0x146   :  { %v874_v14 = vmul.f32 %v1249_v16, %v873_v7 }
 0x148   :  { %v875_v33 = vadd.f32 %v1249_v16, %v874_v14 }
 0x14a   :  { %v879_v35 = vsel %vm878_vm14, %v1249_v16, %v875_v33 }
 0x14b   :  { %v884_v60 = vsel %vm881_vm15, %v883_v48, %v879_v35 }
 0x14c   :  { %v917_v49 = vmul.f32 %v884_v60, %v1991_v9 }
 0x14e   :  { %v933_v30 = vpack.c.bf16 %v917_v49, %v916_v28 }
 0x150   :  { %949 = vst [vmem:[%s2081_s3 + $0x78] sm:$0xff] %v933_v30 }

// kernel: efficientnet_b3_forward.14
= control target key start
LH: loop header
LB: loop body
LE: loop exit
PB: predicated region body
PF: predicated region fallthrough
CT: control target
= control target key end

     0   :  { %vm81_vm0 = vcmask 1041409   ;;  %vm401_vm12 = vcmask 1040384   ;;  %s794_s1 = inlined_call_operand.vmem [shape: bf16[256,128], index: 1, kind: input, shape index: {}]   ;;  %s795_s0 = inlined_call_operand.vmem [shape: f32[2,1,256], index: 0, kind: input, shape index: {}]   ;;  %s796_s2 = inlined_call_operand.vmem [shape: f32[1,128], index: 2, kind: input, shape index: {}]   ;;  %s797_s3 = inlined_call_operand.vmem [shape: bf16[128,256], index: 3, kind: input, shape index: {}]   ;;  %s798_s4 = inlined_call_operand.vmem [shape: f32[1,256], index: 4, kind: input, shape index: {}]   ;;  %s799_s5 = inlined_call_operand.vmem [shape: f32[2,1,256], index: 5, kind: output, shape index: {}]  }
   0x1   :  { %v555_v0 = vld [vmem:[%s794_s1 + $0x38] sm:$0xff]  ;;  %v554_v2 = vld [vmem:[%s794_s1 + $0x30] sm:$0xff]  ;;  %v553_v4 = vld [vmem:[%s794_s1 + $0x28] sm:$0xff] }
   0x2   :  { %v563_v1 = vld [vmem:[%s794_s1 + $0x78] sm:$0xff]  ;;  %185 = vmatpush.bf16.msra.mxu0 %v555_v0  ;;  %v562_v3 = vld [vmem:[%s794_s1 + $0x70] sm:$0xff]  ;;  %v561_v5 = vld [vmem:[%s794_s1 + $0x68] sm:$0xff] }
   0x3   :  { %198 = vmatpush.bf16.msra.mxu1 %v563_v1  ;;  %v21_v6 = vld [vmem:[%s795_s0 + $0x2] sm:$0x3]  ;;  %v20_v11 = vld [vmem:[%s795_s0] sm:$0x3]  ;;  %v551_v12 = vld [vmem:[%s794_s1 + $0x18] sm:$0xff] }
   0x4   :  { %v552_v7 = vld [vmem:[%s794_s1 + $0x20] sm:$0xff]  ;;  %v26_v9 = vperm.slane %v21_v6, 0  ;;  %v27_v10 = vperm.slane %v21_v6, 1  ;;  %v559_v13 = vld [vmem:[%s794_s1 + $0x58] sm:$0xff]  ;;  %v24_v14 = vperm.slane %v20_v11, 0  ;;  %v25_v16 = vperm.slane %v20_v11, 1 }
   0x5   :  { %v560_v8 = vld [vmem:[%s794_s1 + $0x60] sm:$0xff]  ;;  %v550_v18 = vld [vmem:[%s794_s1 + $0x10] sm:$0xff]  ;;  %v549_v24 = vld [vmem:[%s794_s1 + $0x8] sm:$0xff] }
   0x6   :  { %186 = vmatpush.bf16.msra.mxu0 %v554_v2  ;;  %v34_v15 = vpack.c.bf16 %v26_v9, %v26_v9  ;;  %v35_v17 = vpack.c.bf16 %v27_v10, %v27_v10  ;;  %v558_v19 = vld [vmem:[%s794_s1 + $0x50] sm:$0xff]  ;;  %v32_v20 = vpack.c.bf16 %v24_v14, %v24_v14  ;;  %v33_v22 = vpack.c.bf16 %v25_v16, %v25_v16  ;;  %v557_v25 = vld [vmem:[%s794_s1 + $0x48] sm:$0xff]  ;;  %v548_v30 = vld [vmem:[%s794_s1] sm:$0xff] }
   0x7   :  { %199 = vmatpush.bf16.msra.mxu1 %v562_v3  ;;  %v556_v31 = vld [vmem:[%s794_s1 + $0x40] sm:$0xff]  ;;  %v540_v36 = vld [vmem:[%s797_s3 + $0x70] sm:$0xf]  ;;  %v579_v37 = vld [vmem:[%s797_s3 + $0x74] sm:$0xf0] }
   0x8   :  { %v78_v21 = vunpack.c.l.b16 %v34_v15  ;;  %v79_v23 = vunpack.c.l.b16 %v35_v17  ;;  %v76_v26 = vunpack.c.l.b16 %v32_v20  ;;  %v77_v28 = vunpack.c.l.b16 %v33_v22  ;;  %v578_v38 = vld [vmem:[%s797_s3 + $0x74] sm:$0xf]  ;;  %v542_v40 = vld [vmem:[%s797_s3 + $0x78] sm:$0xf0]  ;;  %v532_v42 = vld [vmem:[%s797_s3 + $0x60] sm:$0xf] }
   0x9   :  { %v541_v39 = vor.u32 %v579_v37, %v540_v36  ;;  %v545_v41 = vor.u32 %v578_v38, %v542_v40  ;;  %v577_v43 = vld [vmem:[%s797_s3 + $0x64] sm:$0xf0]  ;;  %v576_v44 = vld [vmem:[%s797_s3 + $0x64] sm:$0xf]  ;;  %v534_v46 = vld [vmem:[%s797_s3 + $0x68] sm:$0xf0] }
   0xa   :  { %187 = vmatpush.bf16.msra.mxu0 %v553_v4  ;;  %v80_v27 = vrot.slane %v78_v21, 7  ;;  %v83_v29 = vrot.slane %v79_v23, 7  ;;  %v533_v45 = vor.u32 %v577_v43, %v532_v42  ;;  %v537_v47 = vor.u32 %v576_v44, %v534_v46  ;;  %v524_v48 = vld [vmem:[%s797_s3 + $0x50] sm:$0xf]  ;;  %v575_v49 = vld [vmem:[%s797_s3 + $0x54] sm:$0xf0] }
   0xb   :  { %200 = vmatpush.bf16.msra.mxu1 %v561_v5  ;;  %334 = vmatpush.bf16.msra.mxu2 %v541_v39  ;;  %v574_v50 = vld [vmem:[%s797_s3 + $0x54] sm:$0xf]  ;;  %v525_v51 = vor.u32 %v575_v49, %v524_v48  ;;  %v526_v52 = vld [vmem:[%s797_s3 + $0x58] sm:$0xf0]  ;;  %v516_v54 = vld [vmem:[%s797_s3 + $0x40] sm:$0xf] }
   0xc   :  { %v82_v32 = vsel %vm81_vm0, %v80_v27, %v76_v26  ;;  %v84_v33 = vsel %vm81_vm0, %v83_v29, %v77_v28  ;;  %347 = vmatpush.bf16.msra.mxu3 %v545_v41  ;;  %v529_v53 = vor.u32 %v574_v50, %v526_v52  ;;  %v573_v55 = vld [vmem:[%s797_s3 + $0x44] sm:$0xf0]  ;;  %v572_v56 = vld [vmem:[%s797_s3 + $0x44] sm:$0xf]  ;;  %v518_v58 = vld [vmem:[%s797_s3 + $0x48] sm:$0xf0] }
   0xd   :  { %v85_v34 = vpack.c.b16 %v82_v32, %v82_v32  ;;  %v86_v35 = vpack.c.b16 %v84_v33, %v84_v33  ;;  %v517_v57 = vor.u32 %v573_v55, %v516_v54  ;;  %v508_v59 = vld [vmem:[%s797_s3 + $0x30] sm:$0xf]  ;;  %v571_v60 = vld [vmem:[%s797_s3 + $0x34] sm:$0xf0]  ;;  %v521_v61 = vor.u32 %v572_v56, %v518_v58  ;;  %v570_v62 = vld [vmem:[%s797_s3 + $0x34] sm:$0xf] }
   0xe   :  { %188 = vmatpush.bf16.msra.mxu0 %v552_v7  ;;  %v510_v63 = vld [vmem:[%s797_s3 + $0x38] sm:$0xf0]  ;;  %v509_v0 = vor.u32 %v571_v60, %v508_v59  ;;  %v500_v2 = vld [vmem:[%s797_s3 + $0x20] sm:$0xf]  ;;  %v569_v3 = vld [vmem:[%s797_s3 + $0x24] sm:$0xf0] }
   0xf   :  { %201 = vmatpush.bf16.msra.mxu1 %v560_v8  ;;  %335 = vmatpush.bf16.msra.mxu2 %v533_v45  ;;  %v513_v1 = vor.u32 %v570_v62, %v510_v63  ;;  %v568_v4 = vld [vmem:[%s797_s3 + $0x24] sm:$0xf]  ;;  %v502_v5 = vld [vmem:[%s797_s3 + $0x28] sm:$0xf0]  ;;  %v501_v6 = vor.u32 %v569_v3, %v500_v2  ;;  %v492_v8 = vld [vmem:[%s797_s3 + $0x10] sm:$0xf] }
  0x10   :  { %348 = vmatpush.bf16.msra.mxu3 %v537_v47  ;;  %v505_v7 = vor.u32 %v568_v4, %v502_v5  ;;  %v567_v9 = vld [vmem:[%s797_s3 + $0x14] sm:$0xf0]  ;;  %v566_v10 = vld [vmem:[%s797_s3 + $0x14] sm:$0xf]  ;;  %v494_v11 = vld [vmem:[%s797_s3 + $0x18] sm:$0xf0] }
  0x11   :  { %v484_v14 = vld [vmem:[%s797_s3] sm:$0xf]  ;;  %v565_v15 = vld [vmem:[%s797_s3 + $0x4] sm:$0xf0]  ;;  %v564_v16 = vld [vmem:[%s797_s3 + $0x4] sm:$0xf] }
  0x12   :  { %189 = vmatpush.bf16.msra.mxu0 %v551_v12  ;;  %v493_v12 = vor.u32 %v567_v9, %v492_v8  ;;  %v486_v17 = vld [vmem:[%s797_s3 + $0x8] sm:$0xf0]  ;;  %v248_v42 = vld [vmem:[%s798_s4] sm:$0x3]  ;;  %v407_v8 = vlaneseq }
  0x13   :  { %202 = vmatpush.bf16.msra.mxu1 %v559_v13  ;;  %336 = vmatpush.bf16.msra.mxu2 %v525_v51  ;;  %v497_v13 = vor.u32 %v566_v10, %v494_v11  ;;  %v489_v20 = vor.u32 %v564_v16, %v486_v17  ;;  %v250_v43 = vperm.slane %v248_v42, 0  ;;  %v251_v44 = vperm.slane %v248_v42, 1 }
  0x14   :  { %349 = vmatpush.bf16.msra.mxu3 %v529_v53  ;;  %vm409_vm14 = vcmp.lt.s32.totalorder %v407_v8, 256 }
  0x16   :  { %190 = vmatpush.bf16.msra.mxu0 %v550_v18  ;;  %v580_v18 = vld [vmem:[%s796_s2] ss:$0 sm:$0xff] }
  0x17   :  { %203 = vmatpush.bf16.msra.mxu1 %v558_v19  ;;  %337 = vmatpush.bf16.msra.mxu2 %v517_v57  ;;  %v485_v19 = vor.u32 %v565_v15, %v484_v14 }
  0x18   :  { %350 = vmatpush.bf16.msra.mxu3 %v521_v61 }
  0x1a   :  { %191 = vmatpush.bf16.msra.mxu0 %v549_v24 }
  0x1b   :  { %204 = vmatpush.bf16.msra.mxu1 %v557_v25  ;;  %338 = vmatpush.bf16.msra.mxu2 %v509_v0 }
  0x1c   :  { %351 = vmatpush.bf16.msra.mxu3 %v513_v1 }
  0x1e   :  { %192 = vmatpush.bf16.msra.mxu0 %v548_v30 }
  0x1f   :  { %205 = vmatpush.bf16.msra.mxu1 %v556_v31  ;;  %339 = vmatpush.bf16.msra.mxu2 %v501_v6 }
  0x20   :  { %352 = vmatpush.bf16.msra.mxu3 %v505_v7 }
  0x21   :  { %193 = vmatmul.bf16.vlgmr.msra.gmra.mxu0 %v85_v34 }
  0x22   :  { %206 = vmatmul.bf16.vlgmr.msra.gmra.mxu1 %v86_v35 }
  0x23   :  { %340 = vmatpush.bf16.msra.mxu2 %v493_v12 }
  0x24   :  { %353 = vmatpush.bf16.msra.mxu3 %v497_v13 }
  0x27   :  { %341 = vmatpush.bf16.msra.mxu2 %v485_v19 }
  0x28   :  { %354 = vmatpush.bf16.msra.mxu3 %v489_v20 }
  0x9e   :  { %v194_v21 = vpop.f32.mrf.mxu0 }
  0x9f   :  { %v207_v22 = vpop.f32.mrf.mxu1  ;;  %v195_v23 = vadd.f32 %v580_v18, %v194_v21 }
  0xa1   :  { %v208_v24 = vadd.f32 %v207_v22, %v195_v23 }
  0xa3   :  { %v481_v25 = vmul.f32 -1.442695, %v208_v24 }
  0xa5   :  { %581 = vpow2.f32 %v481_v25 }
  0xa6   :  { %v196_v26 = vpop.f32.mrf.mxu0 }
  0xa7   :  { %v209_v27 = vpop.f32.mrf.mxu1 }
  0xab   :  { %v582_v28 = vpop.eup %581 }
  0xac   :  { %v214_v29 = vadd.f32 1.0, %v582_v28 }
  0xae   :  { %583 = vrcp.f32 %v214_v29  ;;  %v226_v33 = vand.u32 2147483648, %v214_v29  ;;  %v224_v35 = vand.u32 2147483647, %v214_v29  ;;  %vm220_vm2 = vweird.f32 %v214_v29 }
  0xb0   :  { %v227_v37 = vor.u32 1.1754944e-38, %v226_v33  ;;  %vm225_vm4 = vcmp.eq.f32.partialorder %v224_v35, 8.507059e+37 }
  0xb4   :  { %v584_v30 = vpop.eup %583 }
  0xb5   :  { %v216_v31 = vmul.f32 %v584_v30, %v214_v29  ;;  %vm221_vm1 = vweird.f32 %v584_v30 }
  0xb6   :  { %vm222_vm3 = vmor %vm220_vm2, %vm221_vm1 }
  0xb7   :  { %v217_v32 = vsub.f32 1.0, %v216_v31 }
  0xb9   :  { %v218_v34 = vmul.f32 %v584_v30, %v217_v32 }
  0xbb   :  { %v219_v36 = vadd.f32 %v584_v30, %v218_v34 }
  0xbd   :  { %v223_v38 = vsel %vm222_vm3, %v584_v30, %v219_v36 }
  0xbe   :  { %v228_v39 = vsel %vm225_vm4, %v227_v37, %v223_v38 }
  0xbf   :  { %v230_v40 = vmul.f32 %v228_v39, %v208_v24 }
  0xc1   :  { %v231_v41 = vpack.c.bf16 %v230_v40, %v230_v40 }
  0xc3   :  { %342 = vmatmul.bf16.vlgmr.msra.gmra.mxu2 %v231_v41  ;;  %355 = vmatmul.bf16.vlgmr.msra.gmra.mxu3 %v231_v41 }
 0x146   :  { %v343_v45 = vpop.f32.mrf.mxu2  ;;  %v356_v46 = vpop.f32.mrf.mxu3 }
 0x147   :  { %v344_v47 = vadd.f32 %v343_v45, %v250_v43  ;;  %v357_v48 = vadd.f32 %v356_v46, %v251_v44 }
 0x149   :  { %v546_v49 = vmul.f32 -1.442695, %v344_v47  ;;  %v547_v50 = vmul.f32 -1.442695, %v357_v48 }
 0x14b   :  { %585 = vpow2.f32 %v546_v49 }
 0x14c   :  { %587 = vpow2.f32 %v547_v50 }
 0x14e   :  { %v345_v51 = vpop.f32.mrf.mxu2  ;;  %v358_v52 = vpop.f32.mrf.mxu3 }
 0x151   :  { %v586_v53 = vpop.eup %585 }
 0x152   :  { %v588_v54 = vpop.eup %587  ;;  %v366_v55 = vadd.f32 1.0, %v586_v53 }
 0x153   :  { %v367_v56 = vadd.f32 1.0, %v588_v54 }
 0x154   :  { %589 = vrcp.f32 %v366_v55  ;;  %vm373_vm7 = vweird.f32 %v366_v55  ;;  %v379_v4 = vand.u32 2147483648, %v366_v55  ;;  %v377_v6 = vand.u32 2147483647, %v366_v55 }
 0x155   :  { %591 = vrcp.f32 %v367_v56  ;;  %v394_v0 = vand.u32 2147483648, %v367_v56  ;;  %v392_v2 = vand.u32 2147483647, %v367_v56  ;;  %vm388_vm9 = vweird.f32 %v367_v56 }
 0x156   :  { %v380_v12 = vor.u32 1.1754944e-38, %v379_v4  ;;  %vm378_vm13 = vcmp.eq.f32.partialorder %v377_v6, 8.507059e+37 }
 0x157   :  { %v395_v9 = vor.u32 1.1754944e-38, %v394_v0  ;;  %vm393_vm11 = vcmp.eq.f32.partialorder %v392_v2, 8.507059e+37 }
 0x15a   :  { %v590_v57 = vpop.eup %589 }
 0x15b   :  { %v592_v58 = vpop.eup %591  ;;  %v369_v59 = vmul.f32 %v590_v57, %v366_v55  ;;  %vm374_vm5 = vweird.f32 %v590_v57 }
 0x15c   :  { %v384_v60 = vmul.f32 %v592_v58, %v367_v56  ;;  %vm389_vm6 = vweird.f32 %v592_v58  ;;  %vm781_vm8 = vmor %vm373_vm7, %vm374_vm5 }
 0x15d   :  { %v370_v61 = vsub.f32 1.0, %v369_v59  ;;  %vm390_vm10 = vmor %vm388_vm9, %vm389_vm6 }
 0x15e   :  { %v385_v62 = vsub.f32 1.0, %v384_v60 }
 0x15f   :  { %v371_v63 = vmul.f32 %v590_v57, %v370_v61 }
 0x160   :  { %v386_v1 = vmul.f32 %v592_v58, %v385_v62 }
 0x161   :  { %v372_v3 = vadd.f32 %v590_v57, %v371_v63 }
 0x162   :  { %v387_v7 = vadd.f32 %v592_v58, %v386_v1 }
 0x163   :  { %v376_v10 = vsel %vm781_vm8, %v590_v57, %v372_v3 }
 0x164   :  { %v391_v11 = vsel %vm390_vm10, %v592_v58, %v387_v7  ;;  %v381_v15 = vsel %vm378_vm13, %v380_v12, %v376_v10 }
 0x165   :  { %v396_v13 = vsel %vm393_vm11, %v395_v9, %v391_v11 }
 0x166   :  { %v400_v14 = vrot.slane %v396_v13, 7 }
 0x168   :  { %v402_v16 = vsel %vm401_vm12, %v381_v15, %v400_v14  ;;  %v403_v17 = vsel %vm81_vm0, %v381_v15, %v400_v14 }
 0x169   :  { %v404_v18 = vrot.slane %v403_v17, 1  ;;  %411 = vst.msk [vmem:[%s799_s5] sm:$0x3] %vm409_vm14, %v402_v16 }
 0x16b   :  { %412 = vst.msk [vmem:[%s799_s5 + $0x2] sm:$0x3] %vm409_vm14, %v404_v18 }

// kernel: efficientnet_b3_forward.13
= control target key start
LH: loop header
LB: loop body
LE: loop exit
PB: predicated region body
PF: predicated region fallthrough
CT: control target
= control target key end

     0   :  { %s1885_s15 = smov 0   ;;  %s3433_s0 = inlined_call_operand.vmem [shape: bf16[2,10,10,256], index: 0, kind: input, shape index: {}]   ;;  %s3434_s1 = inlined_call_operand.vmem [shape: f32[9,256], index: 1, kind: input, shape index: {}]   ;;  %s3435_s2 = inlined_call_operand.vmem [shape: f32[1,256], index: 2, kind: input, shape index: {}]   ;;  %s3436_s3 = inlined_call_operand.vmem [shape: bf16[2,8,8,256], index: 3, kind: output, shape index: {0}]   ;;  %s3437_s4 = inlined_call_operand.vmem [shape: f32[2,1,256], index: 4, kind: output, shape index: {1}]  }
   0x1 LB: > { %s1743_s16 = sadd.s32 4294967295, %s1857_s15   ;;  %p1747_p0 = scmp.ge.s32.totalorder %s1857_s15, 1  ;;  %s1857_s15 = sphi %s1885_s15, %s15_s15  }
   0x2   : > { %p165_p1 = scmp.lt.s32.totalorder %s1857_s15, 3 }
   0x4   : > { %p166_p2 = pnand %p1747_p0, %p165_p1 }
   0x6   : > { %169 = sbr.rel (%p166_p2) target bundleno = 301 (0x12d), region = 32 }
   0xb   : > { %p195_p3 = scmp.lt.s32.totalorder %s1743_s16, 1  ;;  %v1904_v0 = vld [vmem:[%s3434_s1] sm:$0xff]  ;;  %v1909_v1 = vld [vmem:[%s3434_s1 + $0x8] sm:$0xff]  ;;  %vm365_vm0 = vcmask 1046528   ;;  %vm512_vm1 = vcmask 1045504  }
   0xc   : > { %3554 = vst [vmem:[#allocation2_spill] sm:$0xff] %v1904_v0  ;;  %v249_v6 = vperm.slane %v1904_v0, 0  ;;  %v250_v7 = vperm.slane %v1909_v1, 0  ;;  %v1920_v8 = vperm.slane %v1904_v0, 1  ;;  %v1927_v12 = vperm.slane %v1909_v1, 1 }
   0xd   : > { %s3869_s16 = smov (!%p195_p3, %s1743_s16), 1  ;;  %3555 = vst [vmem:[#allocation3_spill] sm:$0xff] %v1909_v1  ;;  %v1930_v13 = vperm.slane %v1904_v0, 2  ;;  %v1933_v14 = vperm.slane %v1909_v1, 2 }
   0xe   : > { %s1771_s17 = smul.u32 160, %s3869_s16  ;;  %s1770_s9 = sshll.u32 %s3869_s16, 6 }
   0xf   : > { %3558 = vst [vmem:[#allocation6_spill] sm:$0xff] %v1930_v13  ;;  %s3388_s12 = scalar_lea.vmem %s3436_s3, %s1770_s9  ;;  %s1751_s13 = sshll.u32 %s3869_s16, 1 }
  0x10   : > { %s1899_s20 = scalar_lea.vmem %s3433_s0, %s1771_s17  ;;  %3559 = vst [vmem:[#allocation7_spill] sm:$0xff] %v1933_v14  ;;  %s208_s18 = scalar_lea.vmem %s3437_s4, %s1751_s13 }
  0x11   : > { %v209_v2 = vld [vmem:[%s1899_s20] sm:$0xff]  ;;  %v211_v3 = vld [vmem:[%s1899_s20 + $0x10] sm:$0xff]  ;;  %v1914_v4 = vld [vmem:[%s1899_s20 + $0x8] sm:$0x11] }
  0x12   : > { %3556 = vst [vmem:[#allocation4_spill] sm:$0xff] %v1914_v4  ;;  %v213_v5 = vld [vmem:[%s1899_s20 + $0x20] sm:$0xff]  ;;  %v215_v9 = vld [vmem:[%s1899_s20 + $0x30] sm:$0xff]  ;;  %v1924_v11 = vunpack.c.l.bf16 %v209_v2  ;;  %v1936_v16 = vunpack.c.h.bf16 %v209_v2  ;;  %v1938_v17 = vunpack.c.l.bf16 %v211_v3  ;;  %v1940_v18 = vunpack.c.h.bf16 %v211_v3  ;;  %v212_v38 = vld [vmem:[%s1899_s20 + $0x18] sm:$0x11] }
  0x13   : > { %v217_v10 = vld [vmem:[%s1899_s20 + $0x40] sm:$0xff]  ;;  %v219_v15 = vld [vmem:[%s1899_s20 + $0x50] sm:$0xff]  ;;  %v1942_v19 = vunpack.c.l.bf16 %v213_v5  ;;  %v1946_v22 = vunpack.c.h.bf16 %v213_v5  ;;  %v1948_v23 = vunpack.c.l.bf16 %v215_v9  ;;  %v3438_v24 = vunpack.c.l.bf16 %v1914_v4  ;;  %v214_v43 = vld [vmem:[%s1899_s20 + $0x28] sm:$0x11] }
  0x14   : > { %3557 = vst [vmem:[#allocation5_spill] sm:$0xff] %v1924_v11  ;;  %v221_v20 = vld [vmem:[%s1899_s20 + $0x60] sm:$0xff]  ;;  %v223_v21 = vld [vmem:[%s1899_s20 + $0x70] sm:$0xff]  ;;  %v3439_v25 = vunpack.c.h.bf16 %v1914_v4  ;;  %v1952_v26 = vunpack.c.h.bf16 %v215_v9  ;;  %v1954_v27 = vunpack.c.l.bf16 %v217_v10  ;;  %v1956_v28 = vunpack.c.h.bf16 %v217_v10  ;;  %v216_v44 = vld [vmem:[%s1899_s20 + $0x38] sm:$0x11] }
  0x15   : > { %3560 = vst [vmem:[#allocation8_spill] sm:$0xff] %v1936_v16  ;;  %v1958_v29 = vunpack.c.l.bf16 %v219_v15  ;;  %v1960_v30 = vunpack.c.h.bf16 %v219_v15  ;;  %v1962_v31 = vunpack.c.l.bf16 %v221_v20  ;;  %v1965_v32 = vmul.f32 %v249_v6, %v1924_v11  ;;  %v218_v49 = vld [vmem:[%s1899_s20 + $0x48] sm:$0x11]  ;;  %v220_v50 = vld [vmem:[%s1899_s20 + $0x58] sm:$0x11] }
  0x16   : > { %3561 = vst [vmem:[#allocation9_spill] sm:$0xff] %v1938_v17  ;;  %v1968_v33 = vmul.f32 %v250_v7, %v1936_v16  ;;  %v1970_v34 = vunpack.c.h.bf16 %v221_v20  ;;  %v1972_v35 = vunpack.c.l.bf16 %v223_v21  ;;  %v1974_v36 = vunpack.c.h.bf16 %v223_v21  ;;  %v222_v55 = vld [vmem:[%s1899_s20 + $0x68] sm:$0x11]  ;;  %v224_v56 = vld [vmem:[%s1899_s20 + $0x78] sm:$0x11] }
  0x17   : > { %3562 = vst [vmem:[#allocation10_spill] sm:$0xff] %v1940_v18  ;;  %v1977_v37 = vmul.f32 %v249_v6, %v1938_v17  ;;  %v1981_v39 = vmul.f32 %v250_v7, %v1940_v18  ;;  %v1984_v40 = vmul.f32 %v249_v6, %v1942_v19  ;;  %v1987_v41 = vmul.f32 %v250_v7, %v1946_v22 }
  0x18   : > { %3563 = vst [vmem:[#allocation11_spill] sm:$0xff] %v1942_v19  ;;  %v1990_v42 = vmul.f32 %v249_v6, %v1948_v23  ;;  %v1995_v45 = vmul.f32 %v250_v7, %v1952_v26  ;;  %v1998_v46 = vmul.f32 %v249_v6, %v1954_v27  ;;  %v2001_v47 = vmul.f32 %v250_v7, %v1956_v28 }
  0x19   : > { %3564 = vst [vmem:[#allocation12_spill] sm:$0xff] %v1946_v22  ;;  %v2004_v48 = vmul.f32 %v249_v6, %v1958_v29  ;;  %v2009_v51 = vmul.f32 %v250_v7, %v1960_v30  ;;  %v2012_v52 = vmul.f32 %v249_v6, %v1962_v31  ;;  %v2015_v53 = vmul.f32 %v250_v7, %v1970_v34 }
  0x1a   : > { %3565 = vst [vmem:[#allocation13_spill] sm:$0xff] %v1948_v23  ;;  %v2018_v54 = vmul.f32 %v249_v6, %v1972_v35  ;;  %v2023_v57 = vmul.f32 %v250_v7, %v1974_v36  ;;  %v2025_v58 = vunpack.c.l.bf16 %v212_v38  ;;  %v2027_v59 = vunpack.c.h.bf16 %v212_v38 }
  0x1b   : > { %3566 = vst [vmem:[#allocation14_spill] sm:$0xff] %v1952_v26  ;;  %v2029_v60 = vunpack.c.l.bf16 %v214_v43  ;;  %v2031_v61 = vunpack.c.h.bf16 %v214_v43  ;;  %v2033_v62 = vunpack.c.l.bf16 %v216_v44  ;;  %v2035_v63 = vunpack.c.h.bf16 %v216_v44 }
  0x1c   : > { %3567 = vst [vmem:[#allocation15_spill] sm:$0xff] %v1954_v27  ;;  %v2037_v2 = vunpack.c.l.bf16 %v218_v49  ;;  %v2039_v3 = vunpack.c.h.bf16 %v218_v49  ;;  %v2041_v5 = vunpack.c.l.bf16 %v220_v50  ;;  %v2043_v6 = vunpack.c.h.bf16 %v220_v50 }
  0x1d   : > { %3568 = vst [vmem:[#allocation16_spill] sm:$0xff] %v1956_v28  ;;  %v2045_v7 = vunpack.c.l.bf16 %v222_v55  ;;  %v2047_v9 = vunpack.c.h.bf16 %v222_v55  ;;  %v2049_v10 = vunpack.c.l.bf16 %v224_v56  ;;  %v2051_v15 = vunpack.c.h.bf16 %v224_v56 }
  0x1e   : > { %3569 = vst [vmem:[#allocation17_spill] sm:$0xff] %v1958_v29  ;;  %v301_v20 = vmul.f32 %v1920_v8, %v1924_v11  ;;  %v302_v21 = vmul.f32 %v1927_v12, %v1936_v16  ;;  %v303_v38 = vmul.f32 %v1920_v8, %v3438_v24  ;;  %v304_v43 = vmul.f32 %v1927_v12, %v3439_v25 }
  0x1f   : > { %3570 = vst [vmem:[#allocation18_spill] sm:$0xff] %v1960_v30  ;;  %v305_v44 = vmul.f32 %v1920_v8, %v1938_v17  ;;  %v306_v49 = vmul.f32 %v1927_v12, %v1940_v18  ;;  %v307_v50 = vmul.f32 %v1920_v8, %v2025_v58  ;;  %v308_v55 = vmul.f32 %v1927_v12, %v2027_v59 }
  0x20   : > { %3571 = vst [vmem:[#allocation19_spill] sm:$0xff] %v1962_v31  ;;  %v309_v56 = vmul.f32 %v1920_v8, %v1942_v19  ;;  %v310_v24 = vmul.f32 %v1927_v12, %v1946_v22  ;;  %v311_v25 = vmul.f32 %v1920_v8, %v2029_v60  ;;  %v312_v1 = vmul.f32 %v1927_v12, %v2031_v61 }
  0x21   : > { %3572 = vst [vmem:[#allocation20_spill] sm:$0xff] %v1970_v34  ;;  %v313_v0 = vmul.f32 %v1920_v8, %v1948_v23  ;;  %v316_v19 = vmul.f32 %v1927_v12, %v2035_v63  ;;  %v317_v22 = vmul.f32 %v1920_v8, %v1954_v27  ;;  %v320_v23 = vmul.f32 %v1927_v12, %v2039_v3 }
  0x22   : > { %3573 = vst [vmem:[#allocation21_spill] sm:$0xff] %v1972_v35  ;;  %v366_v18 = vrot.slane %v301_v20, 1  ;;  %v367_v27 = vrot.slane %v303_v38, 1  ;;  %v369_v17 = vrot.slane %v302_v21, 1  ;;  %v370_v4 = vrot.slane %v304_v43, 1 }
  0x23   : > { %3574 = vst [vmem:[#allocation22_spill] sm:$0xff] %v1974_v36  ;;  %v373_v14 = vrot.slane %v307_v50, 1  ;;  %v328_v20 = vmul.f32 %v1927_v12, %v2047_v9  ;;  %v329_v21 = vmul.f32 %v1920_v8, %v1972_v35  ;;  %v330_v38 = vmul.f32 %v1927_v12, %v1974_v36 }
  0x24   : > { %3575 = vst [vmem:[#allocation23_spill] sm:$0xff] %v2018_v54  ;;  %v331_v43 = vmul.f32 %v1920_v8, %v2049_v10  ;;  %v368_v50 = vsel %vm365_vm0, %v366_v18, %v367_v27  ;;  %v381_v35 = vrot.slane %v310_v24, 1  ;;  %v382_v16 = vrot.slane %v312_v1, 1 }
  0x25   : > { %3576 = vst [vmem:[#allocation24_spill] sm:$0xff] %v2023_v57  ;;  %v384_v13 = vrot.slane %v313_v0, 1  ;;  %v388_v57 = vrot.slane %v316_v19, 1  ;;  %v411_v24 = vrot.slane %v330_v38, 1 }
  0x26   : > { %3577 = vst [vmem:[#allocation25_spill] sm:$0xff] %v2025_v58  ;;  %v314_v58 = vmul.f32 %v1927_v12, %v1952_v26  ;;  %v321_v26 = vmul.f32 %v1920_v8, %v1958_v29  ;;  %v326_v29 = vmul.f32 %v1927_v12, %v1970_v34  ;;  %v375_v34 = vrot.slane %v306_v49, 1 }
  0x27   : > { %3578 = vst [vmem:[#allocation26_spill] sm:$0xff] %v2027_v59  ;;  %v315_v59 = vmul.f32 %v1920_v8, %v2033_v62 }
  0x28   : > { %3579 = vst [vmem:[#allocation27_spill] sm:$0xff] %v2029_v60  ;;  %v318_v60 = vmul.f32 %v1927_v12, %v1956_v28  ;;  %v372_v28 = vrot.slane %v305_v44, 1  ;;  %v332_v44 = vmul.f32 %v1927_v12, %v2051_v15  ;;  %v387_v11 = vrot.slane %v314_v58, 1 }
  0x29   : > { %3580 = vst [vmem:[#allocation28_spill] sm:$0xff] %v2031_v61  ;;  %v319_v61 = vmul.f32 %v1920_v8, %v2037_v2  ;;  %v385_v36 = vrot.slane %v315_v59, 1 }
  0x2a   : > { %3581 = vst [vmem:[#allocation29_spill] sm:$0xff] %v2033_v62  ;;  %v322_v62 = vmul.f32 %v1927_v12, %v1960_v30  ;;  %v327_v30 = vmul.f32 %v1920_v8, %v2045_v7  ;;  %v393_v54 = vrot.slane %v318_v60, 1  ;;  %v412_v19 = vrot.slane %v332_v44, 1 }
  0x2b   : > { %3582 = vst [vmem:[#allocation30_spill] sm:$0xff] %v2035_v63  ;;  %v323_v63 = vmul.f32 %v1920_v8, %v2041_v5 }
  0x2c   : > { %3583 = vst [vmem:[#allocation31_spill] sm:$0xff] %v2037_v2  ;;  %v324_v2 = vmul.f32 %v1927_v12, %v2043_v6  ;;  %v394_v12 = vrot.slane %v320_v23, 1  ;;  %v399_v27 = vrot.slane %v322_v62, 1  ;;  %v386_v23 = vsel %vm365_vm0, %v384_v13, %v385_v36 }
  0x2d   : > { %3584 = vst [vmem:[#allocation32_spill] sm:$0xff] %v2039_v3  ;;  %v325_v3 = vmul.f32 %v1920_v8, %v1962_v31  ;;  %v376_v31 = vrot.slane %v308_v55, 1  ;;  %v390_v8 = vrot.slane %v317_v22, 1  ;;  %v397_v18 = vrot.slane %v323_v63, 1 }
  0x2e   : > { %3585 = vst [vmem:[#allocation33_spill] sm:$0xff] %v2041_v5  ;;  %v379_v5 = vrot.slane %v311_v25, 1  ;;  %v400_v49 = vrot.slane %v324_v2, 1  ;;  %v409_v25 = vrot.slane %v331_v43, 1  ;;  %v383_v22 = vsel %vm365_vm0, %v381_v35, %v382_v16  ;;  %v3596_v2 = vld [vmem:[#allocation6_spill] sm:$0xff] }
  0x2f   : > { %3586 = vst [vmem:[#allocation34_spill] sm:$0xff] %v2043_v6  ;;  %v378_v6 = vrot.slane %v309_v56, 1  ;;  %v402_v55 = vrot.slane %v325_v3, 1  ;;  %v377_v1 = vsel %vm365_vm0, %v375_v34, %v376_v31  ;;  %v2135_v16 = vadd.f32 %v368_v50, %v1965_v32  ;;  %v3603_v56 = vld [vmem:[#allocation10_spill] sm:$0xff]  ;;  %v3606_v50 = vld [vmem:[#allocation11_spill] sm:$0xff] }
  0x30   : > { %3587 = vst [vmem:[#allocation35_spill] sm:$0xff] %v2045_v7  ;;  %v371_v7 = vsel %vm365_vm0, %v369_v17, %v370_v4  ;;  %v403_v4 = vrot.slane %v327_v30, 1  ;;  %v405_v17 = vrot.slane %v326_v29, 1  ;;  %v395_v30 = vsel %vm365_vm0, %v393_v54, %v394_v12  ;;  %v3605_v43 = vld [vmem:[#allocation26_spill] sm:$0xff]  ;;  %v3607_v12 = vld [vmem:[#allocation12_spill] sm:$0xff] }
  0x31   : > { %3588 = vst [vmem:[#allocation36_spill] sm:$0xff] %v2047_v9  ;;  %v374_v9 = vsel %vm365_vm0, %v372_v28, %v373_v14  ;;  %v406_v14 = vrot.slane %v328_v20, 1  ;;  %v408_v28 = vrot.slane %v329_v21, 1  ;;  %v380_v0 = vsel %vm365_vm0, %v378_v6, %v379_v5  ;;  %v3598_v5 = vld [vmem:[#allocation7_spill] sm:$0xff]  ;;  %v3604_v21 = vld [vmem:[#allocation25_spill] sm:$0xff] }
  0x32   : > { %3589 = vst [vmem:[#allocation37_spill] sm:$0xff] %v2049_v10  ;;  %v391_v10 = vrot.slane %v319_v61, 1  ;;  %v401_v59 = vsel %vm365_vm0, %v399_v27, %v400_v49  ;;  %v404_v31 = vsel %vm365_vm0, %v402_v55, %v403_v4  ;;  %v2138_v13 = vadd.f32 %v371_v7, %v1968_v33  ;;  %v3608_v27 = vld [vmem:[#allocation27_spill] sm:$0xff]  ;;  %v3609_v55 = vld [vmem:[#allocation28_spill] sm:$0xff] }
  0x33   : > { %3590 = vst [vmem:[#allocation38_spill] sm:$0xff] %v2051_v15  ;;  %v396_v15 = vrot.slane %v321_v26, 1  ;;  %v389_v26 = vsel %vm365_vm0, %v387_v11, %v388_v57  ;;  %v407_v34 = vsel %vm365_vm0, %v405_v17, %v406_v14  ;;  %v410_v60 = vsel %vm365_vm0, %v408_v28, %v409_v25  ;;  %v3610_v17 = vld [vmem:[#allocation13_spill] sm:$0xff]  ;;  %v3611_v28 = vld [vmem:[#allocation14_spill] sm:$0xff] }
  0x34   : > { %v392_v58 = vsel %vm365_vm0, %v390_v8, %v391_v10  ;;  %v413_v11 = vsel %vm365_vm0, %v411_v24, %v412_v19  ;;  %v2142_v35 = vadd.f32 %v374_v9, %v1977_v37  ;;  %v2145_v36 = vadd.f32 %v377_v1, %v1981_v39  ;;  %v3602_v10 = vld [vmem:[#allocation9_spill] sm:$0xff]  ;;  %v3613_v24 = vld [vmem:[#allocation30_spill] sm:$0xff] }
  0x35   : > { %v398_v29 = vsel %vm365_vm0, %v396_v15, %v397_v18  ;;  %v2148_v54 = vadd.f32 %v380_v0, %v1984_v40  ;;  %v2151_v57 = vadd.f32 %v383_v22, %v1987_v41  ;;  %v2154_v32 = vadd.f32 %v386_v23, %v1990_v42  ;;  %v3612_v1 = vld [vmem:[#allocation29_spill] sm:$0xff]  ;;  %v3614_v22 = vld [vmem:[#allocation15_spill] sm:$0xff] }
  0x36   : > { %v2157_v33 = vadd.f32 %v389_v26, %v1995_v45  ;;  %v2160_v61 = vadd.f32 %v392_v58, %v1998_v46  ;;  %v2163_v37 = vadd.f32 %v395_v30, %v2001_v47  ;;  %v2166_v39 = vadd.f32 %v398_v29, %v2004_v48  ;;  %v3591_v45 = vld [vmem:[#allocation23_spill] sm:$0xff]  ;;  %v3593_v46 = vld [vmem:[#allocation24_spill] sm:$0xff]  ;;  %v3595_v47 = vld [vmem:[#allocation5_spill] sm:$0xff] }
  0x37   : > { %v2169_v40 = vadd.f32 %v401_v59, %v2009_v51  ;;  %v2172_v41 = vadd.f32 %v404_v31, %v2012_v52  ;;  %v2175_v42 = vadd.f32 %v407_v34, %v2015_v53  ;;  %v2178_v62 = vadd.f32 %v410_v60, %v3591_v45  ;;  %v3597_v48 = vld [vmem:[#allocation8_spill] sm:$0xff]  ;;  %v3616_v30 = vld [vmem:[#allocation31_spill] sm:$0xff]  ;;  %v3618_v34 = vld [vmem:[#allocation17_spill] sm:$0xff] }
  0x38   : > { %v2181_v63 = vadd.f32 %v413_v11, %v3593_v46  ;;  %v448_v3 = vmul.f32 %v3596_v2, %v3595_v47  ;;  %v449_v6 = vmul.f32 %v3598_v5, %v3597_v48  ;;  %v3599_v51 = vld [vmem:[#allocation4_spill] sm:$0xff]  ;;  %v2195_v15 = vmul.f32 %v3596_v2, %v3602_v10  ;;  %v3619_v11 = vld [vmem:[#allocation18_spill] sm:$0xff]  ;;  %v3620_v46 = vld [vmem:[#allocation33_spill] sm:$0xff] }
  0x39   : > { %3592 = vst [vmem:[#allocation23_spill] sm:$0xff] %v2178_v62  ;;  %v3600_v7 = vunpack.c.l.bf16 %v3599_v51  ;;  %v3601_v9 = vunpack.c.h.bf16 %v3599_v51  ;;  %v2199_v20 = vmul.f32 %v3598_v5, %v3603_v56  ;;  %v454_v38 = vmul.f32 %v3596_v2, %v3604_v21  ;;  %v3615_v26 = vld [vmem:[#allocation16_spill] sm:$0xff] }
  0x3a   : > { %3594 = vst [vmem:[#allocation24_spill] sm:$0xff] %v2181_v63  ;;  %v455_v44 = vmul.f32 %v3598_v5, %v3605_v43  ;;  %v2207_v8 = vmul.f32 %v3596_v2, %v3606_v50  ;;  %v2211_v18 = vmul.f32 %v3598_v5, %v3607_v12  ;;  %v458_v49 = vmul.f32 %v3596_v2, %v3608_v27  ;;  %v3617_v59 = vld [vmem:[#allocation32_spill] sm:$0xff]  ;;  %v3624_v27 = vld [vmem:[#allocation35_spill] sm:$0xff] }
  0x3b   : > { %v450_v52 = vmul.f32 %v3596_v2, %v3600_v7  ;;  %v451_v53 = vmul.f32 %v3598_v5, %v3601_v9  ;;  %v459_v4 = vmul.f32 %v3598_v5, %v3609_v55  ;;  %v460_v14 = vmul.f32 %v3596_v2, %v3610_v17  ;;  %v3621_v7 = vld [vmem:[#allocation34_spill] sm:$0xff] }
  0x3c   : > { %v461_v25 = vmul.f32 %v3598_v5, %v3611_v28  ;;  %v462_v0 = vmul.f32 %v3596_v2, %v3612_v1  ;;  %v463_v19 = vmul.f32 %v3598_v5, %v3613_v24  ;;  %v464_v23 = vmul.f32 %v3596_v2, %v3614_v22  ;;  %v3622_v24 = vld [vmem:[#allocation19_spill] sm:$0xff] }
  0x3d   : > { %v465_v58 = vmul.f32 %v3598_v5, %v3615_v26  ;;  %v466_v29 = vmul.f32 %v3596_v2, %v3616_v30  ;;  %v467_v31 = vmul.f32 %v3598_v5, %v3617_v59  ;;  %v468_v60 = vmul.f32 %v3596_v2, %v3618_v34  ;;  %v3623_v59 = vld [vmem:[#allocation20_spill] sm:$0xff]  ;;  %v3628_v26 = vld [vmem:[#allocation37_spill] sm:$0xff] }
  0x3e   : > { %v469_v45 = vmul.f32 %v3598_v5, %v3619_v11  ;;  %v470_v47 = vmul.f32 %v3596_v2, %v3620_v46  ;;  %v513_v48 = vrot.slane %v448_v3, 2  ;;  %v514_v51 = vrot.slane %v450_v52, 2  ;;  %v3625_v11 = vld [vmem:[#allocation36_spill] sm:$0xff]  ;;  %v3626_v3 = vld [vmem:[#allocation21_spill] sm:$0xff]  ;;  %v3627_v46 = vld [vmem:[#allocation22_spill] sm:$0xff] }
  0x3f   : > { %v471_v9 = vmul.f32 %v3598_v5, %v3621_v7  ;;  %v472_v30 = vmul.f32 %v3596_v2, %v3622_v24  ;;  %v516_v55 = vrot.slane %v449_v6, 2  ;;  %v517_v43 = vrot.slane %v451_v53, 2  ;;  %v3629_v53 = vld [vmem:[#allocation38_spill] sm:$0xff] }
  0x40   : > { %v473_v1 = vmul.f32 %v3598_v5, %v3623_v59  ;;  %v474_v21 = vmul.f32 %v3596_v2, %v3624_v27  ;;  %v475_v34 = vmul.f32 %v3598_v5, %v3625_v11  ;;  %v476_v52 = vmul.f32 %v3596_v2, %v3626_v3 }
  0x41   : > { %v477_v7 = vmul.f32 %v3598_v5, %v3627_v46  ;;  %v478_v6 = vmul.f32 %v3596_v2, %v3628_v26  ;;  %v479_v24 = vmul.f32 %v3598_v5, %v3629_v53  ;;  %v515_v59 = vsel %vm512_vm1, %v513_v48, %v514_v51 }
  0x42   : > { %v519_v27 = vrot.slane %v2195_v15, 2  ;;  %v520_v22 = vrot.slane %v454_v38, 2  ;;  %v522_v11 = vrot.slane %v2199_v20, 2  ;;  %v518_v28 = vsel %vm512_vm1, %v516_v55, %v517_v43 }
  0x43   : > { %v523_v17 = vrot.slane %v455_v44, 2  ;;  %v525_v3 = vrot.slane %v2207_v8, 2  ;;  %v526_v12 = vrot.slane %v458_v49, 2  ;;  %v528_v46 = vrot.slane %v2211_v18, 2 }
  0x44   : > { %v529_v50 = vrot.slane %v459_v4, 2  ;;  %v531_v2 = vrot.slane %v460_v14, 2  ;;  %v532_v26 = vrot.slane %v462_v0, 2  ;;  %v534_v56 = vrot.slane %v461_v25, 2 }
  0x45   : > { %v535_v5 = vrot.slane %v463_v19, 2  ;;  %v537_v53 = vrot.slane %v464_v23, 2  ;;  %v538_v48 = vrot.slane %v466_v29, 2  ;;  %v540_v51 = vrot.slane %v465_v58, 2 }
  0x46   : > { %v541_v15 = vrot.slane %v467_v31, 2  ;;  %v543_v38 = vrot.slane %v468_v60, 2  ;;  %v544_v10 = vrot.slane %v470_v47, 2  ;;  %v546_v20 = vrot.slane %v469_v45, 2  ;;  %v225_v31 = vld [vmem:[%s1899_s20 + $0x80] sm:$0xff]  ;;  %v3633_v47 = vld [vmem:[#allocation24_spill] sm:$0xff] }
  0x47   : > { %v547_v63 = vrot.slane %v471_v9, 2  ;;  %v549_v43 = vrot.slane %v472_v30, 2  ;;  %v550_v44 = vrot.slane %v474_v21, 2  ;;  %v552_v55 = vrot.slane %v473_v1, 2  ;;  %v3630_v60 = vld [vmem:[#allocation2_spill] sm:$0xff] }
  0x48   : > { %v553_v8 = vrot.slane %v475_v34, 2  ;;  %v555_v49 = vrot.slane %v476_v52, 2  ;;  %v556_v62 = vrot.slane %v478_v6, 2  ;;  %v521_v18 = vsel %vm512_vm1, %v519_v27, %v520_v22 }
  0x49   : > { %v524_v4 = vsel %vm512_vm1, %v522_v11, %v523_v17  ;;  %v558_v14 = vrot.slane %v477_v7, 2  ;;  %v559_v25 = vrot.slane %v479_v24, 2  ;;  %v527_v0 = vsel %vm512_vm1, %v525_v3, %v526_v12 }
  0x4a   : > { %v530_v19 = vsel %vm512_vm1, %v528_v46, %v529_v50  ;;  %v533_v23 = vsel %vm512_vm1, %v531_v2, %v532_v26  ;;  %v536_v58 = vsel %vm512_vm1, %v534_v56, %v535_v5  ;;  %v539_v21 = vsel %vm512_vm1, %v537_v53, %v538_v48  ;;  %v3641_v53 = vld [vmem:[#allocation12_spill] sm:$0xff]  ;;  %v3642_v5 = vld [vmem:[#allocation13_spill] sm:$0xff] }
  0x4b   : > { %v542_v1 = vsel %vm512_vm1, %v540_v51, %v541_v15  ;;  %v545_v27 = vsel %vm512_vm1, %v543_v38, %v544_v10  ;;  %v548_v17 = vsel %vm512_vm1, %v546_v20, %v547_v63  ;;  %v551_v24 = vsel %vm512_vm1, %v549_v43, %v550_v44  ;;  %v3643_v51 = vld [vmem:[#allocation14_spill] sm:$0xff]  ;;  %v3644_v38 = vld [vmem:[#allocation15_spill] sm:$0xff]  ;;  %v3645_v43 = vld [vmem:[#allocation16_spill] sm:$0xff] }
  0x4c   : > { %v554_v12 = vsel %vm512_vm1, %v552_v55, %v553_v8  ;;  %v557_v22 = vsel %vm512_vm1, %v555_v49, %v556_v62  ;;  %v577_v50 = vadd.f32 %v515_v59, %v2135_v16  ;;  %v560_v26 = vsel %vm512_vm1, %v558_v14, %v559_v25  ;;  %v226_v62 = vld [vmem:[%s1899_s20 + $0x88] sm:$0x11]  ;;  %v3646_v55 = vld [vmem:[#allocation17_spill] sm:$0xff]  ;;  %v3647_v49 = vld [vmem:[#allocation18_spill] sm:$0xff] }
  0x4d   : > { %v578_v56 = vadd.f32 %v518_v28, %v2138_v13  ;;  %v579_v30 = vadd.f32 %v521_v18, %v2142_v35  ;;  %v580_v29 = vadd.f32 %v524_v4, %v2145_v36  ;;  %v581_v10 = vadd.f32 %v527_v0, %v2148_v54  ;;  %v3631_v28 = vld [vmem:[#allocation3_spill] sm:$0xff]  ;;  %v3649_v25 = vld [vmem:[#allocation20_spill] sm:$0xff] }
  0x4e   : > { %v582_v63 = vadd.f32 %v530_v19, %v2151_v57  ;;  %v583_v34 = vadd.f32 %v533_v23, %v2154_v32  ;;  %v595_v11 = vperm.slane %v3630_v60, 3  ;;  %v584_v16 = vadd.f32 %v536_v58, %v2157_v33  ;;  %v3632_v32 = vld [vmem:[#allocation23_spill] sm:$0xff]  ;;  %v3650_v19 = vld [vmem:[#allocation21_spill] sm:$0xff]  ;;  %v3651_v58 = vld [vmem:[#allocation22_spill] sm:$0xff] }
  0x4f   : > { %v585_v59 = vadd.f32 %v539_v21, %v2160_v61  ;;  %v586_v13 = vadd.f32 %v542_v1, %v2163_v37  ;;  %v596_v35 = vperm.slane %v3631_v28, 3  ;;  %v587_v36 = vadd.f32 %v545_v27, %v2166_v39  ;;  %v3636_v61 = vld [vmem:[#allocation9_spill] sm:$0xff]  ;;  %v3648_v4 = vld [vmem:[#allocation19_spill] sm:$0xff] }
  0x50   : > { %v588_v45 = vadd.f32 %v548_v17, %v2169_v40  ;;  %v589_v54 = vadd.f32 %v551_v24, %v2172_v41  ;;  %v590_v57 = vadd.f32 %v554_v12, %v2175_v42  ;;  %v591_v46 = vadd.f32 %v557_v22, %v3632_v32  ;;  %v3639_v40 = vld [vmem:[#allocation10_spill] sm:$0xff]  ;;  %v3640_v42 = vld [vmem:[#allocation11_spill] sm:$0xff] }
  0x51   : > { %v592_v7 = vadd.f32 %v560_v26, %v3633_v47  ;;  %v2297_v9 = vunpack.c.l.bf16 %v225_v31  ;;  %v2299_v33 = vunpack.c.h.bf16 %v225_v31  ;;  %v597_v37 = vmul.f32 %v595_v11, %v3636_v61 }
  0x52   : > { %v2302_v3 = vunpack.c.l.bf16 %v226_v62  ;;  %v2304_v52 = vunpack.c.h.bf16 %v226_v62  ;;  %v2307_v39 = vperm.slane %v3630_v60, 4  ;;  %v598_v41 = vmul.f32 %v596_v35, %v3639_v40 }
  0x53   : > { %3634 = vst [vmem:[#allocation5_spill] sm:$0xff] %v2297_v9  ;;  %v599_v6 = vmul.f32 %v595_v11, %v3640_v42  ;;  %v600_v2 = vmul.f32 %v596_v35, %v3641_v53  ;;  %v601_v48 = vmul.f32 %v595_v11, %v3642_v5  ;;  %v602_v15 = vmul.f32 %v596_v35, %v3643_v51 }
  0x54   : > { %3635 = vst [vmem:[#allocation6_spill] sm:$0xff] %v2299_v33  ;;  %v603_v20 = vmul.f32 %v595_v11, %v3644_v38  ;;  %v604_v44 = vmul.f32 %v596_v35, %v3645_v43  ;;  %v605_v8 = vmul.f32 %v595_v11, %v3646_v55  ;;  %v606_v18 = vmul.f32 %v596_v35, %v3647_v49 }
  0x55   : > { %3637 = vst [vmem:[#allocation8_spill] sm:$0xff] %v2302_v3  ;;  %v607_v14 = vmul.f32 %v595_v11, %v3648_v4  ;;  %v608_v0 = vmul.f32 %v596_v35, %v3649_v25  ;;  %v609_v23 = vmul.f32 %v595_v11, %v3650_v19  ;;  %v610_v21 = vmul.f32 %v596_v35, %v3651_v58 }
  0x56   : > { %3638 = vst [vmem:[#allocation7_spill] sm:$0xff] %v2304_v52  ;;  %v611_v1 = vmul.f32 %v595_v11, %v2297_v9  ;;  %v612_v27 = vmul.f32 %v596_v35, %v2299_v33  ;;  %v2324_v17 = vadd.f32 %v597_v37, %v577_v50  ;;  %v2326_v24 = vadd.f32 %v598_v41, %v578_v56  ;;  %v3655_v35 = vld [vmem:[#allocation25_spill] sm:$0xff]  ;;  %v3658_v41 = vld [vmem:[#allocation26_spill] sm:$0xff] }
  0x57   : > { %v2328_v12 = vadd.f32 %v599_v6, %v579_v30  ;;  %v2330_v22 = vadd.f32 %v600_v2, %v580_v29  ;;  %v2332_v26 = vadd.f32 %v601_v48, %v581_v10  ;;  %v2334_v31 = vadd.f32 %v602_v15, %v582_v63  ;;  %v3659_v48 = vld [vmem:[#allocation28_spill] sm:$0xff] }
  0x58   : > { %v2336_v62 = vadd.f32 %v603_v20, %v583_v34  ;;  %v2338_v32 = vadd.f32 %v604_v44, %v584_v16  ;;  %v632_v11 = vperm.slane %v3631_v28, 4  ;;  %v2341_v47 = vadd.f32 %v605_v8, %v585_v59  ;;  %v3660_v44 = vld [vmem:[#allocation30_spill] sm:$0xff] }
  0x59   : > { %v2343_v50 = vadd.f32 %v606_v18, %v586_v13  ;;  %v2345_v56 = vadd.f32 %v607_v14, %v587_v36  ;;  %v2347_v30 = vadd.f32 %v608_v0, %v588_v45  ;;  %v2349_v29 = vadd.f32 %v609_v23, %v589_v54  ;;  %v3656_v36 = vld [vmem:[#allocation27_spill] sm:$0xff]  ;;  %v3662_v23 = vld [vmem:[#allocation32_spill] sm:$0xff] }
  0x5a   : > { %v2351_v10 = vadd.f32 %v610_v21, %v590_v57  ;;  %v2353_v63 = vadd.f32 %v611_v1, %v591_v46  ;;  %v2355_v34 = vadd.f32 %v612_v27, %v592_v7  ;;  %v633_v16 = vmul.f32 %v2307_v39, %v3636_v61  ;;  %v3657_v46 = vld [vmem:[#allocation29_spill] sm:$0xff]  ;;  %v3661_v14 = vld [vmem:[#allocation31_spill] sm:$0xff] }
  0x5b   : > { %v635_v59 = vmul.f32 %v2307_v39, %v3655_v35  ;;  %v2363_v13 = vmul.f32 %v2307_v39, %v3640_v42  ;;  %v2367_v45 = vmul.f32 %v2307_v39, %v3656_v36  ;;  %v634_v54 = vmul.f32 %v632_v11, %v3639_v40 }
  0x5c   : > { %3652 = vst [vmem:[#allocation4_spill] sm:$0xff] %v2351_v10  ;;  %v2372_v57 = vmul.f32 %v2307_v39, %v3642_v5  ;;  %v2376_v7 = vmul.f32 %v2307_v39, %v3657_v46  ;;  %v2380_v37 = vmul.f32 %v2307_v39, %v3644_v38  ;;  %v636_v6 = vmul.f32 %v632_v11, %v3658_v41  ;;  %v3663_v38 = vld [vmem:[#allocation33_spill] sm:$0xff]  ;;  %v3664_v5 = vld [vmem:[#allocation34_spill] sm:$0xff] }
  0x5d   : > { %3653 = vst [vmem:[#allocation2_spill] sm:$0xff] %v2353_v63  ;;  %v638_v2 = vmul.f32 %v632_v11, %v3641_v53  ;;  %v640_v15 = vmul.f32 %v632_v11, %v3659_v48  ;;  %v642_v20 = vmul.f32 %v632_v11, %v3643_v51  ;;  %v644_v8 = vmul.f32 %v632_v11, %v3660_v44  ;;  %v3666_v53 = vld [vmem:[#allocation36_spill] sm:$0xff] }
  0x5e   : > { %3654 = vst [vmem:[#allocation3_spill] sm:$0xff] %v2355_v34  ;;  %v646_v18 = vmul.f32 %v632_v11, %v3645_v43  ;;  %v647_v0 = vmul.f32 %v2307_v39, %v3661_v14  ;;  %v648_v21 = vmul.f32 %v632_v11, %v3662_v23  ;;  %v649_v1 = vmul.f32 %v2307_v39, %v3646_v55  ;;  %v3665_v14 = vld [vmem:[#allocation35_spill] sm:$0xff] }
  0x5f   : > { %v650_v27 = vmul.f32 %v632_v11, %v3647_v49  ;;  %v651_v46 = vmul.f32 %v2307_v39, %v3663_v38  ;;  %v652_v48 = vmul.f32 %v632_v11, %v3664_v5  ;;  %v653_v44 = vmul.f32 %v2307_v39, %v3648_v4  ;;  %v3667_v5 = vld [vmem:[#allocation37_spill] sm:$0xff]  ;;  %v3668_v4 = vld [vmem:[#allocation38_spill] sm:$0xff] }
  0x60   : > { %v654_v43 = vmul.f32 %v632_v11, %v3649_v25  ;;  %v697_v51 = vrot.slane %v633_v16, 1  ;;  %v698_v36 = vrot.slane %v635_v59, 1  ;;  %v655_v23 = vmul.f32 %v2307_v39, %v3665_v14 }
  0x61   : > { %v656_v42 = vmul.f32 %v632_v11, %v3666_v53  ;;  %v700_v55 = vrot.slane %v634_v54, 1  ;;  %v701_v41 = vrot.slane %v636_v6, 1  ;;  %v657_v49 = vmul.f32 %v2307_v39, %v3650_v19 }
  0x62   : > { %v658_v38 = vmul.f32 %v632_v11, %v3651_v58  ;;  %v659_v35 = vmul.f32 %v2307_v39, %v3667_v5  ;;  %v660_v40 = vmul.f32 %v632_v11, %v3668_v4  ;;  %v661_v16 = vmul.f32 %v2307_v39, %v2297_v9 }
  0x63   : > { %v662_v59 = vmul.f32 %v632_v11, %v2299_v33  ;;  %v663_v53 = vmul.f32 %v2307_v39, %v2302_v3  ;;  %v664_v54 = vmul.f32 %v632_v11, %v2304_v52  ;;  %v699_v6 = vsel %vm365_vm0, %v697_v51, %v698_v36 }
  0x64   : > { %v703_v19 = vrot.slane %v2363_v13, 1  ;;  %v704_v58 = vrot.slane %v2367_v45, 1  ;;  %v706_v14 = vrot.slane %v638_v2, 1  ;;  %v702_v5 = vsel %vm365_vm0, %v700_v55, %v701_v41 }
  0x65   : > { %v707_v4 = vrot.slane %v640_v15, 1  ;;  %v709_v25 = vrot.slane %v2372_v57, 1  ;;  %v710_v9 = vrot.slane %v2376_v7, 1  ;;  %v712_v33 = vrot.slane %v642_v20, 1 }
  0x66   : > { %v713_v61 = vrot.slane %v644_v8, 1  ;;  %v715_v39 = vrot.slane %v2380_v37, 1  ;;  %v716_v3 = vrot.slane %v647_v0, 1  ;;  %v718_v11 = vrot.slane %v646_v18, 1 }
  0x67   : > { %v719_v52 = vrot.slane %v648_v21, 1  ;;  %v721_v51 = vrot.slane %v649_v1, 1  ;;  %v722_v36 = vrot.slane %v651_v46, 1  ;;  %v724_v13 = vrot.slane %v650_v27, 1 }
  0x68   : > { %v725_v34 = vrot.slane %v652_v48, 1  ;;  %v727_v45 = vrot.slane %v653_v44, 1  ;;  %v728_v2 = vrot.slane %v655_v23, 1  ;;  %v730_v63 = vrot.slane %v654_v43, 1  ;;  %v2482_v44 = vld [vmem:[%s1899_s20 + $0x98] sm:$0x11] }
  0x69   : > { %v731_v55 = vrot.slane %v656_v42, 1  ;;  %v733_v41 = vrot.slane %v657_v49, 1  ;;  %v734_v15 = vrot.slane %v659_v35, 1  ;;  %v736_v57 = vrot.slane %v658_v38, 1  ;;  %v3669_v35 = vld [vmem:[#allocation4_spill] sm:$0xff]  ;;  %3670 = vst [vmem:[#allocation23_spill] sm:$0xff] %v2482_v44 }
  0x6a   : > { %v737_v10 = vrot.slane %v660_v40, 1  ;;  %v739_v7 = vrot.slane %v661_v16, 1  ;;  %v740_v20 = vrot.slane %v663_v53, 1  ;;  %v705_v8 = vsel %vm365_vm0, %v703_v19, %v704_v58  ;;  %v227_v58 = vld [vmem:[%s1899_s20 + $0x90] sm:$0xff]  ;;  %v3701_v16 = vld [vmem:[#allocation35_spill] sm:$0xff] }
  0x6b   : > { %v708_v37 = vsel %vm365_vm0, %v706_v14, %v707_v4  ;;  %v742_v18 = vrot.slane %v662_v59, 1  ;;  %v743_v0 = vrot.slane %v664_v54, 1  ;;  %v711_v46 = vsel %vm365_vm0, %v709_v25, %v710_v9  ;;  %v3680_v59 = vld [vmem:[#allocation10_spill] sm:$0xff] }
  0x6c   : > { %v714_v48 = vsel %vm365_vm0, %v712_v33, %v713_v61  ;;  %v717_v43 = vsel %vm365_vm0, %v715_v39, %v716_v3  ;;  %v720_v42 = vsel %vm365_vm0, %v718_v11, %v719_v52  ;;  %v723_v38 = vsel %vm365_vm0, %v721_v51, %v722_v36  ;;  %v3682_v11 = vld [vmem:[#allocation26_spill] sm:$0xff]  ;;  %v3683_v36 = vld [vmem:[#allocation11_spill] sm:$0xff] }
  0x6d   : > { %v726_v40 = vsel %vm365_vm0, %v724_v13, %v725_v34  ;;  %v729_v53 = vsel %vm365_vm0, %v727_v45, %v728_v2  ;;  %v732_v49 = vsel %vm365_vm0, %v730_v63, %v731_v55  ;;  %v735_v4 = vsel %vm365_vm0, %v733_v41, %v734_v15  ;;  %v3684_v45 = vld [vmem:[#allocation12_spill] sm:$0xff]  ;;  %v3685_v55 = vld [vmem:[#allocation27_spill] sm:$0xff] }
  0x6e   : > { %v738_v19 = vsel %vm365_vm0, %v736_v57, %v737_v10  ;;  %v741_v9 = vsel %vm365_vm0, %v739_v7, %v740_v20  ;;  %v2436_v33 = vadd.f32 %v699_v6, %v2324_v17  ;;  %v744_v61 = vsel %vm365_vm0, %v742_v18, %v743_v0  ;;  %v3681_v6 = vld [vmem:[#allocation25_spill] sm:$0xff]  ;;  %v3686_v15 = vld [vmem:[#allocation28_spill] sm:$0xff]  ;;  %v3690_v18 = vld [vmem:[#allocation30_spill] sm:$0xff] }
  0x6f   : > { %v2440_v3 = vadd.f32 %v702_v5, %v2326_v24  ;;  %v2443_v52 = vadd.f32 %v705_v8, %v2328_v12  ;;  %v2446_v25 = vadd.f32 %v708_v37, %v2330_v22  ;;  %v2450_v10 = vadd.f32 %v711_v46, %v2332_v26  ;;  %v3687_v57 = vld [vmem:[#allocation13_spill] sm:$0xff]  ;;  %v3691_v46 = vld [vmem:[#allocation15_spill] sm:$0xff] }
  0x70   : > { %v2453_v63 = vadd.f32 %v714_v48, %v2334_v31  ;;  %v2456_v17 = vadd.f32 %v717_v43, %v2336_v62  ;;  %v777_v5 = vperm.slane %v3630_v60, 5  ;;  %v2460_v24 = vadd.f32 %v720_v42, %v2338_v32  ;;  %v3689_v8 = vld [vmem:[#allocation29_spill] sm:$0xff]  ;;  %v3692_v43 = vld [vmem:[#allocation16_spill] sm:$0xff] }
  0x71   : > { %v2463_v12 = vadd.f32 %v723_v38, %v2341_v47  ;;  %v2466_v22 = vadd.f32 %v726_v40, %v2343_v50  ;;  %v778_v26 = vperm.slane %v3631_v28, 5  ;;  %v2470_v34 = vadd.f32 %v729_v53, %v2345_v56  ;;  %v3671_v47 = vld [vmem:[#allocation2_spill] sm:$0xff]  ;;  %v3673_v50 = vld [vmem:[#allocation3_spill] sm:$0xff]  ;;  %v3694_v53 = vld [vmem:[#allocation32_spill] sm:$0xff] }
  0x72   : > { %v2473_v31 = vadd.f32 %v732_v49, %v2347_v30  ;;  %v2476_v62 = vadd.f32 %v735_v4, %v2349_v29  ;;  %v2479_v32 = vadd.f32 %v738_v19, %v3669_v35  ;;  %v2485_v14 = vadd.f32 %v741_v9, %v3671_v47  ;;  %v3677_v30 = vld [vmem:[#allocation9_spill] sm:$0xff]  ;;  %v3693_v38 = vld [vmem:[#allocation31_spill] sm:$0xff]  ;;  %v3696_v9 = vld [vmem:[#allocation18_spill] sm:$0xff] }
  0x73   : > { %v2488_v23 = vadd.f32 %v744_v61, %v3673_v50  ;;  %v2490_v21 = vunpack.c.l.bf16 %v227_v58  ;;  %v2492_v56 = vunpack.c.h.bf16 %v227_v58  ;;  %v779_v1 = vmul.f32 %v777_v5, %v3677_v30  ;;  %v3695_v4 = vld [vmem:[#allocation17_spill] sm:$0xff]  ;;  %v3698_v47 = vld [vmem:[#allocation34_spill] sm:$0xff]  ;;  %v3699_v30 = vld [vmem:[#allocation19_spill] sm:$0xff] }
  0x74   : > { %3672 = vst [vmem:[#allocation24_spill] sm:$0xff] %v2485_v14  ;;  %v2496_v29 = vperm.slane %v3630_v60, 6  ;;  %v2499_v27 = vperm.slane %v3631_v28, 6  ;;  %v780_v54 = vmul.f32 %v778_v26, %v3680_v59  ;;  %v781_v39 = vmul.f32 %v777_v5, %v3681_v6  ;;  %v3688_v28 = vld [vmem:[#allocation14_spill] sm:$0xff]  ;;  %v3697_v58 = vld [vmem:[#allocation33_spill] sm:$0xff]  ;;  %v3700_v6 = vld [vmem:[#allocation20_spill] sm:$0xff] }
  0x75   : > { %3674 = vst [vmem:[#allocation4_spill] sm:$0xff] %v2488_v23  ;;  %v782_v51 = vmul.f32 %v778_v26, %v3682_v11  ;;  %v783_v13 = vmul.f32 %v777_v5, %v3683_v36  ;;  %v784_v2 = vmul.f32 %v778_v26, %v3684_v45  ;;  %v785_v41 = vmul.f32 %v777_v5, %v3685_v55 }
  0x76   : > { %3675 = vst [vmem:[#allocation2_spill] sm:$0xff] %v2490_v21  ;;  %v786_v60 = vmul.f32 %v778_v26, %v3686_v15  ;;  %v787_v7 = vmul.f32 %v777_v5, %v3687_v57  ;;  %v788_v20 = vmul.f32 %v778_v26, %v3688_v28  ;;  %v789_v37 = vmul.f32 %v777_v5, %v3689_v8  ;;  %v3706_v28 = vld [vmem:[#allocation38_spill] sm:$0xff]  ;;  %v3707_v57 = vld [vmem:[#allocation5_spill] sm:$0xff] }
  0x77   : > { %3676 = vst [vmem:[#allocation3_spill] sm:$0xff] %v2492_v56  ;;  %v790_v0 = vmul.f32 %v778_v26, %v3690_v18  ;;  %v791_v48 = vmul.f32 %v777_v5, %v3691_v46  ;;  %v792_v42 = vmul.f32 %v778_v26, %v3692_v43  ;;  %v793_v40 = vmul.f32 %v777_v5, %v3693_v38  ;;  %v3702_v56 = vld [vmem:[#allocation36_spill] sm:$0xff]  ;;  %v3704_v43 = vld [vmem:[#allocation22_spill] sm:$0xff]  ;;  %v3705_v46 = vld [vmem:[#allocation37_spill] sm:$0xff] }
  0x78   : > { %3678 = vst [vmem:[#allocation9_spill] sm:$0xff] %v2496_v29  ;;  %v794_v49 = vmul.f32 %v778_v26, %v3694_v53  ;;  %v795_v19 = vmul.f32 %v777_v5, %v3695_v4  ;;  %v796_v61 = vmul.f32 %v778_v26, %v3696_v9  ;;  %v797_v35 = vmul.f32 %v777_v5, %v3697_v58  ;;  %v3703_v4 = vld [vmem:[#allocation21_spill] sm:$0xff] }
  0x79   : > { %3679 = vst [vmem:[#allocation39_spill] sm:$0xff] %v2499_v27  ;;  %v798_v50 = vmul.f32 %v778_v26, %v3698_v47  ;;  %v799_v59 = vmul.f32 %v777_v5, %v3699_v30  ;;  %v800_v11 = vmul.f32 %v778_v26, %v3700_v6  ;;  %v801_v18 = vmul.f32 %v777_v5, %v3701_v16  ;;  %v3708_v27 = vld [vmem:[#allocation6_spill] sm:$0xff] }
  0x7a   : > { %v843_v8 = vrot.slane %v779_v1, 2  ;;  %v844_v15 = vrot.slane %v781_v39, 2  ;;  %v846_v55 = vrot.slane %v780_v54, 2  ;;  %v847_v38 = vrot.slane %v782_v51, 2  ;;  %v3709_v1 = vld [vmem:[#allocation8_spill] sm:$0xff]  ;;  %v3710_v54 = vld [vmem:[#allocation7_spill] sm:$0xff] }
  0x7b   : > { %v849_v44 = vrot.slane %v783_v13, 2  ;;  %v850_v53 = vrot.slane %v785_v41, 2  ;;  %v802_v21 = vmul.f32 %v778_v26, %v3702_v56  ;;  %v803_v9 = vmul.f32 %v777_v5, %v3703_v4 }
  0x7c   : > { %v804_v58 = vmul.f32 %v778_v26, %v3704_v43  ;;  %v805_v47 = vmul.f32 %v777_v5, %v3705_v46  ;;  %v806_v30 = vmul.f32 %v778_v26, %v3706_v28  ;;  %v807_v6 = vmul.f32 %v777_v5, %v3707_v57 }
  0x7d   : > { %v808_v16 = vmul.f32 %v778_v26, %v3708_v27  ;;  %v809_v39 = vmul.f32 %v777_v5, %v3709_v1  ;;  %v810_v51 = vmul.f32 %v778_v26, %v3710_v54  ;;  %v845_v13 = vsel %vm512_vm1, %v843_v8, %v844_v15 }
  0x7e   : > { %v852_v41 = vrot.slane %v784_v2, 2  ;;  %v853_v56 = vrot.slane %v786_v60, 2  ;;  %v848_v4 = vsel %vm512_vm1, %v846_v55, %v847_v38  ;;  %v851_v43 = vsel %vm512_vm1, %v849_v44, %v850_v53 }
  0x7f   : > { %v855_v45 = vrot.slane %v787_v7, 2  ;;  %v856_v46 = vrot.slane %v789_v37, 2  ;;  %v858_v29 = vrot.slane %v788_v20, 2  ;;  %v859_v28 = vrot.slane %v790_v0, 2 }
  0x80   : > { %v861_v36 = vrot.slane %v791_v48, 2  ;;  %v862_v57 = vrot.slane %v793_v40, 2  ;;  %v864_v23 = vrot.slane %v792_v42, 2  ;;  %v865_v27 = vrot.slane %v794_v49, 2 }
  0x81   : > { %v867_v14 = vrot.slane %v795_v19, 2  ;;  %v868_v5 = vrot.slane %v797_v35, 2  ;;  %v870_v1 = vrot.slane %v796_v61, 2  ;;  %v871_v26 = vrot.slane %v798_v50, 2  ;;  %v3712_v35 = vld [vmem:[#allocation4_spill] sm:$0xff] }
  0x82   : > { %v873_v54 = vrot.slane %v799_v59, 2  ;;  %v874_v15 = vrot.slane %v801_v18, 2  ;;  %v876_v2 = vrot.slane %v800_v11, 2  ;;  %v877_v60 = vrot.slane %v802_v21, 2  ;;  %v3717_v59 = vld [vmem:[#allocation13_spill] sm:$0xff] }
  0x83   : > { %v879_v8 = vrot.slane %v803_v9, 2  ;;  %v880_v55 = vrot.slane %v805_v47, 2  ;;  %v882_v38 = vrot.slane %v804_v58, 2  ;;  %v883_v44 = vrot.slane %v806_v30, 2  ;;  %v3713_v47 = vld [vmem:[#allocation11_spill] sm:$0xff] }
  0x84   : > { %v885_v7 = vrot.slane %v807_v6, 2  ;;  %v886_v37 = vrot.slane %v809_v39, 2  ;;  %v854_v20 = vsel %vm512_vm1, %v852_v41, %v853_v56  ;;  %v857_v0 = vsel %vm512_vm1, %v855_v45, %v856_v46  ;;  %v3716_v30 = vld [vmem:[#allocation39_spill] sm:$0xff] }
  0x85   : > { %v888_v48 = vrot.slane %v808_v16, 2  ;;  %v889_v42 = vrot.slane %v810_v51, 2  ;;  %v860_v40 = vsel %vm512_vm1, %v858_v29, %v859_v28  ;;  %v863_v53 = vsel %vm512_vm1, %v861_v36, %v862_v57  ;;  %v3719_v6 = vld [vmem:[#allocation15_spill] sm:$0xff] }
  0x86   : > { %v866_v18 = vsel %vm512_vm1, %v864_v23, %v865_v27  ;;  %v869_v21 = vsel %vm512_vm1, %v867_v14, %v868_v5  ;;  %v872_v49 = vsel %vm512_vm1, %v870_v1, %v871_v26  ;;  %v875_v19 = vsel %vm512_vm1, %v873_v54, %v874_v15  ;;  %v3721_v1 = vld [vmem:[#allocation17_spill] sm:$0xff]  ;;  %v3722_v54 = vld [vmem:[#allocation18_spill] sm:$0xff]  ;;  %v3724_v5 = vld [vmem:[#allocation20_spill] sm:$0xff] }
  0x87   : > { %v878_v9 = vsel %vm512_vm1, %v876_v2, %v877_v60  ;;  %v881_v56 = vsel %vm512_vm1, %v879_v8, %v880_v55  ;;  %v884_v45 = vsel %vm512_vm1, %v882_v38, %v883_v44  ;;  %v887_v16 = vsel %vm512_vm1, %v885_v7, %v886_v37  ;;  %v3725_v15 = vld [vmem:[#allocation21_spill] sm:$0xff]  ;;  %v3726_v60 = vld [vmem:[#allocation22_spill] sm:$0xff] }
  0x88   : > { %v907_v29 = vadd.f32 %v845_v13, %v2436_v33  ;;  %v908_v36 = vadd.f32 %v848_v4, %v2440_v3  ;;  %v890_v23 = vsel %vm512_vm1, %v888_v48, %v889_v42  ;;  %v909_v14 = vadd.f32 %v851_v43, %v2443_v52  ;;  %v3711_v43 = vld [vmem:[#allocation24_spill] sm:$0xff]  ;;  %v3723_v13 = vld [vmem:[#allocation19_spill] sm:$0xff]  ;;  %v3727_v55 = vld [vmem:[#allocation5_spill] sm:$0xff] }
  0x89   : > { %v910_v27 = vadd.f32 %v854_v20, %v2446_v25  ;;  %v911_v57 = vadd.f32 %v857_v0, %v2450_v10  ;;  %v912_v28 = vadd.f32 %v860_v40, %v2453_v63  ;;  %v913_v46 = vadd.f32 %v863_v53, %v2456_v17  ;;  %v3714_v17 = vld [vmem:[#allocation9_spill] sm:$0xff]  ;;  %v3728_v44 = vld [vmem:[#allocation6_spill] sm:$0xff]  ;;  %v3730_v0 = vld [vmem:[#allocation3_spill] sm:$0xff] }
  0x8a   : > { %v914_v61 = vadd.f32 %v866_v18, %v2460_v24  ;;  %v915_v58 = vadd.f32 %v869_v21, %v2463_v12  ;;  %v916_v33 = vadd.f32 %v872_v49, %v2466_v22  ;;  %v917_v3 = vadd.f32 %v875_v19, %v2470_v34  ;;  %v3715_v24 = vld [vmem:[#allocation12_spill] sm:$0xff]  ;;  %v3718_v34 = vld [vmem:[#allocation14_spill] sm:$0xff]  ;;  %v2615_v19 = vld [vmem:[%s3434_s1 + $0x18] ss:$0 sm:$0xff] }
  0x8b   : > { %v918_v4 = vadd.f32 %v878_v9, %v2473_v31  ;;  %v919_v52 = vadd.f32 %v881_v56, %v2476_v62  ;;  %v920_v25 = vadd.f32 %v884_v45, %v2479_v32  ;;  %v921_v10 = vadd.f32 %v887_v16, %v3711_v43  ;;  %v3720_v32 = vld [vmem:[#allocation16_spill] sm:$0xff]  ;;  %v3729_v37 = vld [vmem:[#allocation2_spill] sm:$0xff]  ;;  %3732 = vst [vmem:[#allocation25_spill] sm:$0xff] %v2615_v19 }
  0x8c   : > { %v922_v63 = vadd.f32 %v890_v23, %v3712_v35  ;;  %v927_v50 = vmul.f32 %v3714_v17, %v3713_v47  ;;  %v928_v12 = vmul.f32 %v3716_v30, %v3715_v24  ;;  %v929_v22 = vmul.f32 %v3714_v17, %v3717_v59  ;;  %v2610_v49 = vld [vmem:[%s3434_s1 + $0x10] ss:$0 sm:$0xff]  ;;  %v1849_v16 = vld [vmem:[%s3434_s1] sm:$0xff] }
  0x8d   : > { %v930_v31 = vmul.f32 %v3716_v30, %v3718_v34  ;;  %v931_v62 = vmul.f32 %v3714_v17, %v3719_v6  ;;  %v932_v11 = vmul.f32 %v3716_v30, %v3720_v32  ;;  %v933_v39 = vmul.f32 %v3714_v17, %v3721_v1  ;;  %3731 = vst [vmem:[#allocation10_spill] sm:$0xff] %v2610_v49 }
  0x8e   : > { %v934_v51 = vmul.f32 %v3716_v30, %v3722_v54  ;;  %v935_v41 = vmul.f32 %v3714_v17, %v3723_v13  ;;  %v936_v26 = vmul.f32 %v3716_v30, %v3724_v5  ;;  %v937_v2 = vmul.f32 %v3714_v17, %v3725_v15 }
  0x8f   : > { %v938_v8 = vmul.f32 %v3716_v30, %v3726_v60  ;;  %v939_v38 = vmul.f32 %v3714_v17, %v3727_v55  ;;  %v940_v7 = vmul.f32 %v3716_v30, %v3728_v44  ;;  %v941_v20 = vmul.f32 %v3714_v17, %v3729_v37 }
  0x90   : > { %v942_v48 = vmul.f32 %v3716_v30, %v3730_v0  ;;  %v2597_v42 = vadd.f32 %v927_v50, %v907_v29  ;;  %v2599_v40 = vadd.f32 %v928_v12, %v908_v36  ;;  %v2601_v53 = vadd.f32 %v929_v22, %v909_v14 }
  0x91   : > { %v2603_v18 = vadd.f32 %v930_v31, %v910_v27  ;;  %v2605_v21 = vadd.f32 %v931_v62, %v911_v57  ;;  %v2617_v9 = vadd.f32 %v932_v11, %v912_v28  ;;  %v2619_v56 = vadd.f32 %v933_v39, %v913_v46  ;;  %v1850_v27 = vld [vmem:[%s3434_s1 + $0x8] sm:$0xff]  ;;  %v3743_v62 = vld [vmem:[#allocation29_spill] sm:$0xff]  ;;  %v3744_v39 = vld [vmem:[#allocation30_spill] sm:$0xff] }
  0x92   : > { %v2621_v45 = vadd.f32 %v934_v51, %v914_v61  ;;  %v961_v29 = vperm.slane %v1849_v16, 7  ;;  %v2626_v36 = vadd.f32 %v935_v41, %v915_v58  ;;  %v2628_v23 = vadd.f32 %v936_v26, %v916_v33  ;;  %v3735_v58 = vld [vmem:[#allocation23_spill] sm:$0xff]  ;;  %v3748_v16 = vld [vmem:[#allocation34_spill] sm:$0xff] }
  0x93   : > { %v2630_v14 = vadd.f32 %v937_v2, %v917_v3  ;;  %v962_v57 = vperm.slane %v1850_v27, 7  ;;  %v2635_v28 = vadd.f32 %v938_v8, %v918_v4  ;;  %v2637_v46 = vadd.f32 %v939_v38, %v919_v52  ;;  %v3738_v52 = vld [vmem:[#allocation27_spill] sm:$0xff]  ;;  %v3746_v38 = vld [vmem:[#allocation32_spill] sm:$0xff] }
  0x94   : > { %v2639_v61 = vadd.f32 %v940_v7, %v920_v25  ;;  %v2641_v43 = vadd.f32 %v941_v20, %v921_v10  ;;  %v2643_v35 = vadd.f32 %v942_v48, %v922_v63  ;;  %v2648_v3 = vmul.f32 %v2610_v49, %v3713_v47  ;;  %v3740_v10 = vld [vmem:[#allocation28_spill] sm:$0xff]  ;;  %v3745_v2 = vld [vmem:[#allocation31_spill] sm:$0xff]  ;;  %v3747_v48 = vld [vmem:[#allocation33_spill] sm:$0xff] }
  0x95   : > { %v2652_v17 = vmul.f32 %v2615_v19, %v3715_v24  ;;  %v963_v4 = vmul.f32 %v961_v29, %v3713_v47  ;;  %v2657_v25 = vmul.f32 %v2610_v49, %v3738_v52  ;;  %v2661_v63 = vmul.f32 %v2615_v19, %v3740_v10  ;;  %v3749_v33 = vld [vmem:[#allocation35_spill] sm:$0xff] }
  0x96   : > { %3733 = vst [vmem:[#allocation26_spill] sm:$0xff] %v2641_v43  ;;  %v2665_v50 = vmul.f32 %v2610_v49, %v3717_v59  ;;  %v964_v30 = vmul.f32 %v962_v57, %v3715_v24  ;;  %v965_v12 = vmul.f32 %v961_v29, %v3738_v52  ;;  %v966_v22 = vmul.f32 %v962_v57, %v3740_v10  ;;  %v3753_v49 = vld [vmem:[#allocation8_spill] sm:$0xff] }
  0x97   : > { %3734 = vst [vmem:[#allocation24_spill] sm:$0xff] %v2643_v35  ;;  %v967_v47 = vmul.f32 %v961_v29, %v3717_v59  ;;  %v968_v31 = vmul.f32 %v962_v57, %v3718_v34  ;;  %v969_v11 = vmul.f32 %v961_v29, %v3743_v62  ;;  %v970_v51 = vmul.f32 %v962_v57, %v3744_v39  ;;  %v3752_v39 = vld [vmem:[#allocation38_spill] sm:$0xff]  ;;  %v3754_v62 = vld [vmem:[#allocation7_spill] sm:$0xff] }
  0x98   : > { %3736 = vst [vmem:[#allocation4_spill] sm:$0xff] %v2648_v3  ;;  %v971_v41 = vmul.f32 %v961_v29, %v3719_v6  ;;  %v972_v26 = vmul.f32 %v962_v57, %v3720_v32  ;;  %v973_v8 = vmul.f32 %v961_v29, %v3745_v2  ;;  %v974_v24 = vmul.f32 %v962_v57, %v3746_v38  ;;  %v3751_v38 = vld [vmem:[#allocation37_spill] sm:$0xff] }
  0x99   : > { %3737 = vst [vmem:[#allocation11_spill] sm:$0xff] %v2652_v17  ;;  %v975_v7 = vmul.f32 %v961_v29, %v3721_v1  ;;  %v976_v20 = vmul.f32 %v962_v57, %v3722_v54  ;;  %v977_v59 = vmul.f32 %v961_v29, %v3747_v48  ;;  %v978_v27 = vmul.f32 %v962_v57, %v3748_v16 }
  0x9a   : > { %3739 = vst [vmem:[#allocation9_spill] sm:$0xff] %v2657_v25  ;;  %v979_v52 = vmul.f32 %v961_v29, %v3723_v13  ;;  %v980_v10 = vmul.f32 %v962_v57, %v3724_v5  ;;  %v983_v25 = vmul.f32 %v961_v29, %v3725_v15  ;;  %v984_v3 = vmul.f32 %v962_v57, %v3726_v60 }
  0x9b   : > { %3741 = vst [vmem:[#allocation12_spill] sm:$0xff] %v2661_v63  ;;  %v3750_v63 = vld [vmem:[#allocation36_spill] sm:$0xff]  ;;  %v985_v1 = vmul.f32 %v961_v29, %v3751_v38  ;;  %v1027_v2 = vrot.slane %v963_v4, 1  ;;  %v1028_v54 = vrot.slane %v965_v12, 1  ;;  %v1030_v32 = vrot.slane %v964_v30, 1 }
  0x9c   : > { %3742 = vst [vmem:[#allocation39_spill] sm:$0xff] %v2665_v50  ;;  %v981_v50 = vmul.f32 %v961_v29, %v3749_v33  ;;  %v982_v17 = vmul.f32 %v962_v57, %v3750_v63  ;;  %v1031_v48 = vrot.slane %v966_v22, 1  ;;  %v1033_v6 = vrot.slane %v967_v47, 1 }
  0x9d   : > { %v1034_v16 = vrot.slane %v969_v11, 1  ;;  %v986_v13 = vmul.f32 %v962_v57, %v3752_v39  ;;  %v987_v5 = vmul.f32 %v961_v29, %v3727_v55  ;;  %v988_v33 = vmul.f32 %v962_v57, %v3728_v44 }
  0x9e   : > { %v989_v63 = vmul.f32 %v961_v29, %v3753_v49  ;;  %v990_v15 = vmul.f32 %v962_v57, %v3754_v62  ;;  %v991_v60 = vmul.f32 %v961_v29, %v3729_v37  ;;  %v992_v38 = vmul.f32 %v962_v57, %v3730_v0 }
  0x9f   : > { %v3755_v4 = vunpack.c.l.bf16 %v3735_v58  ;;  %v3756_v12 = vunpack.c.h.bf16 %v3735_v58  ;;  %v1029_v47 = vsel %vm365_vm0, %v1027_v2, %v1028_v54  ;;  %v1036_v11 = vrot.slane %v968_v31, 1 }
  0xa0   : > { %v1037_v55 = vrot.slane %v970_v51, 1  ;;  %v1032_v44 = vsel %vm365_vm0, %v1030_v32, %v1031_v48  ;;  %v1035_v49 = vsel %vm365_vm0, %v1033_v6, %v1034_v16  ;;  %v1039_v39 = vrot.slane %v971_v41, 1 }
  0xa1   : > { %v993_v30 = vmul.f32 %v961_v29, %v3755_v4  ;;  %v994_v22 = vmul.f32 %v962_v57, %v3756_v12  ;;  %v1040_v62 = vrot.slane %v973_v8, 1  ;;  %v1042_v19 = vrot.slane %v972_v26, 1 }
  0xa2   : > { %v1043_v37 = vrot.slane %v974_v24, 1  ;;  %v1045_v34 = vrot.slane %v975_v7, 1  ;;  %v1046_v0 = vrot.slane %v977_v59, 1  ;;  %v1048_v35 = vrot.slane %v976_v20, 1 }
  0xa3   : > { %v1049_v43 = vrot.slane %v978_v27, 1  ;;  %v1051_v29 = vrot.slane %v979_v52, 1  ;;  %v1052_v4 = vrot.slane %v981_v50, 1  ;;  %v1054_v58 = vrot.slane %v980_v10, 1  ;;  %v3769_v52 = vld [vmem:[#allocation31_spill] sm:$0xff] }
  0xa4   : > { %v1055_v57 = vrot.slane %v982_v17, 1  ;;  %v1057_v12 = vrot.slane %v983_v25, 1  ;;  %v1058_v54 = vrot.slane %v985_v1, 1  ;;  %v1060_v31 = vrot.slane %v984_v3, 1 }
  0xa5   : > { %v1061_v51 = vrot.slane %v986_v13, 1  ;;  %v1063_v2 = vrot.slane %v987_v5, 1  ;;  %v1064_v32 = vrot.slane %v989_v63, 1  ;;  %v1066_v48 = vrot.slane %v988_v33, 1  ;;  %v3763_v63 = vld [vmem:[#allocation25_spill] sm:$0xff] }
  0xa6   : > { %v1067_v6 = vrot.slane %v990_v15, 1  ;;  %v1069_v41 = vrot.slane %v991_v60, 1  ;;  %v1070_v8 = vrot.slane %v993_v30, 1  ;;  %v1038_v26 = vsel %vm365_vm0, %v1036_v11, %v1037_v55  ;;  %v3770_v30 = vld [vmem:[#allocation32_spill] sm:$0xff] }
  0xa7   : > { %v1041_v24 = vsel %vm365_vm0, %v1039_v39, %v1040_v62  ;;  %v1072_v7 = vrot.slane %v992_v38, 1  ;;  %v1073_v20 = vrot.slane %v994_v22, 1  ;;  %v1044_v50 = vsel %vm365_vm0, %v1042_v19, %v1043_v37  ;;  %v3765_v39 = vld [vmem:[#allocation10_spill] sm:$0xff] }
  0xa8   : > { %v1047_v17 = vsel %vm365_vm0, %v1045_v34, %v1046_v0  ;;  %v1050_v1 = vsel %vm365_vm0, %v1048_v35, %v1049_v43  ;;  %v1053_v13 = vsel %vm365_vm0, %v1051_v29, %v1052_v4  ;;  %v1056_v5 = vsel %vm365_vm0, %v1054_v58, %v1055_v57  ;;  %v3772_v29 = vld [vmem:[#allocation18_spill] sm:$0xff]  ;;  %v3773_v57 = vld [vmem:[#allocation33_spill] sm:$0xff] }
  0xa9   : > { %v1059_v15 = vsel %vm365_vm0, %v1057_v12, %v1058_v54  ;;  %v1062_v60 = vsel %vm365_vm0, %v1060_v31, %v1061_v51  ;;  %v1065_v55 = vsel %vm365_vm0, %v1063_v2, %v1064_v32  ;;  %v1068_v33 = vsel %vm365_vm0, %v1066_v48, %v1067_v6  ;;  %v3774_v54 = vld [vmem:[#allocation34_spill] sm:$0xff]  ;;  %v3775_v51 = vld [vmem:[#allocation19_spill] sm:$0xff]  ;;  %v3776_v32 = vld [vmem:[#allocation20_spill] sm:$0xff] }
  0xaa   : > { %v1071_v3 = vsel %vm365_vm0, %v1069_v41, %v1070_v8  ;;  %v2716_v37 = vadd.f32 %v1029_v47, %v2597_v42  ;;  %v2719_v34 = vadd.f32 %v1032_v44, %v2599_v40  ;;  %v1074_v0 = vsel %vm365_vm0, %v1072_v7, %v1073_v20  ;;  %v3771_v47 = vld [vmem:[#allocation17_spill] sm:$0xff]  ;;  %v3777_v6 = vld [vmem:[#allocation35_spill] sm:$0xff]  ;;  %v3778_v8 = vld [vmem:[#allocation36_spill] sm:$0xff] }
  0xab   : > { %v2723_v19 = vadd.f32 %v1035_v49, %v2601_v53  ;;  %v2726_v43 = vadd.f32 %v1038_v26, %v2603_v18  ;;  %v2729_v35 = vadd.f32 %v1041_v24, %v2605_v21  ;;  %v2732_v58 = vadd.f32 %v1044_v50, %v2617_v9  ;;  %v3779_v24 = vld [vmem:[#allocation21_spill] sm:$0xff]  ;;  %v3780_v20 = vld [vmem:[#allocation22_spill] sm:$0xff] }
  0xac   : > { %v2735_v42 = vadd.f32 %v1047_v17, %v2619_v56  ;;  %v2738_v44 = vadd.f32 %v1050_v1, %v2621_v45  ;;  %v2741_v40 = vadd.f32 %v1053_v13, %v2626_v36  ;;  %v2744_v53 = vadd.f32 %v1056_v5, %v2628_v23  ;;  %v3758_v56 = vld [vmem:[#allocation26_spill] sm:$0xff]  ;;  %v3760_v36 = vld [vmem:[#allocation24_spill] sm:$0xff]  ;;  %v3781_v17 = vld [vmem:[#allocation37_spill] sm:$0xff] }
  0xad   : > { %v2747_v18 = vadd.f32 %v1059_v15, %v2630_v14  ;;  %v2750_v21 = vadd.f32 %v1062_v60, %v2635_v28  ;;  %v2753_v49 = vadd.f32 %v1065_v55, %v2637_v46  ;;  %v2756_v9 = vadd.f32 %v1068_v33, %v2639_v61  ;;  %v3762_v23 = vld [vmem:[#allocation14_spill] sm:$0xff]  ;;  %v3764_v14 = vld [vmem:[#allocation29_spill] sm:$0xff]  ;;  %v3767_v46 = vld [vmem:[#allocation15_spill] sm:$0xff] }
  0xae   : > { %v2759_v45 = vadd.f32 %v1071_v3, %v3758_v56  ;;  %v2762_v25 = vadd.f32 %v1074_v0, %v3760_v36  ;;  %v1114_v62 = vmul.f32 %v3763_v63, %v3762_v23  ;;  %v1115_v38 = vmul.f32 %v3765_v39, %v3764_v14  ;;  %v3766_v28 = vld [vmem:[#allocation30_spill] sm:$0xff]  ;;  %v3768_v61 = vld [vmem:[#allocation16_spill] sm:$0xff]  ;;  %v3783_v15 = vld [vmem:[#allocation5_spill] sm:$0xff] }
  0xaf   : > { %3757 = vst [vmem:[#allocation13_spill] sm:$0xff] %v2756_v9  ;;  %v1116_v59 = vmul.f32 %v3763_v63, %v3766_v28  ;;  %v1117_v16 = vmul.f32 %v3765_v39, %v3767_v46  ;;  %v1118_v27 = vmul.f32 %v3763_v63, %v3768_v61  ;;  %v1119_v10 = vmul.f32 %v3765_v39, %v3769_v52  ;;  %v3782_v13 = vld [vmem:[#allocation38_spill] sm:$0xff]  ;;  %v3785_v3 = vld [vmem:[#allocation8_spill] sm:$0xff]  ;;  %v3786_v56 = vld [vmem:[#allocation7_spill] sm:$0xff] }
  0xb0   : > { %3759 = vst [vmem:[#allocation27_spill] sm:$0xff] %v2759_v45  ;;  %v1120_v22 = vmul.f32 %v3763_v63, %v3770_v30  ;;  %v1121_v11 = vmul.f32 %v3765_v39, %v3771_v47  ;;  %v1122_v4 = vmul.f32 %v3763_v63, %v3772_v29  ;;  %v1123_v12 = vmul.f32 %v3765_v39, %v3773_v57  ;;  %v3784_v55 = vld [vmem:[#allocation6_spill] sm:$0xff]  ;;  %v3788_v28 = vld [vmem:[#allocation3_spill] sm:$0xff]  ;;  %v3789_v61 = vld [vmem:[#allocation4_spill] sm:$0xff] }
  0xb1   : > { %3761 = vst [vmem:[#allocation28_spill] sm:$0xff] %v2762_v25  ;;  %v1124_v31 = vmul.f32 %v3763_v63, %v3774_v54  ;;  %v1125_v2 = vmul.f32 %v3765_v39, %v3775_v51  ;;  %v1126_v48 = vmul.f32 %v3763_v63, %v3776_v32  ;;  %v1127_v41 = vmul.f32 %v3765_v39, %v3777_v6  ;;  %v3787_v23 = vld [vmem:[#allocation2_spill] sm:$0xff]  ;;  %v3790_v30 = vld [vmem:[#allocation9_spill] sm:$0xff]  ;;  %v3791_v29 = vld [vmem:[#allocation11_spill] sm:$0xff] }
  0xb2   : > { %v1128_v26 = vmul.f32 %v3763_v63, %v3778_v8  ;;  %v1129_v7 = vmul.f32 %v3765_v39, %v3779_v24  ;;  %v1130_v50 = vmul.f32 %v3763_v63, %v3780_v20  ;;  %v1131_v1 = vmul.f32 %v3765_v39, %v3781_v17  ;;  %v3792_v54 = vld [vmem:[#allocation12_spill] sm:$0xff]  ;;  %v3793_v32 = vld [vmem:[#allocation39_spill] sm:$0xff] }
  0xb3   : > { %v1132_v5 = vmul.f32 %v3763_v63, %v3782_v13  ;;  %v2804_v60 = vmul.f32 %v3765_v39, %v3783_v15  ;;  %v2808_v33 = vmul.f32 %v3763_v63, %v3784_v55  ;;  %v2812_v0 = vmul.f32 %v3765_v39, %v3785_v3 }
  0xb4   : > { %v2816_v36 = vmul.f32 %v3763_v63, %v3786_v56  ;;  %v2820_v14 = vmul.f32 %v3765_v39, %v3787_v23  ;;  %v2824_v46 = vmul.f32 %v3763_v63, %v3788_v28  ;;  %v1173_v52 = vrot.slane %v3789_v61, 2 }
  0xb5   : > { %v1174_v47 = vrot.slane %v3790_v30, 2  ;;  %v1176_v57 = vrot.slane %v3791_v29, 2  ;;  %v1177_v51 = vrot.slane %v3792_v54, 2  ;;  %v1179_v6 = vrot.slane %v3793_v32, 2  ;;  %v3794_v29 = vld [vmem:[#allocation23_spill] sm:$0xff] }
  0xb6   : > { %v1180_v8 = vrot.slane %v1115_v38, 2  ;;  %v1182_v24 = vrot.slane %v1114_v62, 2  ;;  %v1183_v20 = vrot.slane %v1116_v59, 2  ;;  %v1185_v17 = vrot.slane %v1117_v16, 2 }
  0xb7   : > { %v1186_v13 = vrot.slane %v1119_v10, 2  ;;  %v1188_v15 = vrot.slane %v1118_v27, 2  ;;  %v1189_v55 = vrot.slane %v1120_v22, 2  ;;  %v1191_v3 = vrot.slane %v1121_v11, 2 }
  0xb8   : > { %v1192_v56 = vrot.slane %v1123_v12, 2  ;;  %v1194_v23 = vrot.slane %v1122_v4, 2  ;;  %v1195_v28 = vrot.slane %v1124_v31, 2  ;;  %v1197_v61 = vrot.slane %v1125_v2, 2 }
  0xb9   : > { %v1198_v25 = vrot.slane %v1127_v41, 2  ;;  %v1200_v30 = vrot.slane %v1126_v48, 2  ;;  %v1201_v45 = vrot.slane %v1128_v26, 2  ;;  %v3795_v9 = vunpack.c.l.bf16 %v3794_v29 }
  0xba   : > { %v3796_v38 = vunpack.c.h.bf16 %v3794_v29  ;;  %v1175_v59 = vsel %vm512_vm1, %v1173_v52, %v1174_v47  ;;  %v1178_v16 = vsel %vm512_vm1, %v1176_v57, %v1177_v51  ;;  %v1181_v27 = vsel %vm512_vm1, %v1179_v6, %v1180_v8  ;;  %v3797_v29 = vld [vmem:[#allocation13_spill] sm:$0xff] }
  0xbb   : > { %v1139_v54 = vmul.f32 %v3765_v39, %v3795_v9  ;;  %v1184_v10 = vsel %vm512_vm1, %v1182_v24, %v1183_v20  ;;  %v1203_v22 = vrot.slane %v1129_v7, 2  ;;  %v1204_v11 = vrot.slane %v1131_v1, 2 }
  0xbc   : > { %v1140_v62 = vmul.f32 %v3763_v63, %v3796_v38  ;;  %v1187_v4 = vsel %vm512_vm1, %v1185_v17, %v1186_v13  ;;  %v1190_v12 = vsel %vm512_vm1, %v1188_v15, %v1189_v55  ;;  %v1206_v31 = vrot.slane %v1130_v50, 2  ;;  %v1253_v50 = vld [vmem:[%s3435_s2] sm:$0x3] }
  0xbd   : > { %v1207_v9 = vrot.slane %v1132_v5, 2  ;;  %v1193_v39 = vsel %vm512_vm1, %v1191_v3, %v1192_v56  ;;  %v1196_v63 = vsel %vm512_vm1, %v1194_v23, %v1195_v28  ;;  %v1199_v2 = vsel %vm512_vm1, %v1197_v61, %v1198_v25 }
  0xbe   : > { %v1202_v48 = vsel %vm512_vm1, %v1200_v30, %v1201_v45  ;;  %v1209_v41 = vrot.slane %v2804_v60, 2  ;;  %v1210_v26 = vrot.slane %v2812_v0, 2  ;;  %v1237_v7 = vadd.f32 %v1175_v59, %v2716_v37  ;;  %v3798_v59 = vld [vmem:[#allocation27_spill] sm:$0xff] }
  0xbf   : > { %v1239_v1 = vadd.f32 %v1181_v27, %v2723_v19  ;;  %v1205_v5 = vsel %vm512_vm1, %v1203_v22, %v1204_v11  ;;  %v1212_v52 = vrot.slane %v2808_v33, 2  ;;  %v1238_v25 = vadd.f32 %v1178_v16, %v2719_v34 }
  0xc0   : > { %v1240_v45 = vadd.f32 %v1184_v10, %v2726_v43  ;;  %v1208_v60 = vsel %vm512_vm1, %v1206_v31, %v1207_v9  ;;  %v1213_v0 = vrot.slane %v2816_v36, 2  ;;  %v1241_v37 = vadd.f32 %v1187_v4, %v2729_v35 }
  0xc1   : > { %v1255_v47 = vperm.slane %v1253_v50, 0  ;;  %v1215_v19 = vrot.slane %v2820_v14, 2  ;;  %v1216_v57 = vrot.slane %v1139_v54, 2  ;;  %v1242_v51 = vadd.f32 %v1190_v12, %v2732_v58 }
  0xc2   : > { %v1256_v32 = vperm.slane %v1253_v50, 1  ;;  %v1218_v6 = vrot.slane %v2824_v46, 2  ;;  %v1243_v33 = vadd.f32 %v1193_v39, %v2735_v42  ;;  %v1219_v8 = vrot.slane %v1140_v62, 2 }
  0xc3   : > { %v2865_v34 = vadd.f32 %v1255_v47, %v1237_v7  ;;  %v2867_v43 = vadd.f32 %v1255_v47, %v1239_v1  ;;  %v1244_v36 = vadd.f32 %v1196_v63, %v2738_v44  ;;  %v1211_v14 = vsel %vm512_vm1, %v1209_v41, %v1210_v26 }
  0xc4   : > { %v2870_v24 = vadd.f32 %v1256_v32, %v1238_v25  ;;  %v2872_v35 = vadd.f32 %v1256_v32, %v1240_v45  ;;  %v1214_v58 = vsel %vm512_vm1, %v1212_v52, %v1213_v0  ;;  %v1245_v20 = vadd.f32 %v1199_v2, %v2741_v40 }
  0xc5   : > { %v2877_v46 = vadd.f32 %v1255_v47, %v1241_v37  ;;  %v1217_v42 = vsel %vm512_vm1, %v1215_v19, %v1216_v57  ;;  %v1246_v17 = vadd.f32 %v1202_v48, %v2744_v53  ;;  %v1247_v13 = vadd.f32 %v1205_v5, %v2747_v18 }
  0xc6   : > { %v2882_v15 = vadd.f32 %v1256_v32, %v1242_v51  ;;  %v2884_v44 = vadd.f32 %v1255_v47, %v1243_v33  ;;  %v1752_v55 = vmul.f32 -1.442695, %v2865_v34  ;;  %v1753_v3 = vmul.f32 -1.442695, %v2870_v24 }
  0xc7   : > { %v1754_v56 = vmul.f32 -1.442695, %v2867_v43  ;;  %v1220_v40 = vsel %vm512_vm1, %v1218_v6, %v1219_v8  ;;  %v1248_v23 = vadd.f32 %v1208_v60, %v2750_v21  ;;  %v2891_v28 = vadd.f32 %v1256_v32, %v1244_v36 }
  0xc8   : > { %v1755_v53 = vmul.f32 -1.442695, %v2872_v35  ;;  %v1249_v18 = vadd.f32 %v1211_v14, %v2753_v49  ;;  %v2895_v61 = vadd.f32 %v1255_v47, %v1245_v20  ;;  %1783 = vpow2.f32 %v1752_v55  ;;  %v3799_v49 = vld [vmem:[#allocation28_spill] sm:$0xff] }
  0xc9   : > { %v1756_v30 = vmul.f32 -1.442695, %v2877_v46  ;;  %v1250_v54 = vadd.f32 %v1214_v58, %v3797_v29  ;;  %v2899_v38 = vadd.f32 %v1256_v32, %v1246_v17  ;;  %1785 = vpow2.f32 %v1753_v3 }
  0xca   : > { %v1757_v62 = vmul.f32 -1.442695, %v2882_v15  ;;  %v1251_v21 = vadd.f32 %v1217_v42, %v3798_v59  ;;  %v2903_v16 = vadd.f32 %v1255_v47, %v1247_v13  ;;  %1787 = vpow2.f32 %v1754_v56 }
  0xcb   : > { %v1758_v27 = vmul.f32 -1.442695, %v2884_v44  ;;  %v1252_v10 = vadd.f32 %v1220_v40, %v3799_v49  ;;  %v2907_v22 = vadd.f32 %v1256_v32, %v1248_v23  ;;  %1789 = vpow2.f32 %v1755_v53 }
  0xcc   : > { %v1759_v11 = vmul.f32 -1.442695, %v2891_v28  ;;  %v2910_v4 = vadd.f32 %v1255_v47, %v1249_v18  ;;  %1791 = vpow2.f32 %v1756_v30  ;;  %v1760_v12 = vmul.f32 -1.442695, %v2895_v61 }
  0xcd   : > { %v2913_v31 = vadd.f32 %v1256_v32, %v1250_v54  ;;  %1793 = vpow2.f32 %v1757_v62  ;;  %v1761_v9 = vmul.f32 -1.442695, %v2899_v38  ;;  %v2916_v63 = vadd.f32 %v1255_v47, %v1251_v21 }
  0xce   : > { %v1784_v39 = vpop.eup %1783  ;;  %1795 = vpow2.f32 %v1758_v27  ;;  %v1762_v2 = vmul.f32 -1.442695, %v2903_v16  ;;  %v2919_v41 = vadd.f32 %v1256_v32, %v1252_v10  ;;  %v1763_v26 = vmul.f32 -1.442695, %v2907_v22 }
  0xcf   : > { %3800 = vst [vmem:[#allocation26_spill] sm:$0xff] %v2916_v63  ;;  %v1786_v48 = vpop.eup %1785  ;;  %1797 = vpow2.f32 %v1759_v11  ;;  %v1764_v1 = vmul.f32 -1.442695, %v2910_v4  ;;  %v1765_v5 = vmul.f32 -1.442695, %v2913_v31  ;;  %v2926_v37 = vadd.f32 1.0, %v1784_v39 }
  0xd0   : > { %3801 = vst [vmem:[#allocation24_spill] sm:$0xff] %v2919_v41  ;;  %v1788_v7 = vpop.eup %1787  ;;  %1799 = vpow2.f32 %v1760_v12  ;;  %v1766_v25 = vmul.f32 -1.442695, %v2916_v63  ;;  %v1767_v60 = vmul.f32 -1.442695, %v2919_v41  ;;  %v2928_v19 = vadd.f32 1.0, %v1786_v48 }
  0xd1   : > { %v1790_v50 = vpop.eup %1789  ;;  %1801 = vpow2.f32 %v1761_v9  ;;  %v2930_v51 = vadd.f32 1.0, %v1788_v7  ;;  %v1350_v32 = vand.u32 2147483648, %v2926_v37  ;;  %v1348_v58 = vand.u32 2147483647, %v2926_v37 }
  0xd2   : > { %v1792_v52 = vpop.eup %1791  ;;  %1803 = vpow2.f32 %v1762_v2  ;;  %v2933_v33 = vadd.f32 1.0, %v1790_v50  ;;  %v1365_v8 = vand.u32 2147483648, %v2928_v19  ;;  %v1363_v17 = vand.u32 2147483647, %v2928_v19 }
  0xd3   : > { %v1794_v45 = vpop.eup %1793  ;;  %1805 = vpow2.f32 %v1763_v26  ;;  %v2936_v14 = vadd.f32 1.0, %v1792_v52  ;;  %v1380_v13 = vand.u32 2147483648, %v2930_v51  ;;  %vm1344_vm2 = vweird.f32 %v2926_v37 }
  0xd4   : > { %v1796_v0 = vpop.eup %1795  ;;  %1807 = vpow2.f32 %v1764_v1  ;;  %v2940_v42 = vadd.f32 1.0, %v1794_v45  ;;  %v2948_v56 = vor.u32 1.1754944e-38, %v1350_v32  ;;  %v1395_v40 = vand.u32 2147483648, %v2933_v33 }
  0xd5   : > { %v1798_v47 = vpop.eup %1797  ;;  %1809 = vpow2.f32 %v1765_v5  ;;  %v2945_v3 = vadd.f32 1.0, %v1796_v0  ;;  %vm1359_vm3 = vweird.f32 %v2928_v19  ;;  %v2955_v18 = vor.u32 1.1754944e-38, %v1365_v8 }
  0xd6   : > { %v1800_v57 = vpop.eup %1799  ;;  %1811 = vpow2.f32 %v1766_v25  ;;  %v2952_v53 = vadd.f32 1.0, %v1798_v47  ;;  %v1378_v30 = vand.u32 2147483647, %v2930_v51  ;;  %vm1374_vm4 = vweird.f32 %v2930_v51 }
  0xd7   : > { %v1802_v6 = vpop.eup %1801  ;;  %1813 = vpow2.f32 %v1767_v60  ;;  %v2959_v54 = vadd.f32 1.0, %v1800_v57  ;;  %v1393_v59 = vand.u32 2147483647, %v2933_v33  ;;  %v2970_v10 = vor.u32 1.1754944e-38, %v1380_v13 }
  0xd8   : > { %v1804_v36 = vpop.eup %1803  ;;  %1815 = vrcp.f32 %v2926_v37  ;;  %v2961_v62 = vadd.f32 1.0, %v1802_v6  ;;  %vm1389_vm5 = vweird.f32 %v2933_v33  ;;  %v2978_v9 = vor.u32 1.1754944e-38, %v1395_v40 }
  0xd9   : > { %v1806_v20 = vpop.eup %1805  ;;  %1817 = vrcp.f32 %v2928_v19  ;;  %v2966_v27 = vadd.f32 1.0, %v1804_v36  ;;  %vm1404_vm6 = vweird.f32 %v2936_v14  ;;  %v1408_v39 = vand.u32 2147483647, %v2936_v14 }
  0xda   : > { %v1808_v55 = vpop.eup %1807  ;;  %1819 = vrcp.f32 %v2930_v51  ;;  %v2968_v49 = vadd.f32 1.0, %v1806_v20  ;;  %v1410_v7 = vand.u32 2147483648, %v2936_v14  ;;  %v1423_v25 = vand.u32 2147483647, %v2940_v42 }
  0xdb   : > { %v1810_v23 = vpop.eup %1809  ;;  %1821 = vrcp.f32 %v2933_v33  ;;  %v2976_v12 = vadd.f32 1.0, %v1808_v55  ;;  %vm3003_vm9 = vcmp.eq.f32.partialorder %v1348_v58, 8.507059e+37  ;;  %v1425_v57 = vand.u32 2147483648, %v2940_v42 }
  0xdc   : > { %v1812_v29 = vpop.eup %1811  ;;  %1823 = vrcp.f32 %v2936_v14  ;;  %v2985_v48 = vadd.f32 1.0, %v1810_v23  ;;  %vm3013_vm11 = vcmp.eq.f32.partialorder %v1363_v17, 8.507059e+37  ;;  %vm3024_vm14 = vcmp.eq.f32.partialorder %v1378_v30, 8.507059e+37 }
  0xdd   : > { %v1814_v21 = vpop.eup %1813  ;;  %1825 = vrcp.f32 %v2940_v42  ;;  %v2993_v50 = vadd.f32 1.0, %v1812_v29  ;;  %vm3034_vm0 = vcmp.eq.f32.partialorder %v1393_v59, 8.507059e+37  ;;  %vm3038_vm1 = vcmp.eq.f32.partialorder %v1408_v39, 8.507059e+37 }
  0xde   : > { %v2974_v11 = vpop.eup %1815  ;;  %1827 = vrcp.f32 %v2945_v3  ;;  %v2995_v5 = vadd.f32 1.0, %v1814_v21  ;;  %v1411_v63 = vor.u32 1.1754944e-38, %v1410_v7  ;;  %v1453_v8 = vand.u32 2147483647, %v2952_v53 }
  0xdf   : > { %v2983_v2 = vpop.eup %1817  ;;  %v1340_v26 = vmul.f32 %v2974_v11, %v2926_v37  ;;  %vm1345_vm8 = vweird.f32 %v2974_v11  ;;  %1829 = vrcp.f32 %v2952_v53  ;;  %v1468_v21 = vand.u32 2147483647, %v2959_v54 }
  0xe0   : > { %v2991_v1 = vpop.eup %1819  ;;  %v1355_v52 = vmul.f32 %v2983_v2, %v2928_v19  ;;  %vm1360_vm10 = vweird.f32 %v2983_v2  ;;  %vm3049_vm12 = vmor %vm1344_vm2, %vm1345_vm8  ;;  %1831 = vrcp.f32 %v2959_v54 }
  0xe1   : > { %v3000_v45 = vpop.eup %1821  ;;  %v1341_v60 = vsub.f32 1.0, %v1340_v26  ;;  %v1370_v47 = vmul.f32 %v2991_v1, %v2930_v51  ;;  %vm1375_vm13 = vweird.f32 %v2991_v1  ;;  %vm3061_vm7 = vmor %vm1359_vm3, %vm1360_vm10  ;;  %1833 = vrcp.f32 %v2961_v62 }
  0xe2   : > { %v3010_v32 = vpop.eup %1823  ;;  %v1356_v6 = vsub.f32 1.0, %v1355_v52  ;;  %v1385_v36 = vmul.f32 %v3000_v45, %v2933_v33  ;;  %vm1390_vm15 = vweird.f32 %v3000_v45  ;;  %vm3072_vm8 = vmor %vm1374_vm4, %vm1375_vm13  ;;  %1835 = vrcp.f32 %v2966_v27 }
  0xe3   : > { %v3020_v58 = vpop.eup %1825  ;;  %v1342_v20 = vmul.f32 %v2974_v11, %v1341_v60  ;;  %v1371_v13 = vsub.f32 1.0, %v1370_v47  ;;  %v1400_v17 = vmul.f32 %v3010_v32, %v2936_v14  ;;  %vm1405_vm2 = vweird.f32 %v3010_v32  ;;  %vm3083_vm10 = vmor %vm1389_vm5, %vm1390_vm15 }
  0xe4   : > { %v3030_v40 = vpop.eup %1827  ;;  %v1357_v23 = vmul.f32 %v2983_v2, %v1356_v6  ;;  %v1386_v29 = vsub.f32 1.0, %v1385_v36  ;;  %v1415_v30 = vmul.f32 %v3020_v58, %v2940_v42  ;;  %vm1420_vm3 = vweird.f32 %v3020_v58  ;;  %vm3096_vm13 = vmor %vm1404_vm6, %vm1405_vm2 }
  0xe5   : > { %v1343_v52 = vadd.f32 %v2974_v11, %v1342_v20  ;;  %v1372_v59 = vmul.f32 %v2991_v1, %v1371_v13  ;;  %v1401_v47 = vsub.f32 1.0, %v1400_v17  ;;  %v1430_v39 = vmul.f32 %v3030_v40, %v2945_v3 }
  0xe6   : > { %v1358_v6 = vadd.f32 %v2983_v2, %v1357_v23  ;;  %v1387_v37 = vmul.f32 %v3000_v45, %v1386_v29  ;;  %v1416_v20 = vsub.f32 1.0, %v1415_v30  ;;  %vm1435_vm4 = vweird.f32 %v3030_v40 }
  0xe7   : > { %v1373_v13 = vadd.f32 %v2991_v1, %v1372_v59  ;;  %v1402_v19 = vmul.f32 %v3010_v32, %v1401_v47  ;;  %v1431_v23 = vsub.f32 1.0, %v1430_v39  ;;  %v1438_v59 = vand.u32 2147483647, %v2945_v3 }
  0xe8   : > { %v1388_v29 = vadd.f32 %v3000_v45, %v1387_v37  ;;  %v1417_v51 = vmul.f32 %v3020_v58, %v1416_v20  ;;  %v1347_v47 = vsel %vm3049_vm12, %v2974_v11, %v1343_v52  ;;  %v1440_v20 = vand.u32 2147483648, %v2945_v3 }
  0xe9   : > { %v1403_v39 = vadd.f32 %v3010_v32, %v1402_v19  ;;  %v1432_v37 = vmul.f32 %v3030_v40, %v1431_v23  ;;  %v1362_v41 = vsel %vm3061_vm7, %v2983_v2, %v1358_v6  ;;  %vm3822_vm5 = vweird.f32 %v2940_v42 }
  0xea   : > { %v1418_v60 = vadd.f32 %v3020_v58, %v1417_v51  ;;  %vm3110_vm12 = vmor %vm3822_vm5, %vm1420_vm3  ;;  %vm3114_vm6 = vcmp.eq.f32.partialorder %v1423_v25, 8.507059e+37  ;;  %v1377_v52 = vsel %vm3072_vm8, %v2991_v1, %v1373_v13  ;;  %v1426_v2 = vor.u32 1.1754944e-38, %v1425_v57 }
  0xeb   : > { %v1433_v7 = vadd.f32 %v3030_v40, %v1432_v37  ;;  %vm3827_vm7 = vweird.f32 %v2945_v3  ;;  %v3134_v25 = vsel %vm3003_vm9, %v2948_v56, %v1347_v47  ;;  %v1392_v1 = vsel %vm3083_vm10, %v3000_v45, %v1388_v29 }
  0xec   : > { %vm3126_vm15 = vmor %vm3827_vm7, %vm1435_vm4  ;;  %v1407_v57 = vsel %vm3096_vm13, %v3010_v32, %v1403_v39  ;;  %vm3142_vm2 = vcmp.eq.f32.partialorder %v1438_v59, 8.507059e+37  ;;  %v3149_v6 = vsel %vm3013_vm11, %v2955_v18, %v1362_v41  ;;  %v1422_v56 = vsel %vm3110_vm12, %v3020_v58, %v1418_v60 }
  0xed   : > { %v1441_v0 = vor.u32 1.1754944e-38, %v1440_v20  ;;  %v3158_v45 = vsel %vm3024_vm14, %v2970_v10, %v1377_v52  ;;  %v1437_v32 = vsel %vm3126_vm15, %v3030_v40, %v1433_v7  ;;  %v1455_v41 = vand.u32 2147483648, %v2952_v53 }
  0xee   : > { %v3168_v18 = vsel %vm3034_vm0, %v2978_v9, %v1392_v1  ;;  %v3172_v58 = vsel %vm3038_vm1, %v1411_v63, %v1407_v57  ;;  %v1470_v10 = vand.u32 2147483648, %v2959_v54  ;;  %v3178_v55 = vsel %vm3114_vm6, %v1426_v2, %v1422_v56  ;;  %v3183_v9 = vpop.eup %1829 }
  0xef   : > { %vm1449_vm9 = vweird.f32 %v2952_v53  ;;  %v1485_v40 = vand.u32 2147483648, %v2961_v62  ;;  %v3187_v63 = vsel %vm3142_vm2, %v1441_v0, %v1437_v32  ;;  %vm1464_vm11 = vweird.f32 %v2959_v54  ;;  %v3200_v23 = vpop.eup %1831 }
  0xf0   : > { %v1500_v26 = vand.u32 2147483648, %v2966_v27  ;;  %v1445_v36 = vmul.f32 %v3183_v9, %v2952_v53  ;;  %vm3194_vm14 = vcmp.eq.f32.partialorder %v1453_v8, 8.507059e+37  ;;  %v1456_v17 = vor.u32 1.1754944e-38, %v1455_v41  ;;  %v3212_v39 = vpop.eup %1833 }
  0xf1   : > { %vm1479_vm0 = vweird.f32 %v2961_v62  ;;  %v1483_v19 = vand.u32 2147483647, %v2961_v62  ;;  %v3202_v29 = vor.u32 1.1754944e-38, %v1470_v10  ;;  %vm1494_vm1 = vweird.f32 %v2966_v27  ;;  %v3219_v20 = vpop.eup %1835 }
  0xf2   : > { %v1498_v30 = vand.u32 2147483647, %v2966_v27  ;;  %1837 = vrcp.f32 %v2968_v49  ;;  %v1446_v51 = vsub.f32 1.0, %v1445_v36  ;;  %vm1450_vm8 = vweird.f32 %v3183_v9 }
  0xf3   : > { %v1460_v59 = vmul.f32 %v3200_v23, %v2959_v54  ;;  %v3210_v47 = vor.u32 1.1754944e-38, %v1485_v40  ;;  %v3214_v33 = vor.u32 1.1754944e-38, %v1500_v26  ;;  %vm1509_vm3 = vweird.f32 %v2968_v49  ;;  %vm3237_vm5 = vmor %vm1449_vm9, %vm1450_vm8 }
  0xf4   : > { %v1513_v37 = vand.u32 2147483647, %v2968_v49  ;;  %1839 = vrcp.f32 %v2976_v12  ;;  %v1447_v60 = vmul.f32 %v3183_v9, %v1446_v51  ;;  %vm1465_vm10 = vweird.f32 %v3200_v23 }
  0xf5   : > { %v1461_v14 = vsub.f32 1.0, %v1460_v59  ;;  %vm3223_vm4 = vcmp.eq.f32.partialorder %v1468_v21, 8.507059e+37  ;;  %v1475_v52 = vmul.f32 %v3212_v39, %v2961_v62  ;;  %vm3229_vm13 = vcmp.eq.f32.partialorder %v1483_v19, 8.507059e+37  ;;  %vm3267_vm9 = vmor %vm1464_vm11, %vm1465_vm10 }
  0xf6   : > { %v1490_v42 = vmul.f32 %v3219_v20, %v2966_v27  ;;  %v1515_v1 = vand.u32 2147483648, %v2968_v49  ;;  %vm1524_vm12 = vweird.f32 %v2976_v12  ;;  %v1528_v57 = vand.u32 2147483647, %v2976_v12 }
  0xf7   : > { %v1448_v3 = vadd.f32 %v3183_v9, %v1447_v60  ;;  %v1462_v56 = vmul.f32 %v3200_v23, %v1461_v14  ;;  %v1476_v0 = vsub.f32 1.0, %v1475_v52  ;;  %vm1480_vm6 = vweird.f32 %v3212_v39 }
  0xf8   : > { %vm3249_vm7 = vcmp.eq.f32.partialorder %v1498_v30, 8.507059e+37  ;;  %v1838_v32 = vpop.eup %1837  ;;  %v1491_v8 = vsub.f32 1.0, %v1490_v42  ;;  %vm1495_vm15 = vweird.f32 %v3219_v20  ;;  %vm3254_vm2 = vcmp.eq.f32.partialorder %v1513_v37, 8.507059e+37  ;;  %vm3275_vm8 = vmor %vm1479_vm0, %vm1480_vm6 }
  0xf9   : > { %1841 = vrcp.f32 %v2985_v48  ;;  %v1452_v10 = vsel %vm3237_vm5, %v3183_v9, %v1448_v3  ;;  %v1463_v40 = vadd.f32 %v3200_v23, %v1462_v56  ;;  %v1477_v26 = vmul.f32 %v3212_v39, %v1476_v0  ;;  %vm3297_vm0 = vmor %vm1494_vm1, %vm1495_vm15 }
  0xfa   : > { %v1505_v36 = vmul.f32 %v1838_v32, %v2968_v49  ;;  %v1840_v19 = vpop.eup %1839  ;;  %v1492_v9 = vmul.f32 %v3219_v20, %v1491_v8  ;;  %v1516_v51 = vor.u32 1.1754944e-38, %v1515_v1  ;;  %vm3280_vm5 = vcmp.eq.f32.partialorder %v1528_v57, 8.507059e+37 }
  0xfb   : > { %v1530_v59 = vand.u32 2147483648, %v2976_v12  ;;  %v1478_v37 = vadd.f32 %v3212_v39, %v1477_v26  ;;  %vm1510_vm11 = vweird.f32 %v1838_v32  ;;  %v1520_v14 = vmul.f32 %v1840_v19, %v2976_v12 }
  0xfc   : > { %v1506_v60 = vsub.f32 1.0, %v1505_v36  ;;  %v1457_v62 = vsel %vm3194_vm14, %v1456_v17, %v1452_v10  ;;  %v1467_v52 = vsel %vm3267_vm9, %v3200_v23, %v1463_v40  ;;  %v1493_v7 = vadd.f32 %v3219_v20, %v1492_v9  ;;  %vm3307_vm6 = vmor %vm1509_vm3, %vm1510_vm11 }
  0xfd   : > { %vm1539_vm10 = vweird.f32 %v2985_v48  ;;  %v1482_v13 = vsel %vm3275_vm8, %v3212_v39, %v1478_v37  ;;  %v1521_v1 = vsub.f32 1.0, %v1520_v14  ;;  %vm1525_vm14 = vweird.f32 %v1840_v19 }
  0xfe   : > { %v1507_v17 = vmul.f32 %v1838_v32, %v1506_v60  ;;  %v1531_v27 = vor.u32 1.1754944e-38, %v1530_v59  ;;  %v1543_v3 = vand.u32 2147483647, %v2985_v48  ;;  %v1545_v56 = vand.u32 2147483648, %v2985_v48  ;;  %vm3326_vm1 = vmor %vm1524_vm12, %vm1525_vm14 }
  0xff   : > { %v1842_v23 = vpop.eup %1841  ;;  %1843 = vrcp.f32 %v2993_v50  ;;  %v1497_v39 = vsel %vm3297_vm0, %v3219_v20, %v1493_v7  ;;  %v1522_v8 = vmul.f32 %v1840_v19, %v1521_v1  ;;  %v1472_v49 = vsel %vm3223_vm4, %v3202_v29, %v1467_v52 }
 0x100   : > { %v1508_v0 = vadd.f32 %v1838_v32, %v1507_v17  ;;  %v1535_v10 = vmul.f32 %v1842_v23, %v2985_v48  ;;  %v1487_v40 = vsel %vm3229_vm13, %v3210_v47, %v1482_v13  ;;  %vm1540_vm3 = vweird.f32 %v1842_v23 }
 0x101   : > { %v1558_v20 = vand.u32 2147483647, %v2993_v50  ;;  %v1523_v36 = vadd.f32 %v1840_v19, %v1522_v8  ;;  %v1560_v29 = vand.u32 2147483648, %v2993_v50  ;;  %v1502_v47 = vsel %vm3249_vm7, %v3214_v33, %v1497_v39  ;;  %vm3352_vm12 = vmor %vm1539_vm10, %vm1540_vm3 }
 0x102   : > { %v1512_v26 = vsel %vm3307_vm6, %v1838_v32, %v1508_v0  ;;  %v1536_v30 = vsub.f32 1.0, %v1535_v10  ;;  %vm3337_vm4 = vcmp.eq.f32.partialorder %v1543_v3, 8.507059e+37  ;;  %v1546_v11 = vor.u32 1.1754944e-38, %v1545_v56 }
 0x103   : > { %1845 = vrcp.f32 %v2995_v5  ;;  %v1517_v2 = vsel %vm3254_vm2, %v1516_v51, %v1512_v26  ;;  %v1527_v32 = vsel %vm3326_vm1, %v1840_v19, %v1523_v36  ;;  %vm1554_vm13 = vweird.f32 %v2993_v50  ;;  %v3866_v26 = vld [vmem:[#allocation26_spill] sm:$0xff] }
 0x104   : > { %v1537_v9 = vmul.f32 %v1842_v23, %v1536_v30  ;;  %v1532_v33 = vsel %vm3280_vm5, %v1531_v27, %v1527_v32  ;;  %v1561_v41 = vor.u32 1.1754944e-38, %v1560_v29  ;;  %vm1569_vm7 = vweird.f32 %v2995_v5  ;;  %v3867_v30 = vld [vmem:[#allocation24_spill] sm:$0xff] }
 0x105   : > { %v1844_v59 = vpop.eup %1843  ;;  %v1573_v51 = vand.u32 2147483647, %v2995_v5  ;;  %vm3359_vm15 = vcmp.eq.f32.partialorder %v1558_v20, 8.507059e+37  ;;  %v1575_v54 = vand.u32 2147483648, %v2995_v5  ;;  %v1579_v48 = vmul.f32 %v3134_v25, %v2865_v34 }
 0x106   : > { %v1538_v19 = vadd.f32 %v1842_v23, %v1537_v9  ;;  %v1550_v37 = vmul.f32 %v1844_v59, %v2993_v50  ;;  %vm1555_vm2 = vweird.f32 %v1844_v59  ;;  %v1580_v14 = vmul.f32 %v3149_v6, %v2870_v24 }
 0x107   : > { %v1581_v52 = vmul.f32 %v3158_v45, %v2867_v43  ;;  %v1582_v7 = vmul.f32 %v3168_v18, %v2872_v35  ;;  %v1583_v17 = vmul.f32 %v3172_v58, %v2877_v46  ;;  %v1584_v34 = vmul.f32 %v3178_v55, %v2882_v15  ;;  %vm3395_vm8 = vmor %vm1554_vm13, %vm1555_vm2 }
 0x108   : > { %v1542_v42 = vsel %vm3352_vm12, %v1842_v23, %v1538_v19  ;;  %v1551_v13 = vsub.f32 1.0, %v1550_v37  ;;  %v1585_v43 = vmul.f32 %v3187_v63, %v2884_v44  ;;  %v1586_v6 = vmul.f32 %v1457_v62, %v2891_v28 }
 0x109   : > { %v1846_v25 = vpop.eup %1845  ;;  %v1547_v24 = vsel %vm3337_vm4, %v1546_v11, %v1542_v42  ;;  %v1587_v35 = vmul.f32 %v1472_v49, %v2895_v61  ;;  %v1588_v15 = vmul.f32 %v1487_v40, %v2899_v38  ;;  %v1589_v28 = vmul.f32 %v1502_v47, %v2903_v16 }
 0x10a   : > { %v1552_v46 = vmul.f32 %v1844_v59, %v1551_v13  ;;  %v1565_v45 = vmul.f32 %v1846_v25, %v2995_v5  ;;  %vm1570_vm9 = vweird.f32 %v1846_v25  ;;  %v1590_v61 = vmul.f32 %v1517_v2, %v2907_v22 }
 0x10b   : > { %v1591_v18 = vmul.f32 %v1532_v33, %v2910_v4  ;;  %v1595_v58 = vpack.c.bf16 %v1580_v14, %v1579_v48  ;;  %v1596_v62 = vpack.c.bf16 %v1582_v7, %v1581_v52  ;;  %v1597_v38 = vpack.c.bf16 %v1584_v34, %v1583_v17  ;;  %vm3410_vm5 = vmor %vm1569_vm7, %vm1570_vm9 }
 0x10c   : > { %v1553_v55 = vadd.f32 %v1844_v59, %v1552_v46  ;;  %v1566_v63 = vsub.f32 1.0, %v1565_v45  ;;  %v1592_v1 = vmul.f32 %v1547_v24, %v2913_v31  ;;  %v1598_v50 = vpack.c.bf16 %v1586_v6, %v1585_v43 }
 0x10d   : > { %v1599_v23 = vpack.c.bf16 %v1588_v15, %v1587_v35  ;;  %v1600_v57 = vpack.c.bf16 %v1590_v61, %v1589_v28  ;;  %1603 = vst [vmem:[%s3388_s12] sm:$0xff] %v1595_v58  ;;  %v1611_v4 = vadd.f32 %v1581_v52, %v1579_v48  ;;  %v1624_v27 = vadd.f32 %v1582_v7, %v1580_v14 }
 0x10e   : > { %v1557_v16 = vsel %vm3395_vm8, %v1844_v59, %v1553_v55  ;;  %v1567_v22 = vmul.f32 %v1846_v25, %v1566_v63  ;;  %1604 = vst [vmem:[%s3388_s12 + $0x8] sm:$0xff] %v1596_v62  ;;  %v1576_v31 = vor.u32 1.1754944e-38, %v1575_v54  ;;  %v1601_v56 = vpack.c.bf16 %v1592_v1, %v1591_v18 }
 0x10f   : > { %1605 = vst [vmem:[%s3388_s12 + $0x10] sm:$0xff] %v1597_v38  ;;  %vm1574_vm11 = vcmp.eq.f32.partialorder %v1573_v51, 8.507059e+37  ;;  %v1612_v0 = vadd.f32 %v1611_v4, %v1583_v17  ;;  %v1625_v8 = vadd.f32 %v1624_v27, %v1584_v34  ;;  %v1562_v10 = vsel %vm3359_vm15, %v1561_v41, %v1557_v16 }
 0x110   : > { %v1568_v39 = vadd.f32 %v1846_v25, %v1567_v22  ;;  %1606 = vst [vmem:[%s3388_s12 + $0x18] sm:$0xff] %v1598_v50  ;;  %v1859_v49 = vmov 64.0   ;;  %v1593_v36 = vmul.f32 %v1562_v10, %v3866_v26  ;;  %vm1649_vm10 = vcmask 1040384  }
 0x111   : > { %1607 = vst [vmem:[%s3388_s12 + $0x20] sm:$0xff] %v1599_v23  ;;  %1847 = vrcp.f32 %v1859_v49  ;;  %v1613_v40 = vadd.f32 %v1612_v0, %v1585_v43  ;;  %v1626_v21 = vadd.f32 %v1625_v8, %v1586_v6 }
 0x112   : > { %v1572_v5 = vsel %vm3410_vm5, %v1846_v25, %v1568_v39  ;;  %1608 = vst [vmem:[%s3388_s12 + $0x28] sm:$0xff] %v1600_v57 }
 0x113   : > { %v1577_v20 = vsel %vm1574_vm11, %v1576_v31, %v1572_v5  ;;  %1609 = vst [vmem:[%s3388_s12 + $0x30] sm:$0xff] %v1601_v56  ;;  %v1614_v47 = vadd.f32 %v1613_v40, %v1587_v35  ;;  %v1627_v12 = vadd.f32 %v1626_v21, %v1588_v15  ;;  %v1652_v35 = vlaneseq }
 0x114   : > { %v1594_v29 = vmul.f32 %v1577_v20, %v3867_v30 }
 0x115   : > { %v1615_v2 = vadd.f32 %v1614_v47, %v1589_v28  ;;  %v1628_v32 = vadd.f32 %v1627_v12, %v1590_v61  ;;  %vm1654_vm14 = vcmp.lt.s32.totalorder %v1652_v35, 256 }
 0x116   : > { %v1602_v11 = vpack.c.bf16 %v1594_v29, %v1593_v36 }
 0x117   : > { %v1848_v9 = vpop.eup %1847  ;;  %v1616_v59 = vadd.f32 %v1615_v2, %v1591_v18  ;;  %v1629_v33 = vadd.f32 %v1628_v32, %v1592_v1 }
 0x118   : > { %1610 = vst [vmem:[%s3388_s12 + $0x38] sm:$0xff] %v1602_v11  ;;  %v1638_v53 = vmul.f32 64.0, %v1848_v9  ;;  %vm1642_vm0 = vweird.f32 %v1848_v9 }
 0x119   : > { %v1617_v41 = vadd.f32 %v1616_v59, %v1593_v36  ;;  %v1630_v51 = vadd.f32 %v1629_v33, %v1594_v29 }
 0x11a   : > { %v1639_v19 = vsub.f32 1.0, %v1638_v53 }
 0x11b   : > { %v1618_v37 = vrot.slane %v1617_v41, 4  ;;  %v1631_v60 = vrot.slane %v1630_v51, 4 }
 0x11c   : > { %v1640_v54 = vmul.f32 %v1848_v9, %v1639_v19 }
 0x11d   : > { %v1619_v48 = vadd.f32 %v1618_v37, %v1617_v41  ;;  %v1632_v14 = vadd.f32 %v1631_v60, %v1630_v51 }
 0x11e   : > { %v1641_v42 = vadd.f32 %v1848_v9, %v1640_v54 }
 0x11f   : > { %v1620_v52 = vrot.slane %v1619_v48, 2  ;;  %v1633_v7 = vrot.slane %v1632_v14, 2 }
 0x120   : > { %v1643_v24 = vsel %vm1642_vm0, %v1848_v9, %v1641_v42 }
 0x121   : > { %v1621_v13 = vadd.f32 %v1620_v52, %v1619_v48  ;;  %v1634_v17 = vadd.f32 %v1633_v7, %v1632_v14 }
 0x123   : > { %v1622_v34 = vrot.slane %v1621_v13, 1  ;;  %v1635_v25 = vrot.slane %v1634_v17, 1 }
 0x125   : > { %v1623_v43 = vadd.f32 %v1622_v34, %v1621_v13  ;;  %v1636_v6 = vadd.f32 %v1635_v25, %v1634_v17 }
 0x127   : > { %v1644_v46 = vmul.f32 %v1643_v24, %v1623_v43  ;;  %v1645_v45 = vmul.f32 %v1643_v24, %v1636_v6 }
 0x129   : > { %v1648_v15 = vrot.slane %v1645_v45, 7 }
 0x12b   : > { %v1650_v44 = vsel %vm1649_vm10, %v1644_v46, %v1648_v15 }
 0x12c   : > { %1656 = vst.msk [vmem:[%s208_s18] sm:$0x3] %vm1654_vm14, %v1650_v44 }
 0x12d PF: > { %s15_s15 = sadd.s32 1, %s1857_s15  }
 0x12e   : > { %p12_p4 = scmp.ge.s32.totalorder %s15_s15, 4  }
 0x130   :  { %14 = sbr.rel (!%p12_p4) target bundleno = 1 (0x1), region = 74 }

// kernel: efficientnet_b3_forward.15
= control target key start
LH: loop header
LB: loop body
LE: loop exit
PB: predicated region body
PF: predicated region fallthrough
CT: control target
= control target key end

     0   :  { %s980_s18 = smov 0   ;;  %s982_s19 = smov 0   ;;  %s1096_s0 = inlined_call_operand.vmem [shape: bf16[128,256], index: 0, kind: input, shape index: {}]   ;;  %s1097_s1 = inlined_call_operand.vmem [shape: f32[2,1,256], index: 1, kind: input, shape index: {}]   ;;  %s1098_s2 = inlined_call_operand.vmem [shape: bf16[256,128], index: 2, kind: input, shape index: {}]   ;;  %s1099_s3 = inlined_call_operand.vmem [shape: f32[1,128], index: 3, kind: input, shape index: {}]   ;;  %s1100_s4 = inlined_call_operand.vmem [shape: bf16[128,128], index: 4, kind: input, shape index: {}]   ;;  %s1101_s5 = inlined_call_operand.vmem [shape: bf16[128,128], index: 5, kind: output, shape index: {}]  }
   0x1   :  { %s984_s20 = smov 0  }
   0x2 LB: > { %s27_s21 = sadd.s32 1, %s944_s19  ;;  %p751_p0 = scmp.ge.s32.totalorder %s948_s20, 1  ;;  %s948_s20 = sphi %s984_s20, %s15_s20   ;;  %s944_s19 = sphi %s982_s19, %s1103_s19   ;;  %s940_s18 = sphi %s980_s18, %s1102_s18  }
   0x3   : > { %p29_p1 = scmp.ge.s32.totalorder %s27_s21, 2  ;;  %p245_p2 = scmp.lt.s32.totalorder %s948_s20, 3 }
   0x5   : > { %s1105_s21 = smov (%p29_p1, %s27_s21), 0  ;;  %p246_p3 = pnand %p751_p0, %p245_p2 }
   0x6   : > { %s752_s26 = sshll.u32 (!%p246_p3), %s940_s18, 3  ;;  %p303_p4 = scmp.lt.s32.totalorder (!%p246_p3), %s940_s18, 1 }
   0x7   : > { %249 = sbr.rel (%p246_p3) target bundleno = 209 (0xd1), region = 40  ;;  %p297_p5 = scmp.lt.s32.totalorder (!%p246_p3), %s752_s26, 15 }
   0xc   : > { %v834_v0 = vld [vmem:[%s1098_s2 + $0x38] sm:$0xff]  ;;  %v833_v2 = vld [vmem:[%s1098_s2 + $0x30] sm:$0xff]  ;;  %v832_v4 = vld [vmem:[%s1098_s2 + $0x28] sm:$0xff]  ;;  %s1107_s18 = smov (!%p303_p4, %s940_s18), 1  ;;  %s1109_s26 = smov (!%p297_p5, %s752_s26), 15 }
   0xd   : > { %v842_v1 = vld [vmem:[%s1098_s2 + $0x78] sm:$0xff]  ;;  %518 = vmatpush.bf16.msra.mxu0 %v834_v0  ;;  %885 = vmatpush.bf16.msra.mxu2 %v834_v0  ;;  %v841_v3 = vld [vmem:[%s1098_s2 + $0x70] sm:$0xff]  ;;  %v840_v5 = vld [vmem:[%s1098_s2 + $0x68] sm:$0xff]  ;;  %s826_s14 = sshll.u32 %s1109_s26, 3  ;;  %s755_s15 = sshll.u32 %s1107_s18, 1 }
   0xe   : > { %547 = vmatpush.bf16.msra.mxu1 %v842_v1  ;;  %893 = vmatpush.bf16.msra.mxu3 %v842_v1  ;;  %v831_v6 = vld [vmem:[%s1098_s2 + $0x20] sm:$0xff]  ;;  %v830_v8 = vld [vmem:[%s1098_s2 + $0x18] sm:$0xff]  ;;  %s1031_s24 = scalar_lea.vmem %s1096_s0, %s826_s14  ;;  %s306_s28 = scalar_lea.vmem %s1097_s1, %s755_s15  ;;  %v829_v10 = vld [vmem:[%s1098_s2 + $0x10] sm:$0xff] }
   0xf   : > { %v839_v7 = vld [vmem:[%s1098_s2 + $0x60] sm:$0xff]  ;;  %v838_v9 = vld [vmem:[%s1098_s2 + $0x58] sm:$0xff]  ;;  %v334_v13 = vld [vmem:[%s1031_s24 + $0x8] sm:$0xff]  ;;  %s757_s17 = sshll.u32 %s1109_s26, 2 }
  0x10   : > { %v332_v11 = vld [vmem:[%s306_s28] sm:$0x3]  ;;  %v338_v15 = vld [vmem:[%s1031_s24 + $0x28] sm:$0xff]  ;;  %v837_v16 = vld [vmem:[%s1098_s2 + $0x50] sm:$0xff]  ;;  %v343_v20 = vunpack.c.l.bf16 %v334_v13  ;;  %v344_v25 = vunpack.c.h.bf16 %v334_v13  ;;  %s1072_s27 = scalar_lea.vmem %s1100_s4, %s757_s17  ;;  %s1079_s18 = scalar_lea.vmem %s1101_s5, %s757_s17 }
  0x11   : > { %519 = vmatpush.bf16.msra.mxu0 %v833_v2  ;;  %886 = vmatpush.bf16.msra.mxu2 %v833_v2  ;;  %v333_v12 = vld [vmem:[%s1031_s24] sm:$0xff]  ;;  %v358_v18 = vperm.slane %v332_v11, 0  ;;  %v359_v19 = vperm.slane %v332_v11, 1  ;;  %v351_v22 = vunpack.c.l.bf16 %v338_v15  ;;  %v828_v24 = vld [vmem:[%s1098_s2 + $0x8] sm:$0xff]  ;;  %v352_v27 = vunpack.c.h.bf16 %v338_v15  ;;  %v335_v43 = vld [vmem:[%s1031_s24 + $0x10] sm:$0xff] }
  0x12   : > { %548 = vmatpush.bf16.msra.mxu1 %v841_v3  ;;  %894 = vmatpush.bf16.msra.mxu3 %v841_v3  ;;  %v337_v14 = vld [vmem:[%s1031_s24 + $0x20] sm:$0xff]  ;;  %v341_v17 = vunpack.c.l.bf16 %v333_v12  ;;  %v342_v23 = vunpack.c.h.bf16 %v333_v12  ;;  %v836_v28 = vld [vmem:[%s1098_s2 + $0x48] sm:$0xff]  ;;  %v336_v44 = vld [vmem:[%s1031_s24 + $0x18] sm:$0xff]  ;;  %v345_v47 = vunpack.c.l.bf16 %v335_v43  ;;  %v346_v51 = vunpack.c.h.bf16 %v335_v43 }
  0x13   : > { %v349_v21 = vunpack.c.l.bf16 %v337_v14  ;;  %v350_v26 = vunpack.c.h.bf16 %v337_v14  ;;  %v364_v30 = vmul.f32 %v358_v18, %v343_v20  ;;  %v372_v32 = vmul.f32 %v358_v18, %v351_v22  ;;  %v827_v34 = vld [vmem:[%s1098_s2] sm:$0xff]  ;;  %v339_v45 = vld [vmem:[%s1031_s24 + $0x30] sm:$0xff]  ;;  %v340_v46 = vld [vmem:[%s1031_s24 + $0x38] sm:$0xff] }
  0x14   : > { %v362_v29 = vmul.f32 %v358_v18, %v341_v17  ;;  %v363_v33 = vmul.f32 %v359_v19, %v342_v23  ;;  %v365_v35 = vmul.f32 %v359_v19, %v344_v25  ;;  %v373_v37 = vmul.f32 %v359_v19, %v352_v27  ;;  %v835_v38 = vld [vmem:[%s1098_s2 + $0x40] sm:$0xff]  ;;  %v880_v17 = vld [vmem:[%s1072_s27 + $0x10] sm:$0xff]  }
  0x15   : > { %520 = vmatpush.bf16.msra.mxu0 %v832_v4  ;;  %887 = vmatpush.bf16.msra.mxu2 %v832_v4  ;;  %v370_v31 = vmul.f32 %v358_v18, %v349_v21  ;;  %v371_v36 = vmul.f32 %v359_v19, %v350_v26  ;;  %v347_v48 = vunpack.c.l.bf16 %v336_v44  ;;  %v353_v49 = vunpack.c.l.bf16 %v339_v45  ;;  %v925_v4 = vld [vmem:[%s1099_s3] ss:$0 sm:$0xff] }
  0x16   : > { %549 = vmatpush.bf16.msra.mxu1 %v840_v5  ;;  %895 = vmatpush.bf16.msra.mxu3 %v840_v5  ;;  %v378_v39 = vpack.c.bf16 %v364_v30, %v362_v29  ;;  %v379_v41 = vpack.c.bf16 %v365_v35, %v363_v33  ;;  %v355_v50 = vunpack.c.l.bf16 %v340_v46  ;;  %v348_v52 = vunpack.c.h.bf16 %v336_v44  ;;  %v879_v35 = vld [vmem:[%s1072_s27 + $0x8] sm:$0xff]  }
  0x17   : > { %v382_v40 = vpack.c.bf16 %v372_v32, %v370_v31  ;;  %v383_v42 = vpack.c.bf16 %v373_v37, %v371_v36  ;;  %v354_v53 = vunpack.c.h.bf16 %v339_v45  ;;  %v356_v54 = vunpack.c.h.bf16 %v340_v46  ;;  %v881_v45 = vld [vmem:[%s1072_s27 + $0x18] sm:$0xff]  }
  0x18   : > { %v366_v55 = vmul.f32 %v358_v18, %v345_v47  ;;  %v368_v56 = vmul.f32 %v358_v18, %v347_v48  ;;  %v374_v57 = vmul.f32 %v358_v18, %v353_v49  ;;  %v376_v58 = vmul.f32 %v358_v18, %v355_v50 }
  0x19   : > { %521 = vmatpush.bf16.msra.mxu0 %v831_v6  ;;  %888 = vmatpush.bf16.msra.mxu2 %v831_v6  ;;  %v367_v59 = vmul.f32 %v359_v19, %v346_v51  ;;  %v369_v60 = vmul.f32 %v359_v19, %v348_v52  ;;  %v375_v61 = vmul.f32 %v359_v19, %v354_v53  ;;  %v853_v21 = vunpack.c.l.bf16 %v880_v17 }
  0x1a   : > { %550 = vmatpush.bf16.msra.mxu1 %v839_v7  ;;  %896 = vmatpush.bf16.msra.mxu3 %v839_v7  ;;  %v377_v62 = vmul.f32 %v359_v19, %v356_v54  ;;  %v380_v63 = vpack.c.bf16 %v368_v56, %v366_v55  ;;  %v384_v0 = vpack.c.bf16 %v376_v58, %v374_v57  ;;  %v844_v7 = vld [vmem:[%s1072_s27] sm:$0xff]   ;;  %v854_v27 = vunpack.c.h.bf16 %v880_v17 }
  0x1b   : > { %v381_v1 = vpack.c.bf16 %v369_v60, %v367_v59  ;;  %v845_v12 = vunpack.c.l.bf16 %v844_v7  ;;  %v846_v15 = vunpack.c.h.bf16 %v844_v7  ;;  %v857_v49 = vunpack.c.l.bf16 %v881_v45 }
  0x1c   : > { %v385_v2 = vpack.c.bf16 %v377_v62, %v375_v61  ;;  %v858_v54 = vunpack.c.h.bf16 %v881_v45 }
  0x1d   : > { %522 = vmatpush.bf16.msra.mxu0 %v830_v8  ;;  %889 = vmatpush.bf16.msra.mxu2 %v830_v8 }
  0x1e   : > { %551 = vmatpush.bf16.msra.mxu1 %v838_v9  ;;  %897 = vmatpush.bf16.msra.mxu3 %v838_v9 }
  0x21   : > { %523 = vmatpush.bf16.msra.mxu0 %v829_v10  ;;  %890 = vmatpush.bf16.msra.mxu2 %v829_v10 }
  0x22   : > { %552 = vmatpush.bf16.msra.mxu1 %v837_v16  ;;  %898 = vmatpush.bf16.msra.mxu3 %v837_v16 }
  0x25   : > { %524 = vmatpush.bf16.msra.mxu0 %v828_v24  ;;  %891 = vmatpush.bf16.msra.mxu2 %v828_v24 }
  0x26   : > { %553 = vmatpush.bf16.msra.mxu1 %v836_v28  ;;  %899 = vmatpush.bf16.msra.mxu3 %v836_v28 }
  0x29   : > { %525 = vmatpush.bf16.msra.mxu0 %v827_v34  ;;  %892 = vmatpush.bf16.msra.mxu2 %v827_v34 }
  0x2a   : > { %554 = vmatpush.bf16.msra.mxu1 %v835_v38  ;;  %900 = vmatpush.bf16.msra.mxu3 %v835_v38 }
  0x2c   : > { %526 = vmatmul.bf16.vlgmr.msra.gmra.mxu0 %v378_v39  ;;  %536 = vmatmul.bf16.vlgmr.msra.gmra.mxu2 %v382_v40  ;;  %v849_v40 = vunpack.c.l.bf16 %v879_v35 }
  0x2d   : > { %555 = vmatmul.bf16.vlgmr.msra.gmra.mxu1 %v379_v41  ;;  %565 = vmatmul.bf16.vlgmr.msra.gmra.mxu3 %v383_v42  ;;  %v850_v42 = vunpack.c.h.bf16 %v879_v35 }
  0x3c   : > { %531 = vmatmul.bf16.gmra.mxu0 %v380_v63  ;;  %541 = vmatmul.bf16.gmra.mxu2 %v384_v0 }
  0x3d   : > { %560 = vmatmul.bf16.gmra.mxu1 %v381_v1  ;;  %570 = vmatmul.bf16.gmra.mxu3 %v385_v2 }
  0xa9   : > { %v527_v3 = vpop.f32.mrf.mxu0 }
  0xaa   : > { %v556_v5 = vpop.f32.mrf.mxu1  ;;  %v528_v6 = vadd.f32 %v925_v4, %v527_v3 }
  0xac   : > { %v557_v11 = vadd.f32 %v556_v5, %v528_v6 }
  0xae   : > { %v592_v19 = vadd.f32 %v845_v12, %v557_v11 }
  0xaf   : > { %v537_v8 = vpop.f32.mrf.mxu2 }
  0xb0   : > { %v566_v9 = vpop.f32.mrf.mxu3  ;;  %v538_v16 = vadd.f32 %v925_v4, %v537_v8 }
  0xb1   : > { %v529_v10 = vpop.f32.mrf.mxu0 }
  0xb2   : > { %v530_v13 = vadd.f32 %v925_v4, %v529_v10  ;;  %v558_v14 = vpop.f32.mrf.mxu1  ;;  %v567_v23 = vadd.f32 %v566_v9, %v538_v16 }
  0xb4   : > { %v559_v18 = vadd.f32 %v558_v14, %v530_v13  ;;  %v596_v31 = vadd.f32 %v853_v21, %v567_v23 }
  0xb6   : > { %v593_v20 = vadd.f32 %v846_v15, %v559_v18 }
  0xb7   : > { %v539_v22 = vpop.f32.mrf.mxu2 }
  0xb8   : > { %v862_v24 = vpack.c.bf16 %v593_v20, %v592_v19  ;;  %v540_v25 = vadd.f32 %v925_v4, %v539_v22  ;;  %v568_v26 = vpop.f32.mrf.mxu3 }
  0xb9   : > { %v532_v28 = vpop.f32.mrf.mxu0 }
  0xba   : > { %863 = vst [vmem:[%s1079_s18] sm:$0xff] %v862_v24   ;;  %v569_v29 = vadd.f32 %v568_v26, %v540_v25  ;;  %v561_v30 = vpop.f32.mrf.mxu1  ;;  %v533_v34 = vadd.f32 %v925_v4, %v532_v28 }
  0xbc   : > { %v597_v32 = vadd.f32 %v854_v27, %v569_v29  ;;  %v562_v39 = vadd.f32 %v561_v30, %v533_v34 }
  0xbe   : > { %v872_v33 = vpack.c.bf16 %v597_v32, %v596_v31  ;;  %v594_v47 = vadd.f32 %v849_v40, %v562_v39 }
  0xbf   : > { %v542_v36 = vpop.f32.mrf.mxu2 }
  0xc0   : > { %883 = vst [vmem:[%s1079_s18 + $0x10] sm:$0xff] %v872_v33   ;;  %v571_v37 = vpop.f32.mrf.mxu3  ;;  %v543_v44 = vadd.f32 %v925_v4, %v542_v36 }
  0xc1   : > { %v534_v38 = vpop.f32.mrf.mxu0 }
  0xc2   : > { %v535_v41 = vadd.f32 %v925_v4, %v534_v38  ;;  %v563_v43 = vpop.f32.mrf.mxu1  ;;  %v572_v51 = vadd.f32 %v571_v37, %v543_v44 }
  0xc4   : > { %v564_v46 = vadd.f32 %v563_v43, %v535_v41  ;;  %v598_v57 = vadd.f32 %v857_v49, %v572_v51 }
  0xc6   : > { %v595_v48 = vadd.f32 %v850_v42, %v564_v46 }
  0xc7   : > { %v544_v50 = vpop.f32.mrf.mxu2 }
  0xc8   : > { %v867_v52 = vpack.c.bf16 %v595_v48, %v594_v47  ;;  %v545_v53 = vadd.f32 %v925_v4, %v544_v50  ;;  %v573_v55 = vpop.f32.mrf.mxu3 }
  0xca   : > { %882 = vst [vmem:[%s1079_s18 + $0x8] sm:$0xff] %v867_v52   ;;  %v574_v56 = vadd.f32 %v573_v55, %v545_v53 }
  0xcc   : > { %v599_v58 = vadd.f32 %v858_v54, %v574_v56 }
  0xce   : > { %v877_v59 = vpack.c.bf16 %v599_v58, %v598_v57 }
  0xd0   : > { %884 = vst [vmem:[%s1079_s18 + $0x18] sm:$0xff] %v877_v59  }
  0xd1 PF: > { %s15_s20 = sadd.s32 1, %s948_s20   ;;  %s1102_s18 = smov %s944_s19 }
  0xd2   : > { %p12_p6 = scmp.ge.s32.totalorder %s15_s20, 4   ;;  %s1103_s19 = smov %s1105_s21 }
  0xd4   :  { %14 = sbr.rel (!%p12_p6) target bundleno = 2 (0x2), region = 82 }

// kernel: efficientnet_b3_forward.20
= control target key start
LH: loop header
LB: loop body
LE: loop exit
PB: predicated region body
PF: predicated region fallthrough
CT: control target
= control target key end

     0   :  { %s1028_s12 = smov 0   ;;  %s1616_s0 = inlined_call_operand.vmem [shape: bf16[128,128], index: 0, kind: input, shape index: {}]   ;;  %s1617_s1 = inlined_call_operand.vmem [shape: bf16[128,256], index: 1, kind: input, shape index: {}]   ;;  %s1618_s2 = inlined_call_operand.vmem [shape: f32[1,256], index: 2, kind: input, shape index: {}]   ;;  %s1619_s3 = inlined_call_operand.vmem [shape: f32[2,1,256], index: 3, kind: output, shape index: {}]  }
   0x1 LB: > { %s1034_s13 = sadd.s32 4294967295, %s1005_s12   ;;  %p786_p0 = scmp.ge.s32.totalorder %s1005_s12, 1  ;;  %s1005_s12 = sphi %s1028_s12, %s13_s12  }
   0x2   : > { %p138_p1 = scmp.lt.s32.totalorder %s1005_s12, 3 }
   0x4   : > { %p139_p2 = pnand %p786_p0, %p138_p1 }
   0x5   : > { %s787_s29 = sshll.u32 (!%p139_p2), %s1034_s13, 3  ;;  %p167_p4 = scmp.lt.s32.totalorder (!%p139_p2), %s1034_s13, 1 }
   0x6   : > { %142 = sbr.rel (%p139_p2) target bundleno = 279 (0x117), region = 32  ;;  %p162_p3 = scmp.lt.s32.totalorder (!%p139_p2), %s787_s29, 15 }
   0xb   : > { %v864_v0 = vld [vmem:[%s1617_s1 + $0x70] sm:$0xf]  ;;  %v907_v1 = vld [vmem:[%s1617_s1 + $0x74] sm:$0xf0]  ;;  %v906_v2 = vld [vmem:[%s1617_s1 + $0x74] sm:$0xf] }
   0xc   : > { %v865_v3 = vor.u32 %v907_v1, %v864_v0  ;;  %v866_v4 = vld [vmem:[%s1617_s1 + $0x78] sm:$0xf0]  ;;  %v856_v5 = vld [vmem:[%s1617_s1 + $0x60] sm:$0xf]  ;;  %v905_v6 = vld [vmem:[%s1617_s1 + $0x64] sm:$0xf0] }
   0xd   : > { %v869_v7 = vor.u32 %v906_v2, %v866_v4  ;;  %v904_v8 = vld [vmem:[%s1617_s1 + $0x64] sm:$0xf]  ;;  %v858_v9 = vld [vmem:[%s1617_s1 + $0x68] sm:$0xf0]  ;;  %v857_v10 = vor.u32 %v905_v6, %v856_v5  ;;  %v848_v12 = vld [vmem:[%s1617_s1 + $0x50] sm:$0xf] }
   0xe   : > { %305 = vmatpush.bf16.msra.mxu0 %v865_v3  ;;  %908 = vmatpush.bf16.msra.mxu2 %v865_v3  ;;  %v861_v11 = vor.u32 %v904_v8, %v858_v9  ;;  %v903_v13 = vld [vmem:[%s1617_s1 + $0x54] sm:$0xf0]  ;;  %v902_v14 = vld [vmem:[%s1617_s1 + $0x54] sm:$0xf]  ;;  %v850_v15 = vld [vmem:[%s1617_s1 + $0x58] sm:$0xf0] }
   0xf   : > { %334 = vmatpush.bf16.msra.mxu1 %v869_v7  ;;  %916 = vmatpush.bf16.msra.mxu3 %v869_v7  ;;  %v849_v16 = vor.u32 %v903_v13, %v848_v12  ;;  %v853_v17 = vor.u32 %v902_v14, %v850_v15  ;;  %v840_v18 = vld [vmem:[%s1617_s1 + $0x40] sm:$0xf]  ;;  %v901_v19 = vld [vmem:[%s1617_s1 + $0x44] sm:$0xf0]  ;;  %v900_v20 = vld [vmem:[%s1617_s1 + $0x44] sm:$0xf] }
  0x10   : > { %v842_v21 = vld [vmem:[%s1617_s1 + $0x48] sm:$0xf0]  ;;  %v841_v22 = vor.u32 %v901_v19, %v840_v18  ;;  %v832_v24 = vld [vmem:[%s1617_s1 + $0x30] sm:$0xf]  ;;  %v899_v25 = vld [vmem:[%s1617_s1 + $0x34] sm:$0xf0] }
  0x11   : > { %v845_v23 = vor.u32 %v900_v20, %v842_v21  ;;  %v898_v26 = vld [vmem:[%s1617_s1 + $0x34] sm:$0xf]  ;;  %v834_v27 = vld [vmem:[%s1617_s1 + $0x38] sm:$0xf0]  ;;  %v833_v28 = vor.u32 %v899_v25, %v832_v24  ;;  %v824_v30 = vld [vmem:[%s1617_s1 + $0x20] sm:$0xf] }
  0x12   : > { %306 = vmatpush.bf16.msra.mxu0 %v857_v10  ;;  %909 = vmatpush.bf16.msra.mxu2 %v857_v10  ;;  %v837_v29 = vor.u32 %v898_v26, %v834_v27  ;;  %v897_v31 = vld [vmem:[%s1617_s1 + $0x24] sm:$0xf0]  ;;  %v896_v32 = vld [vmem:[%s1617_s1 + $0x24] sm:$0xf]  ;;  %v826_v33 = vld [vmem:[%s1617_s1 + $0x28] sm:$0xf0] }
  0x13   : > { %335 = vmatpush.bf16.msra.mxu1 %v861_v11  ;;  %917 = vmatpush.bf16.msra.mxu3 %v861_v11  ;;  %v825_v34 = vor.u32 %v897_v31, %v824_v30  ;;  %v829_v35 = vor.u32 %v896_v32, %v826_v33  ;;  %v816_v36 = vld [vmem:[%s1617_s1 + $0x10] sm:$0xf]  ;;  %v895_v37 = vld [vmem:[%s1617_s1 + $0x14] sm:$0xf0]  ;;  %s1661_s29 = smov (!%p162_p3, %s787_s29), 15  ;;  %s1663_s13 = smov (!%p167_p4, %s1034_s13), 1 }
  0x14   : > { %v894_v38 = vld [vmem:[%s1617_s1 + $0x14] sm:$0xf]  ;;  %v818_v39 = vld [vmem:[%s1617_s1 + $0x18] sm:$0xf0]  ;;  %v817_v40 = vor.u32 %v895_v37, %v816_v36  ;;  %v808_v42 = vld [vmem:[%s1617_s1] sm:$0xf] }
  0x15   : > { %v821_v41 = vor.u32 %v894_v38, %v818_v39  ;;  %v893_v43 = vld [vmem:[%s1617_s1 + $0x4] sm:$0xf0]  ;;  %s788_s25 = sshll.u32 %s1661_s29, 2  ;;  %v892_v44 = vld [vmem:[%s1617_s1 + $0x4] sm:$0xf]  ;;  %s789_s8 = sshll.u32 %s1663_s13, 1 }
  0x16   : > { %307 = vmatpush.bf16.msra.mxu0 %v849_v16  ;;  %910 = vmatpush.bf16.msra.mxu2 %v849_v16  ;;  %v810_v45 = vld [vmem:[%s1617_s1 + $0x8] sm:$0xf0]  ;;  %v809_v46 = vor.u32 %v893_v43, %v808_v42  ;;  %s165_s6 = scalar_lea.vmem %s1616_s0, %s788_s25  ;;  %v195_v52 = vld [vmem:[%s1618_s2] sm:$0x3]  ;;  %s170_s11 = scalar_lea.vmem %s1619_s3, %s789_s8 }
  0x17   : > { %336 = vmatpush.bf16.msra.mxu1 %v853_v17  ;;  %918 = vmatpush.bf16.msra.mxu3 %v853_v17  ;;  %v813_v47 = vor.u32 %v892_v44, %v810_v45  ;;  %v888_v48 = vld [vmem:[%s165_s6] sm:$0xff]  ;;  %v890_v49 = vld [vmem:[%s165_s6 + $0x10] sm:$0xff]  ;;  %v889_v50 = vld [vmem:[%s165_s6 + $0x8] sm:$0xff]  ;;  %v1141_v53 = vperm.slane %v195_v52, 0  ;;  %v1143_v55 = vperm.slane %v195_v52, 1 }
  0x18   : > { %v891_v51 = vld [vmem:[%s165_s6 + $0x18] sm:$0xff] }
  0x1a   : > { %308 = vmatpush.bf16.msra.mxu0 %v841_v22  ;;  %911 = vmatpush.bf16.msra.mxu2 %v841_v22 }
  0x1b   : > { %337 = vmatpush.bf16.msra.mxu1 %v845_v23  ;;  %919 = vmatpush.bf16.msra.mxu3 %v845_v23 }
  0x1e   : > { %309 = vmatpush.bf16.msra.mxu0 %v833_v28  ;;  %912 = vmatpush.bf16.msra.mxu2 %v833_v28 }
  0x1f   : > { %338 = vmatpush.bf16.msra.mxu1 %v837_v29  ;;  %920 = vmatpush.bf16.msra.mxu3 %v837_v29 }
  0x22   : > { %310 = vmatpush.bf16.msra.mxu0 %v825_v34  ;;  %913 = vmatpush.bf16.msra.mxu2 %v825_v34 }
  0x23   : > { %339 = vmatpush.bf16.msra.mxu1 %v829_v35  ;;  %921 = vmatpush.bf16.msra.mxu3 %v829_v35 }
  0x26   : > { %311 = vmatpush.bf16.msra.mxu0 %v817_v40  ;;  %914 = vmatpush.bf16.msra.mxu2 %v817_v40 }
  0x27   : > { %340 = vmatpush.bf16.msra.mxu1 %v821_v41  ;;  %922 = vmatpush.bf16.msra.mxu3 %v821_v41 }
  0x2a   : > { %312 = vmatpush.bf16.msra.mxu0 %v809_v46  ;;  %915 = vmatpush.bf16.msra.mxu2 %v809_v46 }
  0x2b   : > { %341 = vmatpush.bf16.msra.mxu1 %v813_v47  ;;  %923 = vmatpush.bf16.msra.mxu3 %v813_v47 }
  0x2d   : > { %313 = vmatmul.bf16.vlgmr.msra.gmra.mxu0 %v888_v48  ;;  %323 = vmatmul.bf16.vlgmr.msra.gmra.mxu2 %v890_v49 }
  0x2e   : > { %342 = vmatmul.bf16.vlgmr.msra.gmra.mxu1 %v888_v48  ;;  %352 = vmatmul.bf16.vlgmr.msra.gmra.mxu3 %v890_v49 }
  0x3d   : > { %318 = vmatmul.bf16.gmra.mxu0 %v889_v50  ;;  %328 = vmatmul.bf16.gmra.mxu2 %v891_v51 }
  0x3e   : > { %347 = vmatmul.bf16.gmra.mxu1 %v889_v50  ;;  %357 = vmatmul.bf16.gmra.mxu3 %v891_v51 }
  0xaa   : > { %v314_v54 = vpop.f32.mrf.mxu0 }
  0xab   : > { %v343_v56 = vpop.f32.mrf.mxu1  ;;  %v1146_v57 = vadd.f32 %v314_v54, %v1141_v53 }
  0xac   : > { %v1149_v58 = vadd.f32 %v343_v56, %v1143_v55 }
  0xad   : > { %v870_v62 = vmul.f32 -1.442695, %v1146_v57 }
  0xae   : > { %v871_v0 = vmul.f32 -1.442695, %v1149_v58 }
  0xaf   : > { %933 = vpow2.f32 %v870_v62 }
  0xb0   : > { %v324_v59 = vpop.f32.mrf.mxu2  ;;  %935 = vpow2.f32 %v871_v0 }
  0xb1   : > { %v1152_v60 = vadd.f32 %v324_v59, %v1141_v53  ;;  %v353_v61 = vpop.f32.mrf.mxu3 }
  0xb2   : > { %v316_v63 = vpop.f32.mrf.mxu0  ;;  %v1161_v4 = vadd.f32 %v353_v61, %v1143_v55 }
  0xb3   : > { %v1157_v1 = vadd.f32 %v316_v63, %v1141_v53  ;;  %v345_v2 = vpop.f32.mrf.mxu1  ;;  %v878_v3 = vmul.f32 -1.442695, %v1152_v60 }
  0xb4   : > { %v1164_v5 = vadd.f32 %v345_v2, %v1143_v55  ;;  %v879_v8 = vmul.f32 -1.442695, %v1161_v4 }
  0xb5   : > { %v872_v6 = vmul.f32 -1.442695, %v1157_v1  ;;  %937 = vpow2.f32 %v878_v3  ;;  %v934_v10 = vpop.eup %933 }
  0xb6   : > { %v873_v7 = vmul.f32 -1.442695, %v1164_v5  ;;  %v936_v11 = vpop.eup %935  ;;  %v1172_v14 = vadd.f32 1.0, %v934_v10 }
  0xb7   : > { %939 = vpow2.f32 %v872_v6  ;;  %v1174_v16 = vadd.f32 1.0, %v936_v11 }
  0xb8   : > { %941 = vpow2.f32 %v873_v7  ;;  %v326_v9 = vpop.f32.mrf.mxu2  ;;  %v438_v30 = vand.u32 2147483648, %v1172_v14  ;;  %v436_v38 = vand.u32 2147483647, %v1172_v14  ;;  %vm432_vm1 = vweird.f32 %v1172_v14 }
  0xb9   : > { %943 = vpow2.f32 %v879_v8  ;;  %v1170_v13 = vadd.f32 %v326_v9, %v1141_v53  ;;  %v355_v26 = vpop.f32.mrf.mxu3  ;;  %v453_v33 = vand.u32 2147483648, %v1174_v16  ;;  %v451_v43 = vand.u32 2147483647, %v1174_v16 }
  0xba   : > { %945 = vrcp.f32 %v1172_v14  ;;  %v319_v24 = vpop.f32.mrf.mxu0  ;;  %v1206_v34 = vadd.f32 %v355_v26, %v1143_v55  ;;  %v1216_v41 = vor.u32 1.1754944e-38, %v438_v30  ;;  %vm447_vm3 = vweird.f32 %v1174_v16 }
  0xbb   : > { %v938_v12 = vpop.eup %937  ;;  %v880_v20 = vmul.f32 -1.442695, %v1170_v13  ;;  %947 = vrcp.f32 %v1174_v16  ;;  %v348_v25 = vpop.f32.mrf.mxu1  ;;  %v1194_v28 = vadd.f32 %v319_v24, %v1141_v53  ;;  %v1224_v47 = vor.u32 1.1754944e-38, %v453_v33 }
  0xbc   : > { %v1176_v18 = vadd.f32 1.0, %v938_v12  ;;  %v1200_v31 = vadd.f32 %v348_v25, %v1143_v55  ;;  %v881_v50 = vmul.f32 -1.442695, %v1206_v34  ;;  %vm1265_vm5 = vcmp.eq.f32.partialorder %v436_v38, 8.507059e+37 }
  0xbd   : > { %v940_v15 = vpop.eup %939  ;;  %v874_v39 = vmul.f32 -1.442695, %v1194_v28  ;;  %vm1275_vm7 = vcmp.eq.f32.partialorder %v451_v43, 8.507059e+37 }
  0xbe   : > { %v942_v17 = vpop.eup %941  ;;  %v1180_v21 = vadd.f32 1.0, %v940_v15  ;;  %949 = vrcp.f32 %v1176_v18  ;;  %v875_v44 = vmul.f32 -1.442695, %v1200_v31  ;;  %v556_v49 = vand.u32 2147483647, %v1176_v18 }
  0xbf   : > { %v944_v19 = vpop.eup %943  ;;  %v1183_v22 = vadd.f32 1.0, %v942_v17  ;;  %951 = vpow2.f32 %v880_v20  ;;  %v558_v54 = vand.u32 2147483648, %v1176_v18  ;;  %vm552_vm4 = vweird.f32 %v1176_v18 }
  0xc0   : > { %v1186_v23 = vadd.f32 1.0, %v944_v19  ;;  %953 = vrcp.f32 %v1180_v21  ;;  %v1190_v27 = vpop.eup %945  ;;  %v329_v45 = vpop.f32.mrf.mxu2  ;;  %vm462_vm6 = vweird.f32 %v1180_v21  ;;  %vm1284_vm9 = vcmp.eq.f32.partialorder %v556_v49, 8.507059e+37 }
  0xc1   : > { %955 = vrcp.f32 %v1183_v22  ;;  %v1196_v29 = vpop.eup %947  ;;  %v428_v36 = vmul.f32 %v1190_v27, %v1172_v14  ;;  %vm433_vm0 = vweird.f32 %v1190_v27  ;;  %v1239_v63 = vadd.f32 %v329_v45, %v1141_v53  ;;  %v358_v0 = vpop.f32.mrf.mxu3 }
  0xc2   : > { %957 = vrcp.f32 %v1186_v23  ;;  %v443_v42 = vmul.f32 %v1196_v29, %v1174_v16  ;;  %v321_v51 = vpop.f32.mrf.mxu0  ;;  %vm448_vm2 = vweird.f32 %v1196_v29  ;;  %v573_v8 = vand.u32 2147483648, %v1186_v23  ;;  %vm1301_vm11 = vmor %vm432_vm1, %vm433_vm0 }
  0xc3   : > { %v429_v52 = vsub.f32 1.0, %v428_v36  ;;  %v350_v61 = vpop.f32.mrf.mxu1  ;;  %959 = vpow2.f32 %v874_v39  ;;  %v1246_v6 = vadd.f32 %v321_v51, %v1141_v53  ;;  %v882_v9 = vmul.f32 -1.442695, %v1239_v63  ;;  %vm1322_vm15 = vmor %vm447_vm3, %vm448_vm2 }
  0xc4   : > { %v1202_v32 = vpop.eup %949  ;;  %v444_v2 = vsub.f32 1.0, %v443_v42  ;;  %961 = vpow2.f32 %v875_v44  ;;  %v1251_v10 = vadd.f32 %v350_v61, %v1143_v55  ;;  %v1257_v15 = vadd.f32 %v358_v0, %v1143_v55 }
  0xc5   : > { %v952_v35 = vpop.eup %951  ;;  %v548_v48 = vmul.f32 %v1202_v32, %v1176_v18  ;;  %v430_v11 = vmul.f32 %v1190_v27, %v429_v52  ;;  %v1260_v17 = vor.u32 1.1754944e-38, %v558_v54  ;;  %v876_v20 = vmul.f32 -1.442695, %v1246_v6 }
  0xc6   : > { %v1210_v37 = vpop.eup %953  ;;  %v1233_v59 = vadd.f32 1.0, %v952_v35  ;;  %v445_v24 = vmul.f32 %v1196_v29, %v444_v2  ;;  %v571_v26 = vand.u32 2147483647, %v1186_v23  ;;  %v1270_v36 = vor.u32 1.1754944e-38, %v573_v8 }
  0xc7   : > { %v1214_v40 = vpop.eup %955  ;;  %v458_v56 = vmul.f32 %v1210_v37, %v1180_v21  ;;  %v549_v7 = vsub.f32 1.0, %v548_v48  ;;  %v877_v39 = vmul.f32 -1.442695, %v1251_v10  ;;  %v431_v44 = vadd.f32 %v1190_v27, %v430_v11 }
  0xc8   : > { %v1222_v46 = vpop.eup %957  ;;  %v473_v62 = vmul.f32 %v1214_v40, %v1183_v22  ;;  %963 = vrcp.f32 %v1233_v59  ;;  %vm567_vm8 = vweird.f32 %v1186_v23  ;;  %v466_v52 = vand.u32 2147483647, %v1180_v21 }
  0xc9   : > { %v563_v3 = vmul.f32 %v1222_v46, %v1186_v23  ;;  %v459_v12 = vsub.f32 1.0, %v458_v56  ;;  %965 = vpow2.f32 %v881_v50  ;;  %v960_v30 = vpop.eup %959  ;;  %v550_v35 = vmul.f32 %v1202_v32, %v549_v7 }
  0xca   : > { %v474_v19 = vsub.f32 1.0, %v473_v62  ;;  %967 = vpow2.f32 %v882_v9  ;;  %v962_v42 = vpop.eup %961  ;;  %v1281_v48 = vadd.f32 1.0, %v960_v30  ;;  %v883_v50 = vmul.f32 -1.442695, %v1257_v15 }
  0xcb   : > { %v564_v25 = vsub.f32 1.0, %v563_v3  ;;  %v460_v38 = vmul.f32 %v1210_v37, %v459_v12  ;;  %v468_v54 = vand.u32 2147483648, %v1180_v21  ;;  %969 = vpow2.f32 %v876_v20 }
  0xcc   : > { %v475_v43 = vmul.f32 %v1214_v40, %v474_v19  ;;  %v446_v61 = vadd.f32 %v1196_v29, %v445_v24  ;;  %vm553_vm10 = vweird.f32 %v1202_v32  ;;  %971 = vrcp.f32 %v1281_v48 }
  0xcd   : > { %v565_v62 = vmul.f32 %v1222_v46, %v564_v25  ;;  %v551_v2 = vadd.f32 %v1202_v32, %v550_v35  ;;  %vm568_vm12 = vweird.f32 %v1222_v46  ;;  %v1307_v3 = vadd.f32 1.0, %v962_v42  ;;  %vm1337_vm1 = vmor %vm552_vm4, %vm553_vm10 }
  0xce   : > { %v1291_v56 = vpop.eup %963  ;;  %973 = vpow2.f32 %v877_v39  ;;  %v435_v8 = vsel %vm1301_vm11, %v1190_v27, %v431_v44  ;;  %vm1312_vm13 = vcmp.eq.f32.partialorder %v571_v26, 8.507059e+37  ;;  %v461_v14 = vadd.f32 %v1210_v37, %v460_v38 }
  0xcf   : > { %v966_v49 = vpop.eup %965  ;;  %vm463_vm14 = vweird.f32 %v1210_v37  ;;  %975 = vpow2.f32 %v883_v50  ;;  %v476_v12 = vadd.f32 %v1214_v40, %v475_v43  ;;  %vm478_vm0 = vweird.f32 %v1214_v40 }
  0xd0   : > { %v968_v7 = vpop.eup %967  ;;  %v481_v27 = vand.u32 2147483647, %v1183_v22  ;;  %977 = vrcp.f32 %v1307_v3  ;;  %v450_v19 = vsel %vm1322_vm15, %v1196_v29, %v446_v61  ;;  %v566_v20 = vadd.f32 %v1222_v46, %v565_v62  ;;  %vm1350_vm2 = vmor %vm462_vm6, %vm463_vm14 }
  0xd1   : > { %v483_v24 = vand.u32 2147483648, %v1183_v22  ;;  %v1343_v25 = vadd.f32 1.0, %v966_v49  ;;  %v970_v26 = vpop.eup %969  ;;  %v555_v30 = vsel %vm1337_vm1, %v1202_v32, %v551_v2  ;;  %vm477_vm3 = vweird.f32 %v1183_v22 }
  0xd2   : > { %v578_v18 = vmul.f32 %v1291_v56, %v1233_v59  ;;  %v1357_v35 = vadd.f32 1.0, %v968_v7  ;;  %v1359_v39 = vpop.eup %971  ;;  %v440_v42 = vsel %vm1265_vm5, %v1216_v41, %v435_v8  ;;  %v465_v21 = vsel %vm1350_vm2, %v1210_v37, %v461_v14  ;;  %vm1369_vm6 = vmor %vm477_vm3, %vm478_vm0  ;;  %v331_v14 = vpop.f32.mrf.mxu2 }
  0xd3   : > { %vm467_vm4 = vcmp.eq.f32.partialorder %v466_v52, 8.507059e+37  ;;  %v469_v32 = vor.u32 1.1754944e-38, %v468_v54  ;;  %v455_v38 = vsel %vm1275_vm7, %v1224_v47, %v450_v19  ;;  %vm1380_vm5 = vmor %vm567_vm8, %vm568_vm12  ;;  %v480_v37 = vsel %vm1369_vm6, %v1214_v40, %v476_v12  ;;  %v360_v19 = vpop.f32.mrf.mxu3 }
  0xd4   : > { %v974_v44 = vpop.eup %973  ;;  %vm482_vm10 = vcmp.eq.f32.partialorder %v481_v27, 8.507059e+37  ;;  %v488_v33 = vmul.f32 %v1359_v39, %v1281_v48  ;;  %v560_v47 = vsel %vm1284_vm9, %v1260_v17, %v555_v30  ;;  %v570_v23 = vsel %vm1380_vm5, %v1222_v46, %v566_v20 }
  0xd5   : > { %v976_v50 = vpop.eup %975  ;;  %v484_v45 = vor.u32 1.1754944e-38, %v483_v24  ;;  %979 = vrcp.f32 %v1343_v25  ;;  %v470_v54 = vsel %vm467_vm4, %v469_v32, %v465_v21  ;;  %v579_v40 = vsub.f32 1.0, %v578_v18 }
  0xd6   : > { %v1396_v52 = vpop.eup %977  ;;  %981 = vrcp.f32 %v1357_v35  ;;  %v1399_v43 = vadd.f32 1.0, %v970_v26  ;;  %v489_v62 = vsub.f32 1.0, %v488_v33  ;;  %v1403_v51 = vadd.f32 1.0, %v974_v44 }
  0xd7   : > { %v485_v61 = vsel %vm482_vm10, %v484_v45, %v480_v37  ;;  %v503_v17 = vmul.f32 %v1396_v52, %v1307_v3  ;;  %v667_v46 = vmul.f32 %v440_v42, %v1146_v57  ;;  %v575_v49 = vsel %vm1312_vm13, %v1270_v36, %v570_v23 }
  0xd8   : > { %v1409_v0 = vadd.f32 1.0, %v976_v50  ;;  %v668_v2 = vmul.f32 %v455_v38, %v1149_v58  ;;  %v669_v7 = vmul.f32 %v470_v54, %v1157_v1  ;;  %v588_v8 = vand.u32 2147483648, %v1233_v59 }
  0xd9   : > { %983 = vrcp.f32 %v1399_v43  ;;  %v1416_v11 = vmul.f32 %v560_v47, %v1152_v60  ;;  %v670_v57 = vmul.f32 %v485_v61, %v1164_v5  ;;  %v580_v12 = vmul.f32 %v1291_v56, %v579_v40 }
  0xda   : > { %v586_v36 = vand.u32 2147483647, %v1233_v59  ;;  %v1424_v58 = vmul.f32 %v575_v49, %v1161_v4  ;;  %v490_v1 = vmul.f32 %v1359_v39, %v489_v62  ;;  %v504_v27 = vsub.f32 1.0, %v503_v17 }
  0xdb   : > { %v1421_v9 = vpop.eup %979  ;;  %985 = vrcp.f32 %v1403_v51  ;;  %v496_v60 = vand.u32 2147483647, %v1281_v48  ;;  %v498_v5 = vand.u32 2147483648, %v1281_v48  ;;  %v1434_v20 = vadd.f32 %v331_v14, %v1141_v53 }
  0xdc   : > { %v1428_v16 = vpop.eup %981  ;;  %987 = vrcp.f32 %v1409_v0  ;;  %v1436_v24 = vadd.f32 %v669_v7, %v667_v46  ;;  %v1438_v4 = vor.u32 1.1754944e-38, %v588_v8  ;;  %v511_v26 = vand.u32 2147483647, %v1307_v3 }
  0xdd   : > { %v513_v30 = vand.u32 2147483648, %v1307_v3  ;;  %v1442_v29 = vadd.f32 %v670_v57, %v668_v2  ;;  %v1445_v18 = vadd.f32 %v1291_v56, %v580_v12  ;;  %v593_v42 = vmul.f32 %v1421_v9, %v1343_v25 }
  0xde   : > { %v1450_v21 = vadd.f32 %v360_v19, %v1143_v55  ;;  %v491_v32 = vadd.f32 %v1359_v39, %v490_v1  ;;  %vm493_vm7 = vweird.f32 %v1359_v39  ;;  %v505_v22 = vmul.f32 %v1396_v52, %v504_v27 }
  0xdf   : > { %v984_v53 = vpop.eup %983  ;;  %v608_v44 = vmul.f32 %v1428_v16, %v1357_v35  ;;  %vm492_vm8 = vweird.f32 %v1281_v48  ;;  %vm1458_vm9 = vcmp.eq.f32.partialorder %v496_v60, 8.507059e+37  ;;  %v499_v41 = vor.u32 1.1754944e-38, %v498_v5 }
  0xe0   : > { %v884_v55 = vmul.f32 -1.442695, %v1434_v20  ;;  %vm583_vm11 = vweird.f32 %v1291_v56  ;;  %vm507_vm12 = vweird.f32 %v1307_v3  ;;  %vm1465_vm13 = vcmp.eq.f32.partialorder %v511_v26, 8.507059e+37  ;;  %vm1474_vm14 = vmor %vm492_vm8, %vm493_vm7 }
  0xe1   : > { %v986_v37 = vpop.eup %985  ;;  %v514_v50 = vor.u32 1.1754944e-38, %v513_v30  ;;  %v518_v47 = vmul.f32 %v984_v53, %v1399_v43  ;;  %v594_v23 = vsub.f32 1.0, %v593_v42  ;;  %vm508_vm15 = vweird.f32 %v1396_v52 }
  0xe2   : > { %v1470_v48 = vpop.eup %987  ;;  %vm522_vm0 = vweird.f32 %v1399_v43  ;;  %v533_v54 = vmul.f32 %v986_v37, %v1403_v51  ;;  %vm582_vm1 = vweird.f32 %v1233_v59  ;;  %v495_v40 = vsel %vm1474_vm14, %v1359_v39, %v491_v32  ;;  %vm1497_vm3 = vmor %vm507_vm12, %vm508_vm15 }
  0xe3   : > { %v506_v61 = vadd.f32 %v1396_v52, %v505_v22  ;;  %v609_v62 = vsub.f32 1.0, %v608_v44  ;;  %v519_v17 = vsub.f32 1.0, %v518_v47  ;;  %v526_v46 = vand.u32 2147483647, %v1399_v43  ;;  %vm1526_vm12 = vmor %vm582_vm1, %vm583_vm11 }
  0xe4   : > { %v528_v49 = vand.u32 2147483648, %v1399_v43  ;;  %v534_v2 = vsub.f32 1.0, %v533_v54  ;;  %989 = vpow2.f32 %v884_v55  ;;  %v623_v7 = vmul.f32 %v1470_v48, %v1409_v0 }
  0xe5   : > { %v520_v8 = vmul.f32 %v984_v53, %v519_v17  ;;  %vm523_vm2 = vweird.f32 %v984_v53  ;;  %v885_v14 = vmul.f32 -1.442695, %v1450_v21  ;;  %v500_v39 = vsel %vm1458_vm9, %v499_v41, %v495_v40 }
  0xe6   : > { %v535_v12 = vmul.f32 %v986_v37, %v534_v2  ;;  %vm538_vm4 = vweird.f32 %v986_v37  ;;  %v543_v1 = vand.u32 2147483648, %v1403_v51  ;;  %v510_v27 = vsel %vm1497_vm3, %v1396_v52, %v506_v61  ;;  %vm524_vm5 = vmor %vm522_vm0, %vm523_vm2 }
  0xe7   : > { %v521_v19 = vadd.f32 %v984_v53, %v520_v8  ;;  %v541_v60 = vand.u32 2147483647, %v1403_v51  ;;  %991 = vpow2.f32 %v885_v14  ;;  %vm1506_vm6 = vcmp.eq.f32.partialorder %v586_v36, 8.507059e+37 }
  0xe8   : > { %v595_v3 = vmul.f32 %v1421_v9, %v594_v23  ;;  %v529_v26 = vor.u32 1.1754944e-38, %v528_v49  ;;  %v536_v30 = vadd.f32 %v986_v37, %v535_v12  ;;  %vm537_vm10 = vweird.f32 %v1403_v51 }
  0xe9   : > { %v671_v42 = vmul.f32 %v500_v39, %v1194_v28  ;;  %v624_v52 = vsub.f32 1.0, %v623_v7  ;;  %v525_v32 = vsel %vm524_vm5, %v984_v53, %v521_v19  ;;  %vm527_vm7 = vcmp.eq.f32.partialorder %v526_v46, 8.507059e+37  ;;  %vm539_vm8 = vmor %vm537_vm10, %vm538_vm4 }
  0xea   : > { %v990_v36 = vpop.eup %989  ;;  %v515_v22 = vsel %vm1465_vm13, %v514_v50, %v510_v27  ;;  %v530_v44 = vsel %vm527_vm7, %v529_v26, %v525_v32  ;;  %v540_v38 = vsel %vm539_vm8, %v986_v37, %v536_v30  ;;  %v544_v41 = vor.u32 1.1754944e-38, %v543_v1 }
  0xeb   : > { %v601_v43 = vand.u32 2147483647, %v1343_v25  ;;  %v610_v55 = vmul.f32 %v1428_v16, %v609_v62  ;;  %vm542_vm9 = vcmp.eq.f32.partialorder %v541_v60, 8.507059e+37  ;;  %v1520_v51 = vadd.f32 1.0, %v990_v36 }
  0xec   : > { %vm597_vm13 = vweird.f32 %v1343_v25  ;;  %v603_v53 = vand.u32 2147483648, %v1343_v25  ;;  %v673_v37 = vmul.f32 %v530_v44, %v1246_v6  ;;  %v545_v33 = vsel %vm542_vm9, %v544_v41, %v540_v38 }
  0xed   : > { %v992_v50 = vpop.eup %991  ;;  %v585_v47 = vsel %vm1526_vm12, %v1291_v56, %v1445_v18  ;;  %vm598_vm14 = vweird.f32 %v1421_v9  ;;  %v672_v59 = vmul.f32 %v515_v22, %v1200_v31  ;;  %993 = vrcp.f32 %v1520_v51 }
  0xee   : > { %v596_v23 = vadd.f32 %v1421_v9, %v595_v3  ;;  %v684_v45 = vadd.f32 %v1436_v24, %v671_v42  ;;  %v625_v54 = vmul.f32 %v1470_v48, %v624_v52  ;;  %v1543_v6 = vadd.f32 1.0, %v992_v50  ;;  %vm1561_vm0 = vmor %vm597_vm13, %vm598_vm14 }
  0xef   : > { %vm1545_vm11 = vcmp.eq.f32.partialorder %v601_v43, 8.507059e+37  ;;  %v611_v56 = vadd.f32 %v1428_v16, %v610_v55  ;;  %vm613_vm15 = vweird.f32 %v1428_v16  ;;  %v674_v31 = vmul.f32 %v545_v33, %v1251_v10 }
  0xf0   : > { %v604_v18 = vor.u32 1.1754944e-38, %v603_v53  ;;  %v618_v61 = vand.u32 2147483648, %v1357_v35  ;;  %v685_v62 = vadd.f32 %v684_v45, %v673_v37  ;;  %995 = vrcp.f32 %v1543_v6 }
  0xf1   : > { %v590_v24 = vsel %vm1506_vm6, %v1438_v4, %v585_v47  ;;  %v697_v10 = vadd.f32 %v1442_v29, %v672_v59  ;;  %vm612_vm1 = vweird.f32 %v1357_v35  ;;  %v616_v46 = vand.u32 2147483647, %v1357_v35 }
  0xf2   : > { %v600_v49 = vsel %vm1561_vm0, %v1421_v9, %v596_v23  ;;  %vm1571_vm2 = vmor %vm612_vm1, %vm613_vm15  ;;  %v626_v25 = vadd.f32 %v1470_v48, %v625_v54  ;;  %vm628_vm3 = vweird.f32 %v1470_v48  ;;  %v631_v7 = vand.u32 2147483647, %v1409_v0 }
  0xf3   : > { %v994_v2 = vpop.eup %993  ;;  %v615_v29 = vsel %vm1571_vm2, %v1428_v16, %v611_v56  ;;  %v633_v35 = vand.u32 2147483648, %v1409_v0  ;;  %v698_v8 = vadd.f32 %v697_v10, %v674_v31  ;;  %v619_v14 = vor.u32 1.1754944e-38, %v618_v61 }
  0xf4   : > { %vm627_vm4 = vweird.f32 %v1409_v0  ;;  %v686_v9 = vadd.f32 %v685_v62, %v1416_v11  ;;  %v638_v39 = vmul.f32 %v994_v2, %v1520_v51  ;;  %v677_v57 = vmul.f32 %v590_v24, %v1170_v13 }
  0xf5   : > { %v605_v12 = vsel %vm1545_vm11, %v604_v18, %v600_v49  ;;  %vm617_vm6 = vcmp.eq.f32.partialorder %v616_v46, 8.507059e+37  ;;  %vm1588_vm5 = vmor %vm627_vm4, %vm628_vm3  ;;  %v1007_v1 = vmov 64.0   ;;  %v648_v60 = vand.u32 2147483648, %v1520_v51 }
  0xf6   : > { %997 = vrcp.f32 %v1007_v1  ;;  %v996_v27 = vpop.eup %995  ;;  %v620_v19 = vsel %vm617_vm6, %v619_v14, %v615_v29  ;;  %v630_v0 = vsel %vm1588_vm5, %v1470_v48, %v626_v25  ;;  %v639_v11 = vsub.f32 1.0, %v638_v39 }
  0xf7   : > { %vm632_vm10 = vcmp.eq.f32.partialorder %v631_v7, 8.507059e+37  ;;  %v634_v13 = vor.u32 1.1754944e-38, %v633_v35  ;;  %v699_v5 = vadd.f32 %v698_v8, %v1424_v58  ;;  %v653_v3 = vmul.f32 %v996_v27, %v1543_v6 }
  0xf8   : > { %v640_v26 = vmul.f32 %v994_v2, %v639_v11  ;;  %vm643_vm7 = vweird.f32 %v994_v2  ;;  %v646_v30 = vand.u32 2147483647, %v1520_v51  ;;  %v687_v42 = vadd.f32 %v686_v9, %v677_v57 }
  0xf9   : > { %v678_v52 = vmul.f32 %v605_v12, %v1206_v34  ;;  %v679_v32 = vmul.f32 %v620_v19, %v1239_v63  ;;  %v635_v36 = vsel %vm632_vm10, %v634_v13, %v630_v0  ;;  %v654_v48 = vsub.f32 1.0, %v653_v3 }
  0xfa   : > { %v641_v22 = vadd.f32 %v994_v2, %v640_v26  ;;  %vm642_vm8 = vweird.f32 %v1520_v51  ;;  %v649_v44 = vor.u32 1.1754944e-38, %v648_v60  ;;  %v663_v38 = vand.u32 2147483648, %v1543_v6 }
  0xfb   : > { %vm644_vm9 = vmor %vm642_vm8, %vm643_vm7  ;;  %v655_v41 = vmul.f32 %v996_v27, %v654_v48  ;;  %vm658_vm12 = vweird.f32 %v996_v27  ;;  %v661_v43 = vand.u32 2147483647, %v1543_v6  ;;  %v700_v55 = vadd.f32 %v699_v5, %v678_v52 }
  0xfc   : > { %v998_v58 = vpop.eup %997  ;;  %v645_v28 = vsel %vm644_vm9, %v994_v2, %v641_v22  ;;  %vm647_vm13 = vcmp.eq.f32.partialorder %v646_v30, 8.507059e+37  ;;  %v688_v34 = vadd.f32 %v687_v42, %v679_v32  ;;  %v680_v63 = vmul.f32 %v635_v36, %v1257_v15 }
  0xfd   : > { %v650_v53 = vsel %vm647_vm13, %v649_v44, %v645_v28  ;;  %v656_v37 = vadd.f32 %v996_v27, %v655_v41  ;;  %vm657_vm14 = vweird.f32 %v1543_v6  ;;  %v710_v33 = vmul.f32 64.0, %v998_v58 }
  0xfe   : > { %v681_v51 = vmul.f32 %v650_v53, %v1434_v20  ;;  %vm659_vm11 = vmor %vm657_vm14, %vm658_vm12  ;;  %v664_v50 = vor.u32 1.1754944e-38, %v663_v38  ;;  %vm662_vm15 = vcmp.eq.f32.partialorder %v661_v43, 8.507059e+37  ;;  %v701_v59 = vadd.f32 %v700_v55, %v680_v63 }
  0xff   : > { %v660_v47 = vsel %vm659_vm11, %v996_v27, %v656_v37  ;;  %v711_v15 = vsub.f32 1.0, %v710_v33  ;;  %vm714_vm0 = vweird.f32 %v998_v58  ;;  %v724_v2 = vlaneseq }
 0x100   : > { %v689_v23 = vadd.f32 %v688_v34, %v681_v51  ;;  %v665_v45 = vsel %vm662_vm15, %v664_v50, %v660_v47  ;;  %vm721_vm1 = vcmask 1040384  }
 0x101   : > { %v682_v54 = vmul.f32 %v665_v45, %v1450_v21  ;;  %v712_v61 = vmul.f32 %v998_v58, %v711_v15  ;;  %vm726_vm2 = vcmp.lt.s32.totalorder %v724_v2, 256 }
 0x102   : > { %v690_v40 = vrot.slane %v689_v23, 4 }
 0x103   : > { %v702_v56 = vadd.f32 %v701_v59, %v682_v54  ;;  %v713_v17 = vadd.f32 %v998_v58, %v712_v61 }
 0x104   : > { %v691_v31 = vadd.f32 %v690_v40, %v689_v23 }
 0x105   : > { %v703_v18 = vrot.slane %v702_v56, 4  ;;  %v715_v4 = vsel %vm714_vm0, %v998_v58, %v713_v17 }
 0x106   : > { %v692_v6 = vrot.slane %v691_v31, 2 }
 0x107   : > { %v704_v20 = vadd.f32 %v703_v18, %v702_v56 }
 0x108   : > { %v693_v62 = vadd.f32 %v692_v6, %v691_v31 }
 0x109   : > { %v705_v24 = vrot.slane %v704_v20, 2 }
 0x10a   : > { %v694_v10 = vrot.slane %v693_v62, 1 }
 0x10b   : > { %v706_v46 = vadd.f32 %v705_v24, %v704_v20 }
 0x10c   : > { %v695_v21 = vadd.f32 %v694_v10, %v693_v62 }
 0x10d   : > { %v707_v49 = vrot.slane %v706_v46, 1 }
 0x10e   : > { %v716_v7 = vmul.f32 %v715_v4, %v695_v21 }
 0x10f   : > { %v708_v25 = vadd.f32 %v707_v49, %v706_v46 }
 0x111   : > { %v717_v29 = vmul.f32 %v715_v4, %v708_v25 }
 0x113   : > { %v720_v35 = vrot.slane %v717_v29, 7 }
 0x115   : > { %v722_v8 = vsel %vm721_vm1, %v716_v7, %v720_v35 }
 0x116   : > { %728 = vst.msk [vmem:[%s170_s11] sm:$0x3] %vm726_vm2, %v722_v8 }
 0x117 PF: > { %s13_s12 = sadd.s32 1, %s1005_s12  }
 0x118   : > { %p10_p5 = scmp.ge.s32.totalorder %s13_s12, 4  }
 0x11a   :  { %12 = sbr.rel (!%p10_p5) target bundleno = 1 (0x1), region = 62 }

// kernel: efficientnet_b3_forward.21
= control target key start
LH: loop header
LB: loop body
LE: loop exit
PB: predicated region body
PF: predicated region fallthrough
CT: control target
= control target key end

     0   :  { %s383_s0 = inlined_call_operand.vmem [shape: bf16[2,256], index: 0, kind: input, shape index: {}]   ;;  %s384_s1 = inlined_call_operand.vmem [shape: bf16[256,128], index: 1, kind: input, shape index: {}]   ;;  %s385_s2 = inlined_call_operand.vmem [shape: f32[1,128], index: 2, kind: input, shape index: {}]   ;;  %s386_s3 = inlined_call_operand.hbm [shape: f32[2,128], index: 3, kind: output, shape index: {}]  }
   0x1   :  { %v268_v0 = vld [vmem:[%s384_s1 + $0x38] sm:$0xff]  ;;  %v267_v2 = vld [vmem:[%s384_s1 + $0x30] sm:$0xff]  ;;  %v15_v4 = vld [vmem:[%s383_s0] sm:$0x3] }
   0x2   :  { %v276_v1 = vld [vmem:[%s384_s1 + $0x78] sm:$0xff]  ;;  %154 = vmatpush.bf16.msra.mxu0 %v268_v0  ;;  %v275_v3 = vld [vmem:[%s384_s1 + $0x70] sm:$0xff]  ;;  %v266_v5 = vld [vmem:[%s384_s1 + $0x28] sm:$0xff]  ;;  %53 = vst [vmem:[#allocation1] ss:$9 sm:$0xff] %v15_v4 }
   0x3   :  { %167 = vmatpush.bf16.msra.mxu1 %v276_v1  ;;  %v274_v6 = vld [vmem:[%s384_s1 + $0x68] sm:$0xff] }
   0x6   :  { %155 = vmatpush.bf16.msra.mxu0 %v267_v2 }
   0x7   :  { %168 = vmatpush.bf16.msra.mxu1 %v275_v3 }
   0x8   :  { %8 = vsyncpa [#allocation3], 0  ;;  %v265_v7 = vld [vmem:[%s384_s1 + $0x20] sm:$0xff]  ;;  %v264_v9 = vld [vmem:[%s384_s1 + $0x18] sm:$0xff]  ;;  %s305_s20 = smov [#allocation2]   ;;  %s188_s24 = sshll.u32 %s386_s3, 4  ;;  %s189_s24 = int_to_ptr.hbm [resolvable:$true] %s188_s24 }
   0x9   :  { %v273_v8 = vld [vmem:[%s384_s1 + $0x60] sm:$0xff]  ;;  %v272_v10 = vld [vmem:[%s384_s1 + $0x58] sm:$0xff]  ;;  %v263_v11 = vld [vmem:[%s384_s1 + $0x10] sm:$0xff]  ;;  %s186_s21 = sshll.u32 %s305_s20, 4  ;;  %s187_s21 = int_to_ptr.vmem [resolvable:$true] %s186_s21 }
   0xa   :  { %156 = vmatpush.bf16.msra.mxu0 %v266_v5  ;;  %v271_v12 = vld [vmem:[%s384_s1 + $0x50] sm:$0xff]  ;;  %v262_v13 = vld [vmem:[%s384_s1 + $0x8] sm:$0xff]  ;;  %v261_v15 = vld [vmem:[%s384_s1] sm:$0xff] }
   0xb   :  { %169 = vmatpush.bf16.msra.mxu1 %v274_v6  ;;  %v270_v14 = vld [vmem:[%s384_s1 + $0x48] sm:$0xff]  ;;  %v269_v16 = vld [vmem:[%s384_s1 + $0x40] sm:$0xff] }
   0xc   :  { %v54_v17 = vld [vmem:[#allocation1] sm:$0xff]  ;;  %v55_v18 = vld [vmem:[#allocation1 + $0x9] sm:$0xff] }
   0xd   :  { %v278_v19 = vld [vmem:[%s385_s2] ss:$0 sm:$0xff] }
   0xe   :  { %157 = vmatpush.bf16.msra.mxu0 %v265_v7 }
   0xf   :  { %170 = vmatpush.bf16.msra.mxu1 %v273_v8 }
  0x12   :  { %158 = vmatpush.bf16.msra.mxu0 %v264_v9 }
  0x13   :  { %171 = vmatpush.bf16.msra.mxu1 %v272_v10 }
  0x16   :  { %159 = vmatpush.bf16.msra.mxu0 %v263_v11 }
  0x17   :  { %172 = vmatpush.bf16.msra.mxu1 %v271_v12 }
  0x1a   :  { %160 = vmatpush.bf16.msra.mxu0 %v262_v13 }
  0x1b   :  { %173 = vmatpush.bf16.msra.mxu1 %v270_v14 }
  0x1e   :  { %161 = vmatpush.bf16.msra.mxu0 %v261_v15 }
  0x1f   :  { %174 = vmatpush.bf16.msra.mxu1 %v269_v16 }
  0x21   :  { %162 = vmatmul.bf16.vlgmr.msra.gmra.mxu0 %v54_v17 }
  0x22   :  { %175 = vmatmul.bf16.vlgmr.msra.gmra.mxu1 %v55_v18 }
  0x9e   :  { %v163_v20 = vpop.f32.mrf.mxu0 }
  0x9f   :  { %v176_v21 = vpop.f32.mrf.mxu1  ;;  %v164_v22 = vadd.f32 %v278_v19, %v163_v20 }
  0xa1   :  { %v177_v23 = vadd.f32 %v176_v21, %v164_v22 }
  0xa3   :  { %180 = vst [vmem:[#allocation2] sm:$0x3] %v177_v23 }
  0xa4   :  { %191 = dma.vmem_to_hbm [thread:$0]  %s187_s21, 32, %s189_s24, [#allocation3]  }
  0xa6   :  { %v165_v24 = vpop.f32.mrf.mxu0 }
  0xa7   :  { %v178_v25 = vpop.f32.mrf.mxu1 }
  0xa8   :  { %303 = dma.done.wait [#allocation3], 32  }
  0xa9   :  { %304 = vsyncadd [#allocation3], 4294967264 }
  0xaa   :  { %196 = vsyncpa [#allocation3], 1 }

</bundles_post_ra>
